<compile_context>
chip_gen: v5e
topology: v5e:2x2
jax: 0.10.0
libtpu: 0.0.40
codegen_flags: <defaults>
</compile_context>

<pallas_src>
import functools

import jax
import jax.numpy as jnp
from jax.experimental import pallas as pl
from jax.experimental.pallas import tpu as pltpu

# Pin matmul precision so the in-kernel dots and the pure-JAX reference use
# the same full-f32 MXU path (default bf16 matmul precision would otherwise
# introduce few-e-3 discrepancies between the two).
jax.config.update("jax_default_matmul_precision", "highest")


# ----------------------------------------------------------------------------
# In-kernel compute for one GAT layer (all heads batched).
# ----------------------------------------------------------------------------
def _gat_layer_compute(x, mask, rhs, a_src_blk, a_tgt_blk, bias, *,
                       num_heads, f_out, concat, elu, same_dim):
    H, F_out = num_heads, f_out
    N = x.shape[0]
    hf = H * F_out

    # Single MXU pass: per-head projections (first hf columns) and the packed
    # skip-projection terms (remaining columns, if any).
    both = jnp.dot(x, rhs, preferred_element_type=jnp.float32)      # (N, hf[+skip])
    proj = both[:, :hf]                                             # (N, H*F_out)

    # Head-batched attention scores straight off the MXU, already oriented as
    # (H, N, 1) (source, varies over queries) and (H, 1, N) (target, varies
    # over keys) -- no in-kernel transposes / cross-lane reductions needed.
    projb = jnp.broadcast_to(proj[None, :, :], (H, N, hf))
    s_src = jnp.einsum("hnk,hkp->hnp", projb, a_src_blk,
                       preferred_element_type=jnp.float32)          # (H, N, 1)
    s_tgt = jnp.einsum("hpk,hnk->hpn", a_tgt_blk, projb,
                       preferred_element_type=jnp.float32)          # (H, 1, N)

    scores = s_src + s_tgt                                          # (H, N, N)
    scores = jnp.maximum(scores, 0.2 * scores)                      # LeakyReLU(0.2)
    scores = scores + mask[None, :, :]

    # Numerically-stable softmax over keys, batched over all heads. Exact
    # division (no approx reciprocal) for parity with the reference.
    scores = scores - jnp.max(scores, axis=-1, keepdims=True)
    e = jnp.exp(scores)
    attn = e / jnp.sum(e, axis=-1, keepdims=True)                   # (H, N, N)

    # Per-head neighbourhood aggregation (H is small & static: unrolled dots).
    outs = [jnp.dot(attn[h], proj[:, h * F_out:(h + 1) * F_out],
                    preferred_element_type=jnp.float32)
            for h in range(H)]                                      # H x (N, F_out)

    if concat:
        out = jnp.concatenate(outs, axis=-1)                        # (N, H*F_out)
        # Skip connection: one full-width add of the packed skip columns.
        out = out + (jnp.tile(x, (1, H)) if same_dim else both[:, hf:2 * hf])
    else:
        out = outs[0]
        for o in outs[1:]:
            out = out + o
        out = out * (1.0 / H)                                       # mean over heads
        # Skip weights were pre-averaged over heads in the wrapper.
        out = out + (x if same_dim else both[:, hf:hf + F_out])

    out = out + bias
    if elu:
        out = jnp.where(out > 0, out, jnp.exp(out) - 1.0)
    return out


def _make_fused_gat_kernel(layer_cfgs):
    """Kernel body chaining all GAT layers inside one pallas_call."""
    def kernel(*refs):
        x = refs[0][...]                       # (N, F_in0)
        mask = refs[1][...]                    # (N, N)
        out_ref = refs[-1]
        base = 2
        for li, cfg in enumerate(layer_cfgs):
            rhs = refs[base + 4 * li][...]
            a_src_blk = refs[base + 4 * li + 1][...]
            a_tgt_blk = refs[base + 4 * li + 2][...]
            bias = refs[base + 4 * li + 3][...]
            x = _gat_layer_compute(x, mask, rhs, a_src_blk, a_tgt_blk, bias, **cfg)
        out_ref[...] = x.astype(out_ref.dtype)
    return kernel


# ----------------------------------------------------------------------------
# Forward pass: a single gridless pallas_call over all (pre-packed) layers.
# ----------------------------------------------------------------------------
def gat_forward(x, mask, packed_layers):
    inputs = [x, mask]
    cfgs = []
    for p in packed_layers:
        inputs += [p["rhs"], p["a_src_blk"], p["a_tgt_blk"], p["bias"]]
        cfgs.append(p["cfg"])

    N = x.shape[0]
    out_dim = packed_layers[-1]["out_dim"]
    kernel = _make_fused_gat_kernel(tuple(cfgs))

    vmem_spec = pl.BlockSpec(memory_space=pltpu.MemorySpace.VMEM)
    out = pl.pallas_call(
        kernel,
        out_shape=jax.ShapeDtypeStruct((N, out_dim), jnp.float32),
        in_specs=[vmem_spec] * len(inputs),
        out_specs=vmem_spec,
    )(*inputs)
    return out, mask


# ----------------------------------------------------------------------------
# One-time parameter packing (off the forward path).
# ----------------------------------------------------------------------------
def pack_gat_params(layer_params):
    packed = []
    for p in layer_params:
        W = p["proj"]                                   # (H, F_in, F_out)
        H, F_in, F_out = W.shape
        hf = H * F_out
        concat = p["concat"]
        same_dim = (F_in == F_out)

        # Pack per-head projection (and skip) weights into one lane-dense RHS.
        w_all = jnp.transpose(W, (1, 0, 2)).reshape(F_in, hf)
        if same_dim:
            rhs = w_all                                  # skip term is x itself
        elif concat:
            skip_all = jnp.transpose(p["skip"], (1, 0, 2)).reshape(F_in, hf)
            rhs = jnp.concatenate([w_all, skip_all], axis=-1)       # (F_in, 2*hf)
        else:
            skip_mean = jnp.mean(p["skip"], axis=0)                 # (F_in, F_out)
            rhs = jnp.concatenate([w_all, skip_mean], axis=-1)      # (F_in, hf+F_out)

        # Block-structured scoring weights: head-batched MXU matmuls against
        # these give the per-head scores already batched on the leading axis.
        a_src = p["a_src"].reshape(H, F_out)
        a_tgt = p["a_tgt"].reshape(H, F_out)
        a_src_blk = jnp.zeros((H, hf, 1), jnp.float32)
        a_tgt_blk = jnp.zeros((H, 1, hf), jnp.float32)
        for h in range(H):
            a_src_blk = a_src_blk.at[h, h * F_out:(h + 1) * F_out, 0].set(a_src[h])
            a_tgt_blk = a_tgt_blk.at[h, 0, h * F_out:(h + 1) * F_out].set(a_tgt[h])

        out_dim = hf if concat else F_out
        packed.append(dict(
            rhs=rhs,
            a_src_blk=a_src_blk,
            a_tgt_blk=a_tgt_blk,
            bias=p["bias"].reshape(1, out_dim),
            out_dim=out_dim,
            cfg=dict(num_heads=H, f_out=F_out, concat=concat,
                     elu=(p["activation"] == "elu"), same_dim=same_dim),
        ))
    return packed


# ----------------------------------------------------------------------------
# Pure-JAX reference (mirrors the PyTorch forward exactly, dropout = identity).
# ----------------------------------------------------------------------------
def _gat_layer_ref(x, mask, p):
    prec = jax.lax.Precision.HIGHEST
    H, F_in, F_out = p["proj"].shape
    proj = jnp.einsum("nf,hfo->hno", x, p["proj"], precision=prec)   # (H, N, F_out)
    s_src = jnp.sum(proj * p["a_src"], axis=-1, keepdims=True)       # (H, N, 1)
    s_tgt = jnp.sum(proj * p["a_tgt"], axis=-1, keepdims=True)       # (H, N, 1)
    scores = s_src + jnp.transpose(s_tgt, (0, 2, 1))
    scores = jnp.where(scores >= 0, scores, 0.2 * scores) + mask
    attn = jax.nn.softmax(scores, axis=-1)
    out = jnp.einsum("hnm,hmo->hno", attn, proj, precision=prec)
    out = jnp.transpose(out, (1, 0, 2))                              # (N, H, F_out)
    if F_out == x.shape[-1]:
        out = out + x[:, None, :]
    else:
        out = out + jnp.einsum("nf,hfo->nho", x, p["skip"], precision=prec)
    if p["concat"]:
        out = out.reshape(x.shape[0], H * F_out)
    else:
        out = out.mean(axis=1)
    out = out + p["bias"]
    if p["activation"] == "elu":
        out = jnp.where(out > 0, out, jnp.exp(out) - 1.0)
    return out


def gat_forward_ref(x, mask, layer_params):
    for p in layer_params:
        x = _gat_layer_ref(x, mask, p)
    return x, mask


# ----------------------------------------------------------------------------
# Deterministic parameter init (xavier-uniform style, bias = 0).
# ----------------------------------------------------------------------------
def _glorot(key, shape):
    fan_in, fan_out = shape[-2], shape[-1]
    limit = (6.0 / (fan_in + fan_out)) ** 0.5
    return jax.random.uniform(key, shape, jnp.float32, -limit, limit)


def init_gat_params(key, num_of_layers, num_heads_per_layer, num_features_per_layer):
    heads = [1] + list(num_heads_per_layer)
    layers = []
    for i in range(num_of_layers):
        f_in = num_features_per_layer[i] * heads[i]
        f_out = num_features_per_layer[i + 1]
        h = heads[i + 1]
        concat = i < num_of_layers - 1
        key, k1, k2, k3, k4 = jax.random.split(key, 5)
        layers.append(dict(
            proj=_glorot(k1, (h, f_in, f_out)),
            a_src=_glorot(k2, (h, 1, f_out)),
            a_tgt=_glorot(k3, (h, 1, f_out)),
            # nn.Linear(f_in, h*f_out).weight is (h*f_out, f_in); stored here
            # pre-transposed per head as (h, f_in, f_out).
            skip=_glorot(k4, (h, f_in, f_out)),
            bias=jnp.zeros((h * f_out,) if concat else (f_out,), jnp.float32),
            concat=concat,
            activation="elu" if concat else None,
        ))
    return layers


# ----------------------------------------------------------------------------
if __name__ == "__main__":
    # GAT arch: 2 layers, 4 heads each, features 16 -> 8 -> 8.
    num_of_layers = 2
    num_heads_per_layer = [4, 4]
    num_features_per_layer = [16, 8, 8]
    N = 16  # number of graph nodes

    key = jax.random.PRNGKey(0)
    key, kx, kp = jax.random.split(key, 3)

    x = jax.random.normal(kx, (N, num_features_per_layer[0]), jnp.float32)

    # Deterministic connectivity: ring graph (both directions) + self loops.
    ids = jnp.arange(N)
    adj = ((ids[:, None] == ids[None, :]) |
           (((ids[:, None] + 1) % N) == ids[None, :]) |
           (((ids[:, None] - 1) % N) == ids[None, :]))
    connectivity_mask = jnp.where(adj, 0.0, -1e9).astype(jnp.float32)

    layer_params = init_gat_params(kp, num_of_layers, num_heads_per_layer,
                                   num_features_per_layer)
    packed_params = pack_gat_params(layer_params)   # one-time packing

    out, _ = gat_forward(x, connectivity_mask, packed_params)
    out = jax.block_until_ready(out)

    ref, _ = gat_forward_ref(x, connectivity_mask, layer_params)
    ref = jax.block_until_ready(ref)

    assert out.shape == (N, num_features_per_layer[-1]), out.shape
    err = float(jnp.max(jnp.abs(out - ref)))
    assert jnp.allclose(out, ref, atol=2e-3, rtol=2e-3), err
    print("KERNEL_OK")
</pallas_src>

<mosaic_0001>
module attributes {stable_mosaic.version = 11 : i64} {
  func.func @kernel(%arg0: memref<16x16xf32, #tpu.memory_space<vmem>>, %arg1: memref<16x16xf32, #tpu.memory_space<vmem>>, %arg2: memref<16x64xf32, #tpu.memory_space<vmem>>, %arg3: memref<4x32x1xf32, #tpu.memory_space<vmem>>, %arg4: memref<4x1x32xf32, #tpu.memory_space<vmem>>, %arg5: memref<1x32xf32, #tpu.memory_space<vmem>>, %arg6: memref<32x40xf32, #tpu.memory_space<vmem>>, %arg7: memref<4x32x1xf32, #tpu.memory_space<vmem>>, %arg8: memref<4x1x32xf32, #tpu.memory_space<vmem>>, %arg9: memref<1x8xf32, #tpu.memory_space<vmem>>, %arg10: memref<16x8xf32, #tpu.memory_space<vmem>>) attributes {dimension_semantics = [], scalar_prefetch = 0 : i64, scratch_operands = 0 : i64, tpu.core_type = #tpu.core_type<tc>} {
    %c0 = arith.constant 0 : index
    %c0_0 = arith.constant 0 : index
    %0 = vector.load %arg0[%c0, %c0_0] : memref<16x16xf32, #tpu.memory_space<vmem>>, vector<16x16xf32>
    %c0_1 = arith.constant 0 : index
    %c0_2 = arith.constant 0 : index
    %1 = vector.load %arg1[%c0_1, %c0_2] : memref<16x16xf32, #tpu.memory_space<vmem>>, vector<16x16xf32>
    %c0_3 = arith.constant 0 : index
    %c0_4 = arith.constant 0 : index
    %2 = vector.load %arg2[%c0_3, %c0_4] : memref<16x64xf32, #tpu.memory_space<vmem>>, vector<16x64xf32>
    %c0_5 = arith.constant 0 : index
    %c0_6 = arith.constant 0 : index
    %c0_7 = arith.constant 0 : index
    %3 = vector.load %arg3[%c0_5, %c0_6, %c0_7] : memref<4x32x1xf32, #tpu.memory_space<vmem>>, vector<4x32x1xf32>
    %c0_8 = arith.constant 0 : index
    %c0_9 = arith.constant 0 : index
    %c0_10 = arith.constant 0 : index
    %4 = vector.load %arg4[%c0_8, %c0_9, %c0_10] : memref<4x1x32xf32, #tpu.memory_space<vmem>>, vector<4x1x32xf32>
    %c0_11 = arith.constant 0 : index
    %c0_12 = arith.constant 0 : index
    %5 = vector.load %arg5[%c0_11, %c0_12] : memref<1x32xf32, #tpu.memory_space<vmem>>, vector<1x32xf32>
    %cst = arith.constant dense<0.000000e+00> : vector<16x64xf32>
    %6 = tpu.matmul %0, %2, %cst {dimension_numbers = #tpu.dot_dimension_numbers<[1], [0], [0], [1], [0, 0, 1, 1], [], []>, precision = #tpu.contract_precision<fp32>} : vector<16x16xf32>, vector<16x64xf32>, vector<16x64xf32> -> vector<16x64xf32>
    %7 = vector.extract_strided_slice %6 {offsets = [0, 0], sizes = [16, 32], strides = [1, 1]} : vector<16x64xf32> to vector<16x32xf32>
    %8 = vector.shape_cast %7 : vector<16x32xf32> to vector<1x16x32xf32>
    %9 = vector.shape_cast %8 : vector<1x16x32xf32> to vector<1x16x32xf32>
    %10 = vector.broadcast %9 : vector<1x16x32xf32> to vector<4x16x32xf32>
    "tpu.trace_start"() <{level = 10 : i32, message = "hnk,hkp->hnp"}> : () -> ()
    %cst_13 = arith.constant dense<0.000000e+00> : vector<4x16x1xf32>
    %11 = tpu.matmul %10, %3, %cst_13 {dimension_numbers = #tpu.dot_dimension_numbers<[2], [1], [1], [2], [0, 0, 0, 1, 1, 2], [0], [0]>, precision = #tpu.contract_precision<fp32>} : vector<4x16x32xf32>, vector<4x32x1xf32>, vector<4x16x1xf32> -> vector<4x16x1xf32>
    "tpu.trace_stop"() : () -> ()
    "tpu.trace_start"() <{level = 10 : i32, message = "hpk,hnk->hpn"}> : () -> ()
    %cst_14 = arith.constant dense<0.000000e+00> : vector<4x1x16xf32>
    %12 = tpu.matmul %4, %10, %cst_14 {dimension_numbers = #tpu.dot_dimension_numbers<[2], [2], [1], [1], [0, 0, 0, 1, 1, 1], [0], [0]>, precision = #tpu.contract_precision<fp32>} : vector<4x1x32xf32>, vector<4x16x32xf32>, vector<4x1x16xf32> -> vector<4x1x16xf32>
    "tpu.trace_stop"() : () -> ()
    %13 = vector.broadcast %11 : vector<4x16x1xf32> to vector<4x16x16xf32>
    %14 = vector.broadcast %12 : vector<4x1x16xf32> to vector<4x16x16xf32>
    %15 = arith.addf %13, %14 : vector<4x16x16xf32>
    %cst_15 = arith.constant 2.000000e-01 : f32
    %16 = vector.broadcast %cst_15 : f32 to vector<4x16x16xf32>
    %17 = arith.mulf %16, %15 : vector<4x16x16xf32>
    %18 = arith.maximumf %15, %17 : vector<4x16x16xf32>
    %19 = vector.shape_cast %1 : vector<16x16xf32> to vector<1x16x16xf32>
    %20 = vector.broadcast %19 : vector<1x16x16xf32> to vector<4x16x16xf32>
    %21 = arith.addf %18, %20 : vector<4x16x16xf32>
    %cst_16 = arith.constant dense<0xFF800000> : vector<4x16xf32>
    %22 = vector.multi_reduction <maximumf>, %21, %cst_16 [2] : vector<4x16x16xf32> to vector<4x16xf32>
    %23 = vector.shape_cast %22 : vector<4x16xf32> to vector<4x16x1xf32>
    %24 = vector.broadcast %23 : vector<4x16x1xf32> to vector<4x16x16xf32>
    %25 = arith.subf %21, %24 : vector<4x16x16xf32>
    %26 = math.exp %25 : vector<4x16x16xf32>
    %cst_17 = arith.constant dense<0.000000e+00> : vector<4x16xf32>
    %27 = vector.multi_reduction <add>, %26, %cst_17 [2] : vector<4x16x16xf32> to vector<4x16xf32>
    %28 = vector.shape_cast %27 : vector<4x16xf32> to vector<4x16x1xf32>
    %29 = vector.broadcast %28 : vector<4x16x1xf32> to vector<4x16x16xf32>
    %30 = arith.divf %26, %29 : vector<4x16x16xf32>
    %31 = vector.extract_strided_slice %30 {offsets = [0, 0, 0], sizes = [1, 16, 16], strides = [1, 1, 1]} : vector<4x16x16xf32> to vector<1x16x16xf32>
    %32 = vector.shape_cast %31 : vector<1x16x16xf32> to vector<16x16xf32>
    %33 = vector.extract_strided_slice %7 {offsets = [0, 0], sizes = [16, 8], strides = [1, 1]} : vector<16x32xf32> to vector<16x8xf32>
    %cst_18 = arith.constant dense<0.000000e+00> : vector<16x8xf32>
    %34 = tpu.matmul %32, %33, %cst_18 {dimension_numbers = #tpu.dot_dimension_numbers<[1], [0], [0], [1], [0, 0, 1, 1], [], []>, precision = #tpu.contract_precision<fp32>} : vector<16x16xf32>, vector<16x8xf32>, vector<16x8xf32> -> vector<16x8xf32>
    %35 = vector.extract_strided_slice %30 {offsets = [1, 0, 0], sizes = [1, 16, 16], strides = [1, 1, 1]} : vector<4x16x16xf32> to vector<1x16x16xf32>
    %36 = vector.shape_cast %35 : vector<1x16x16xf32> to vector<16x16xf32>
    %37 = vector.extract_strided_slice %7 {offsets = [0, 8], sizes = [16, 8], strides = [1, 1]} : vector<16x32xf32> to vector<16x8xf32>
    %cst_19 = arith.constant dense<0.000000e+00> : vector<16x8xf32>
    %38 = tpu.matmul %36, %37, %cst_19 {dimension_numbers = #tpu.dot_dimension_numbers<[1], [0], [0], [1], [0, 0, 1, 1], [], []>, precision = #tpu.contract_precision<fp32>} : vector<16x16xf32>, vector<16x8xf32>, vector<16x8xf32> -> vector<16x8xf32>
    %39 = vector.extract_strided_slice %30 {offsets = [2, 0, 0], sizes = [1, 16, 16], strides = [1, 1, 1]} : vector<4x16x16xf32> to vector<1x16x16xf32>
    %40 = vector.shape_cast %39 : vector<1x16x16xf32> to vector<16x16xf32>
    %41 = vector.extract_strided_slice %7 {offsets = [0, 16], sizes = [16, 8], strides = [1, 1]} : vector<16x32xf32> to vector<16x8xf32>
    %cst_20 = arith.constant dense<0.000000e+00> : vector<16x8xf32>
    %42 = tpu.matmul %40, %41, %cst_20 {dimension_numbers = #tpu.dot_dimension_numbers<[1], [0], [0], [1], [0, 0, 1, 1], [], []>, precision = #tpu.contract_precision<fp32>} : vector<16x16xf32>, vector<16x8xf32>, vector<16x8xf32> -> vector<16x8xf32>
    %43 = vector.extract_strided_slice %30 {offsets = [3, 0, 0], sizes = [1, 16, 16], strides = [1, 1, 1]} : vector<4x16x16xf32> to vector<1x16x16xf32>
    %44 = vector.shape_cast %43 : vector<1x16x16xf32> to vector<16x16xf32>
    %45 = vector.extract_strided_slice %7 {offsets = [0, 24], sizes = [16, 8], strides = [1, 1]} : vector<16x32xf32> to vector<16x8xf32>
    %cst_21 = arith.constant dense<0.000000e+00> : vector<16x8xf32>
    %46 = tpu.matmul %44, %45, %cst_21 {dimension_numbers = #tpu.dot_dimension_numbers<[1], [0], [0], [1], [0, 0, 1, 1], [], []>, precision = #tpu.contract_precision<fp32>} : vector<16x16xf32>, vector<16x8xf32>, vector<16x8xf32> -> vector<16x8xf32>
    %47 = tpu.concatenate %34, %38, %42, %46 in 1 : vector<16x8xf32>, vector<16x8xf32>, vector<16x8xf32>, vector<16x8xf32> -> vector<16x32xf32>
    %48 = vector.extract_strided_slice %6 {offsets = [0, 32], sizes = [16, 32], strides = [1, 1]} : vector<16x64xf32> to vector<16x32xf32>
    %49 = arith.addf %47, %48 : vector<16x32xf32>
    %50 = vector.broadcast %5 : vector<1x32xf32> to vector<16x32xf32>
    %51 = arith.addf %49, %50 : vector<16x32xf32>
    %cst_22 = arith.constant 0.000000e+00 : f32
    %52 = vector.broadcast %cst_22 : f32 to vector<16x32xf32>
    %53 = arith.cmpf ogt, %51, %52 : vector<16x32xf32>
    %54 = math.exp %51 : vector<16x32xf32>
    %cst_23 = arith.constant 1.000000e+00 : f32
    %55 = vector.broadcast %cst_23 : f32 to vector<16x32xf32>
    %56 = arith.subf %54, %55 : vector<16x32xf32>
    %57 = arith.select %53, %51, %56 : vector<16x32xi1>, vector<16x32xf32>
    %c0_24 = arith.constant 0 : index
    %c0_25 = arith.constant 0 : index
    %58 = vector.load %arg6[%c0_24, %c0_25] : memref<32x40xf32, #tpu.memory_space<vmem>>, vector<32x40xf32>
    %c0_26 = arith.constant 0 : index
    %c0_27 = arith.constant 0 : index
    %c0_28 = arith.constant 0 : index
    %59 = vector.load %arg7[%c0_26, %c0_27, %c0_28] : memref<4x32x1xf32, #tpu.memory_space<vmem>>, vector<4x32x1xf32>
    %c0_29 = arith.constant 0 : index
    %c0_30 = arith.constant 0 : index
    %c0_31 = arith.constant 0 : index
    %60 = vector.load %arg8[%c0_29, %c0_30, %c0_31] : memref<4x1x32xf32, #tpu.memory_space<vmem>>, vector<4x1x32xf32>
    %c0_32 = arith.constant 0 : index
    %c0_33 = arith.constant 0 : index
    %61 = vector.load %arg9[%c0_32, %c0_33] : memref<1x8xf32, #tpu.memory_space<vmem>>, vector<1x8xf32>
    %cst_34 = arith.constant dense<0.000000e+00> : vector<16x40xf32>
    %62 = tpu.matmul %57, %58, %cst_34 {dimension_numbers = #tpu.dot_dimension_numbers<[1], [0], [0], [1], [0, 0, 1, 1], [], []>, precision = #tpu.contract_precision<fp32>} : vector<16x32xf32>, vector<32x40xf32>, vector<16x40xf32> -> vector<16x40xf32>
    %63 = vector.extract_strided_slice %62 {offsets = [0, 0], sizes = [16, 32], strides = [1, 1]} : vector<16x40xf32> to vector<16x32xf32>
    %64 = vector.shape_cast %63 : vector<16x32xf32> to vector<1x16x32xf32>
    %65 = vector.shape_cast %64 : vector<1x16x32xf32> to vector<1x16x32xf32>
    %66 = vector.broadcast %65 : vector<1x16x32xf32> to vector<4x16x32xf32>
    "tpu.trace_start"() <{level = 10 : i32, message = "hnk,hkp->hnp"}> : () -> ()
    %cst_35 = arith.constant dense<0.000000e+00> : vector<4x16x1xf32>
    %67 = tpu.matmul %66, %59, %cst_35 {dimension_numbers = #tpu.dot_dimension_numbers<[2], [1], [1], [2], [0, 0, 0, 1, 1, 2], [0], [0]>, precision = #tpu.contract_precision<fp32>} : vector<4x16x32xf32>, vector<4x32x1xf32>, vector<4x16x1xf32> -> vector<4x16x1xf32>
    "tpu.trace_stop"() : () -> ()
    "tpu.trace_start"() <{level = 10 : i32, message = "hpk,hnk->hpn"}> : () -> ()
    %cst_36 = arith.constant dense<0.000000e+00> : vector<4x1x16xf32>
    %68 = tpu.matmul %60, %66, %cst_36 {dimension_numbers = #tpu.dot_dimension_numbers<[2], [2], [1], [1], [0, 0, 0, 1, 1, 1], [0], [0]>, precision = #tpu.contract_precision<fp32>} : vector<4x1x32xf32>, vector<4x16x32xf32>, vector<4x1x16xf32> -> vector<4x1x16xf32>
    "tpu.trace_stop"() : () -> ()
    %69 = vector.broadcast %67 : vector<4x16x1xf32> to vector<4x16x16xf32>
    %70 = vector.broadcast %68 : vector<4x1x16xf32> to vector<4x16x16xf32>
    %71 = arith.addf %69, %70 : vector<4x16x16xf32>
    %cst_37 = arith.constant 2.000000e-01 : f32
    %72 = vector.broadcast %cst_37 : f32 to vector<4x16x16xf32>
    %73 = arith.mulf %72, %71 : vector<4x16x16xf32>
    %74 = arith.maximumf %71, %73 : vector<4x16x16xf32>
    %75 = vector.shape_cast %1 : vector<16x16xf32> to vector<1x16x16xf32>
    %76 = vector.broadcast %75 : vector<1x16x16xf32> to vector<4x16x16xf32>
    %77 = arith.addf %74, %76 : vector<4x16x16xf32>
    %cst_38 = arith.constant dense<0xFF800000> : vector<4x16xf32>
    %78 = vector.multi_reduction <maximumf>, %77, %cst_38 [2] : vector<4x16x16xf32> to vector<4x16xf32>
    %79 = vector.shape_cast %78 : vector<4x16xf32> to vector<4x16x1xf32>
    %80 = vector.broadcast %79 : vector<4x16x1xf32> to vector<4x16x16xf32>
    %81 = arith.subf %77, %80 : vector<4x16x16xf32>
    %82 = math.exp %81 : vector<4x16x16xf32>
    %cst_39 = arith.constant dense<0.000000e+00> : vector<4x16xf32>
    %83 = vector.multi_reduction <add>, %82, %cst_39 [2] : vector<4x16x16xf32> to vector<4x16xf32>
    %84 = vector.shape_cast %83 : vector<4x16xf32> to vector<4x16x1xf32>
    %85 = vector.broadcast %84 : vector<4x16x1xf32> to vector<4x16x16xf32>
    %86 = arith.divf %82, %85 : vector<4x16x16xf32>
    %87 = vector.extract_strided_slice %86 {offsets = [0, 0, 0], sizes = [1, 16, 16], strides = [1, 1, 1]} : vector<4x16x16xf32> to vector<1x16x16xf32>
    %88 = vector.shape_cast %87 : vector<1x16x16xf32> to vector<16x16xf32>
    %89 = vector.extract_strided_slice %63 {offsets = [0, 0], sizes = [16, 8], strides = [1, 1]} : vector<16x32xf32> to vector<16x8xf32>
    %cst_40 = arith.constant dense<0.000000e+00> : vector<16x8xf32>
    %90 = tpu.matmul %88, %89, %cst_40 {dimension_numbers = #tpu.dot_dimension_numbers<[1], [0], [0], [1], [0, 0, 1, 1], [], []>, precision = #tpu.contract_precision<fp32>} : vector<16x16xf32>, vector<16x8xf32>, vector<16x8xf32> -> vector<16x8xf32>
    %91 = vector.extract_strided_slice %86 {offsets = [1, 0, 0], sizes = [1, 16, 16], strides = [1, 1, 1]} : vector<4x16x16xf32> to vector<1x16x16xf32>
    %92 = vector.shape_cast %91 : vector<1x16x16xf32> to vector<16x16xf32>
    %93 = vector.extract_strided_slice %63 {offsets = [0, 8], sizes = [16, 8], strides = [1, 1]} : vector<16x32xf32> to vector<16x8xf32>
    %cst_41 = arith.constant dense<0.000000e+00> : vector<16x8xf32>
    %94 = tpu.matmul %92, %93, %cst_41 {dimension_numbers = #tpu.dot_dimension_numbers<[1], [0], [0], [1], [0, 0, 1, 1], [], []>, precision = #tpu.contract_precision<fp32>} : vector<16x16xf32>, vector<16x8xf32>, vector<16x8xf32> -> vector<16x8xf32>
    %95 = vector.extract_strided_slice %86 {offsets = [2, 0, 0], sizes = [1, 16, 16], strides = [1, 1, 1]} : vector<4x16x16xf32> to vector<1x16x16xf32>
    %96 = vector.shape_cast %95 : vector<1x16x16xf32> to vector<16x16xf32>
    %97 = vector.extract_strided_slice %63 {offsets = [0, 16], sizes = [16, 8], strides = [1, 1]} : vector<16x32xf32> to vector<16x8xf32>
    %cst_42 = arith.constant dense<0.000000e+00> : vector<16x8xf32>
    %98 = tpu.matmul %96, %97, %cst_42 {dimension_numbers = #tpu.dot_dimension_numbers<[1], [0], [0], [1], [0, 0, 1, 1], [], []>, precision = #tpu.contract_precision<fp32>} : vector<16x16xf32>, vector<16x8xf32>, vector<16x8xf32> -> vector<16x8xf32>
    %99 = vector.extract_strided_slice %86 {offsets = [3, 0, 0], sizes = [1, 16, 16], strides = [1, 1, 1]} : vector<4x16x16xf32> to vector<1x16x16xf32>
    %100 = vector.shape_cast %99 : vector<1x16x16xf32> to vector<16x16xf32>
    %101 = vector.extract_strided_slice %63 {offsets = [0, 24], sizes = [16, 8], strides = [1, 1]} : vector<16x32xf32> to vector<16x8xf32>
    %cst_43 = arith.constant dense<0.000000e+00> : vector<16x8xf32>
    %102 = tpu.matmul %100, %101, %cst_43 {dimension_numbers = #tpu.dot_dimension_numbers<[1], [0], [0], [1], [0, 0, 1, 1], [], []>, precision = #tpu.contract_precision<fp32>} : vector<16x16xf32>, vector<16x8xf32>, vector<16x8xf32> -> vector<16x8xf32>
    %103 = arith.addf %90, %94 : vector<16x8xf32>
    %104 = arith.addf %103, %98 : vector<16x8xf32>
    %105 = arith.addf %104, %102 : vector<16x8xf32>
    %cst_44 = arith.constant 2.500000e-01 : f32
    %106 = vector.broadcast %cst_44 : f32 to vector<16x8xf32>
    %107 = arith.mulf %105, %106 : vector<16x8xf32>
    %108 = vector.extract_strided_slice %62 {offsets = [0, 32], sizes = [16, 8], strides = [1, 1]} : vector<16x40xf32> to vector<16x8xf32>
    %109 = arith.addf %107, %108 : vector<16x8xf32>
    %110 = vector.broadcast %61 : vector<1x8xf32> to vector<16x8xf32>
    %111 = arith.addf %109, %110 : vector<16x8xf32>
    %c0_45 = arith.constant 0 : index
    %c0_46 = arith.constant 0 : index
    %112 = vector.load %arg10[%c0_45, %c0_46] : memref<16x8xf32, #tpu.memory_space<vmem>>, vector<16x8xf32>
    tpu.vector_store %arg10[%c0_45, %c0_46], %111 {strides = array<i32>} : memref<16x8xf32, #tpu.memory_space<vmem>>, vector<16x8xf32>,
    return
  }
}

</mosaic_0001>

<bundles_post_ra>
// kernel: tpu_custom_call.1
= control target key start
LH: loop header
LB: loop body
LE: loop exit
PB: predicated region body
PF: predicated region fallthrough
CT: control target
= control target key end

     0   :  { %vm62_vm0 = vcmask 130048   ;;  %vm259_vm1 = vcmask 261120   ;;  %s5849_s19 = smov 120   ;;  %s5850_s20 = smov 112   ;;  %s7101_s2 = inlined_call_operand.vmem [shape: f32[16,64], index: 2, kind: input, shape index: {}]   ;;  %s7102_s0 = inlined_call_operand.vmem [shape: f32[16,16], index: 0, kind: input, shape index: {}]   ;;  %s7103_s3 = inlined_call_operand.vmem [shape: f32[4,32,1], index: 3, kind: input, shape index: {}]   ;;  %s7104_s4 = inlined_call_operand.vmem [shape: f32[4,1,32], index: 4, kind: input, shape index: {}]   ;;  %s7105_s1 = inlined_call_operand.vmem [shape: f32[16,16], index: 1, kind: input, shape index: {}]   ;;  %s7106_s5 = inlined_call_operand.vmem [shape: f32[1,32], index: 5, kind: input, shape index: {}]   ;;  %s7107_s6 = inlined_call_operand.vmem [shape: f32[32,40], index: 6, kind: input, shape index: {}]   ;;  %s7108_s7 = inlined_call_operand.vmem [shape: f32[4,32,1], index: 7, kind: input, shape index: {}]   ;;  %s7109_s8 = inlined_call_operand.vmem [shape: f32[4,1,32], index: 8, kind: input, shape index: {}]   ;;  %s7110_s9 = inlined_call_operand.vmem [shape: f32[1,8], index: 9, kind: input, shape index: {}]   ;;  %s7111_s10 = inlined_call_operand.vmem [shape: f32[16,8], index: 10, kind: output, shape index: {}]  }
   0x1   :  { %v40_v0 = vld [vmem:[%s7101_s2 + $0x8] sm:$0xff]  ;;  %v39_v1 = vld [vmem:[%s7101_s2] sm:$0xff]  ;;  %v44_v26 = vld [vmem:[%s7103_s3 + $0x18] sm:$0xff]  ;;  %s5852_s2 = smov 96   ;;  %s5853_s21 = smov 8  }
   0x2   :  { %v35_v2 = vld [vmem:[%s7102_s0] sm:$0xff]  ;;  %v83_v3 = vand.u32 4294901760, %v40_v0  ;;  %v85_v4 = vand.u32 4294901760, %v39_v1  ;;  %v36_v6 = vld [vmem:[%s7102_s0 + $0x8] sm:$0xff]  ;;  %v278_v27 = vand.u32 4294901760, %v44_v26  ;;  %v43_v28 = vld [vmem:[%s7103_s3 + $0x10] sm:$0xff] }
   0x3   :  { %v64_v5 = vsel %vm62_vm0, %v35_v2, 0  ;;  %v67_v8 = vsel %vm62_vm0, %v36_v6, 0  ;;  %v280_v30 = vand.u32 4294901760, %v43_v28  ;;  %v42_v31 = vld [vmem:[%s7103_s3 + $0x8] sm:$0xff]  ;;  %v41_v35 = vld [vmem:[%s7103_s3] sm:$0xff]  ;;  %v48_v50 = vld [vmem:[%s7103_s3 + $0x38] sm:$0xff] }
   0x4   :  { %v87_v7 = vand.u32 4294901760, %v64_v5  ;;  %v119_v9 = vsub.f32 %v40_v0, %v83_v3  ;;  %84 = vmatpush.msra.mxu0 %v83_v3  ;;  %v125_v10 = vsub.f32 %v39_v1, %v85_v4  ;;  %185 = vmatpush.msra.mxu3 %v83_v3  ;;  %v95_v11 = vand.u32 4294901760, %v67_v8  ;;  %v47_v52 = vld [vmem:[%s7103_s3 + $0x30] sm:$0xff]  ;;  %v46_v55 = vld [vmem:[%s7103_s3 + $0x28] sm:$0xff]  ;;  %v45_v60 = vld [vmem:[%s7103_s3 + $0x20] sm:$0xff]  ;;  %s5851_s0 = smov 104  }
   0x5   :  { %v316_v29 = vsub.f32 %v44_v26, %v278_v27  ;;  %v322_v33 = vsub.f32 %v43_v28, %v280_v30  ;;  %v282_v34 = vand.u32 4294901760, %v42_v31  ;;  %v284_v39 = vand.u32 4294901760, %v41_v35  ;;  %s5854_s22 = smov 16   ;;  %s5855_s23 = smov 24  }
   0x6   :  { %v88_v12 = vsub.f32 %v64_v5, %v87_v7  ;;  %155 = vmatpush.msra.mxu2 %v119_v9  ;;  %86 = vmatpush.msra.mxu0 %v85_v4  ;;  %v120_v13 = vand.u32 4294901760, %v119_v9  ;;  %v126_v14 = vand.u32 4294901760, %v125_v10  ;;  %v96_v15 = vsub.f32 %v67_v8, %v95_v11 }
   0x7   :  { %187 = vmatpush.msra.mxu3 %v85_v4  ;;  %v317_v32 = vand.u32 4294901760, %v316_v29  ;;  %v323_v37 = vand.u32 4294901760, %v322_v33  ;;  %v328_v38 = vsub.f32 %v42_v31, %v282_v34  ;;  %v334_v43 = vsub.f32 %v41_v35, %v284_v39 }
   0x8   :  { %v89_v16 = vand.u32 4294901760, %v88_v12  ;;  %158 = vmatpush.msra.mxu2 %v125_v10  ;;  %v121_v17 = vsub.f32 %v119_v9, %v120_v13  ;;  %v127_v18 = vsub.f32 %v125_v10, %v126_v14  ;;  %218 = vmatpush.msrb.mxu0 %v120_v13  ;;  %v97_v20 = vand.u32 4294901760, %v96_v15 }
   0x9   :  { %161 = vmatmul.f32.vlgmr.msra.gmra.mxu2 %v88_v12  ;;  %v318_v36 = vsub.f32 %v316_v29, %v317_v32  ;;  %v324_v41 = vsub.f32 %v322_v33, %v323_v37  ;;  %v329_v42 = vand.u32 4294901760, %v328_v38  ;;  %v335_v46 = vand.u32 4294901760, %v334_v43 }
   0xa   :  { %v90_v19 = vsub.f32 %v88_v12, %v89_v16  ;;  %191 = vmatmul.f32.vlgmr.msra.gmra.mxu3 %v89_v16  ;;  %v122_v21 = vand.u32 4294901760, %v121_v17  ;;  %v128_v22 = vand.u32 4294901760, %v127_v18  ;;  %222 = vmatpush.msrb.mxu0 %v126_v14  ;;  %v98_v24 = vsub.f32 %v96_v15, %v97_v20 }
   0xb   :  { %279 = vmatpush.msrb.mxu2 %v278_v27  ;;  %v319_v40 = vand.u32 4294901760, %v318_v36  ;;  %v325_v44 = vand.u32 4294901760, %v324_v41  ;;  %v330_v45 = vsub.f32 %v328_v38, %v329_v42  ;;  %v336_v48 = vsub.f32 %v334_v43, %v335_v46 }
   0xc   :  { %v91_v23 = vand.u32 4294901760, %v90_v19  ;;  %123 = vmatpush.msra.mxu1 %v122_v21  ;;  %v99_v25 = vand.u32 4294901760, %v98_v24  ;;  %v5940_v51 = vand.u32 4294901760, %v48_v50  ;;  %v5949_v54 = vand.u32 4294901760, %v47_v52 }
   0xd   :  { %281 = vmatpush.msrb.mxu2 %v280_v30  ;;  %320 = vmatpush.msrb.mxu3 %v319_v40  ;;  %v331_v47 = vand.u32 4294901760, %v330_v45  ;;  %v337_v49 = vand.u32 4294901760, %v336_v48  ;;  %v5956_v57 = vand.u32 4294901760, %v46_v55  ;;  %v5967_v63 = vand.u32 4294901760, %v45_v60  ;;  %v50_v40 = vld [vmem:[%s7103_s3 + $0x48] sm:$0xff]  ;;  %v49_v45 = vld [vmem:[%s7103_s3 + $0x40] sm:$0xff] }
   0xe   :  { %92 = vmatmul.f32.vlgmr.msra.gmra.mxu0 %v91_v23  ;;  %129 = vmatpush.msra.mxu1 %v128_v22  ;;  %v5947_v53 = vsub.f32 %v48_v50, %v5940_v51  ;;  %v5959_v58 = vsub.f32 %v47_v52, %v5949_v54  ;;  %v6040_v52 = vand.u32 4294901760, %v49_v45 }
   0xf   :  { %131 = vmatmul.f32.vlgmr.msra.gmra.mxu1 %v87_v7  ;;  %362 = vmatpush.msra.mxu0 %v316_v29  ;;  %v5970_v0 = vsub.f32 %v46_v55, %v5956_v57  ;;  %v5976_v5 = vsub.f32 %v45_v60, %v5967_v63  ;;  %v52_v29 = vld [vmem:[%s7103_s3 + $0x58] sm:$0xff] }
  0x10   :  { %247 = vmatpush.msrb.mxu1 %v83_v3  ;;  %283 = vmatpush.msrb.mxu2 %v282_v34  ;;  %v533_v56 = vand.u32 4294901760, %v5947_v53  ;;  %v539_v62 = vand.u32 4294901760, %v5959_v58  ;;  %v5992_v31 = vand.u32 4294901760, %v52_v29 }
  0x11   :  { %166 = vmatmul.f32.gmra.mxu2 %v96_v15  ;;  %365 = vmatpush.msra.mxu0 %v322_v33  ;;  %v551_v9 = vand.u32 4294901760, %v5976_v5 }
  0x12   :  { %197 = vmatmul.f32.gmra.mxu3 %v97_v20  ;;  %249 = vmatpush.msrb.mxu1 %v85_v4  ;;  %v534_v61 = vsub.f32 %v5947_v53, %v533_v56  ;;  %v540_v3 = vsub.f32 %v5959_v58, %v539_v62  ;;  %v545_v4 = vand.u32 4294901760, %v5970_v0  ;;  %v6003_v36 = vsub.f32 %v52_v29, %v5992_v31 }
  0x13   :  { %368 = vmatpush.msra.mxu0 %v328_v38  ;;  %285 = vmatpush.msrb.mxu2 %v284_v39  ;;  %v552_v13 = vsub.f32 %v5976_v5, %v551_v9 }
  0x14   :  { %396 = vmatpush.msra.mxu1 %v278_v27  ;;  %326 = vmatpush.msrb.mxu3 %v325_v44  ;;  %v535_v2 = vand.u32 4294901760, %v534_v61  ;;  %v541_v6 = vand.u32 4294901760, %v540_v3 }
  0x15   :  { %371 = vmatpush.msra.mxu0 %v334_v43  ;;  %431 = vmatpush.msra.mxu2 %v317_v32  ;;  %v553_v16 = vand.u32 4294901760, %v552_v13  ;;  %v6020_v43 = vand.u32 4294901760, %v50_v40 }
  0x16   :  { %100 = vmatmul.f32.gmra.mxu0 %v99_v25  ;;  %398 = vmatpush.msra.mxu1 %v280_v30 }
  0x17   :  { %135 = vmatmul.f32.gmra.mxu1 %v95_v11  ;;  %435 = vmatpush.msra.mxu2 %v323_v37  ;;  %v6033_v48 = vsub.f32 %v50_v40, %v6020_v43 }
  0x18   :  { %400 = vmatpush.msra.mxu1 %v282_v34  ;;  %332 = vmatpush.msrb.mxu3 %v331_v47  ;;  %v749_v47 = vand.u32 4294901760, %v6003_v36 }
  0x19   :  { %439 = vmatpush.msra.mxu2 %v329_v42  ;;  %v761_v60 = vand.u32 4294901760, %v6033_v48 }
  0x1a   :  { %402 = vmatpush.msra.mxu1 %v284_v39  ;;  %338 = vmatpush.msrb.mxu3 %v337_v49 }
  0x1b   :  { %443 = vmatpush.msra.mxu2 %v335_v46 }
  0x1c   :  { %466 = vmatpush.msra.mxu3 %v278_v27 }
  0x1e   :  { %224 = vmatmul.f32.vlgmr.msrb.gmra.mxu0 %v87_v7  ;;  %468 = vmatpush.msra.mxu3 %v280_v30 }
  0x1f   :  { %251 = vmatmul.f32.vlgmr.msrb.gmra.mxu1 %v87_v7  ;;  %495 = vmatpush.msrb.mxu0 %v5940_v51  ;;  %v546_v7 = vsub.f32 %v5970_v0, %v545_v4 }
  0x20   :  { %470 = vmatpush.msra.mxu3 %v282_v34  ;;  %536 = vmatpush.msrb.mxu1 %v535_v2  ;;  %v51_v34 = vld [vmem:[%s7103_s3 + $0x50] sm:$0xff] }
  0x21   :  { %497 = vmatpush.msrb.mxu0 %v5949_v54  ;;  %v6005_v37 = vand.u32 4294901760, %v51_v34 }
  0x22   :  { %472 = vmatpush.msra.mxu3 %v284_v39  ;;  %542 = vmatpush.msrb.mxu1 %v541_v6  ;;  %v55_v6 = vld [vmem:[%s7103_s3 + $0x70] sm:$0xff] }
  0x23   :  { %499 = vmatpush.msrb.mxu0 %v5956_v57  ;;  %v6018_v42 = vsub.f32 %v51_v34, %v6005_v37 }
  0x25   :  { %501 = vmatpush.msrb.mxu0 %v5967_v63  ;;  %v755_v55 = vand.u32 4294901760, %v6018_v42 }
  0x26   :  { %228 = vmatmul.f32.gmra.mxu0 %v95_v11 }
  0x27   :  { %255 = vmatmul.f32.gmra.mxu1 %v95_v11  ;;  %v547_v11 = vand.u32 4294901760, %v546_v7 }
  0x29   :  { %548 = vmatpush.msrb.mxu1 %v547_v11 }
  0x2b   :  { %554 = vmatpush.msrb.mxu1 %v553_v16 }
  0x8b   :  { %v93_v59 = vpop.f32.mrf.mxu0 }
  0x8c   :  { %v132_v1 = vpop.f32.mrf.mxu1  ;;  %v162_v8 = vpop.f32.mrf.mxu2 }
  0x8d   :  { %v133_v10 = vadd.f32 %v132_v1, %v93_v59  ;;  %v192_v14 = vpop.f32.mrf.mxu3  ;;  %v6050_v59 = vsub.f32 %v49_v45, %v6040_v52 }
  0x8f   :  { %v163_v17 = vadd.f32 %v162_v8, %v133_v10  ;;  %v6101_v8 = vand.u32 4294901760, %v55_v6  ;;  %v53_v10 = vld [vmem:[%s7103_s3 + $0x60] sm:$0xff] }
  0x90   :  { %v6120_v13 = vand.u32 4294901760, %v53_v10 }
  0x91   :  { %v193_v18 = vadd.f32 %v192_v14, %v163_v17 }
  0x92   :  { %v982_v17 = vsub.f32 %v53_v10, %v6120_v13 }
  0x93   :  { %v101_v12 = vpop.f32.mrf.mxu0 }
  0x94   :  { %v136_v15 = vpop.f32.mrf.mxu1  ;;  %v167_v20 = vpop.f32.mrf.mxu2 }
  0x95   :  { %v137_v19 = vadd.f32 %v136_v15, %v101_v12  ;;  %v198_v26 = vpop.f32.mrf.mxu3  ;;  %v6118_v12 = vsub.f32 %v55_v6, %v6101_v8 }
  0x97   :  { %v168_v24 = vadd.f32 %v167_v20, %v137_v19  ;;  %v971_v16 = vand.u32 4294901760, %v6118_v12 }
  0x99   :  { %v199_v30 = vadd.f32 %v198_v26, %v168_v24  ;;  %v972_v20 = vsub.f32 %v6118_v12, %v971_v16 }
  0x9b   :  { %v225_v21 = vpop.f32.mrf.mxu0  ;;  %v973_v24 = vand.u32 4294901760, %v972_v20 }
  0x9c   :  { %v226_v22 = vadd.f32 %v225_v21, %v193_v18  ;;  %v252_v23 = vpop.f32.mrf.mxu1  ;;  %v983_v21 = vand.u32 4294901760, %v982_v17 }
  0x9e   :  { %v5983_v25 = vadd.f32 %v252_v23, %v226_v22  ;;  %v984_v26 = vsub.f32 %v982_v17, %v983_v21 }
  0xa0   :  { %v261_v27 = vsel %vm259_vm1, %v5983_v25, 0  ;;  %v985_v29 = vand.u32 4294901760, %v984_v26 }
  0xa1   :  { %v5987_v28 = vand.u32 4294901760, %v261_v27 }
  0xa3   :  { %v5995_v32 = vsub.f32 %v261_v27, %v5987_v28  ;;  %v229_v33 = vpop.f32.mrf.mxu0  ;;  %340 = vmatmul.f32.vlgmr.msrb.gmra.mxu3 %v5987_v28 }
  0xa4   :  { %v230_v35 = vadd.f32 %v229_v33, %v199_v30  ;;  %612 = vmatpush.msrb.mxu3 %v5940_v51  ;;  %v256_v38 = vpop.f32.mrf.mxu1  ;;  %v57_v30 = vld [vmem:[%s7104_s4] sm:$0x1] }
  0xa5   :  { %374 = vmatmul.f32.vlgmr.msra.gmra.mxu0 %v5995_v32  ;;  %v6009_v39 = vand.u32 4294901760, %v5995_v32 }
  0xa6   :  { %v6014_v41 = vadd.f32 %v256_v38, %v230_v35  ;;  %614 = vmatpush.msrb.mxu3 %v5949_v54  ;;  %647 = vmatpush.msra.mxu0 %v533_v56  ;;  %v59_v35 = vld [vmem:[%s7104_s4 + $0x2] sm:$0x1] }
  0xa7   :  { %406 = vmatmul.f32.vlgmr.msra.gmra.mxu1 %v6009_v39  ;;  %v289_v44 = vsub.f32 %v5995_v32, %v6009_v39 }
  0xa8   :  { %v264_v46 = vsel %vm259_vm1, %v6014_v41, 0  ;;  %616 = vmatpush.msrb.mxu3 %v5956_v57  ;;  %651 = vmatpush.msra.mxu0 %v539_v62 }
  0xa9   :  { %v6035_v49 = vand.u32 4294901760, %v264_v46  ;;  %v6037_v50 = vand.u32 4294901760, %v289_v44  ;;  %682 = vmatpush.msra.mxu1 %v5940_v51  ;;  %v750_v51 = vsub.f32 %v6003_v36, %v749_v47 }
  0xaa   :  { %618 = vmatpush.msrb.mxu3 %v5967_v63  ;;  %655 = vmatpush.msra.mxu0 %v545_v4 }
  0xab   :  { %v6045_v56 = vsub.f32 %v264_v46, %v6035_v49  ;;  %291 = vmatmul.f32.vlgmr.msrb.gmra.mxu2 %v6037_v50  ;;  %344 = vmatmul.f32.gmra.mxu3 %v6035_v49  ;;  %v751_v1 = vand.u32 4294901760, %v750_v51 }
  0xac   :  { %684 = vmatpush.msra.mxu1 %v5949_v54  ;;  %578 = vmatpush.msrb.mxu2 %v5947_v53  ;;  %v756_v53 = vsub.f32 %v6018_v42, %v755_v55  ;;  %v767_v54 = vand.u32 4294901760, %v6050_v59 }
  0xad   :  { %379 = vmatmul.f32.gmra.mxu0 %v6045_v56  ;;  %v6060_v61 = vand.u32 4294901760, %v6045_v56 }
  0xae   :  { %659 = vmatpush.msra.mxu0 %v551_v9  ;;  %686 = vmatpush.msra.mxu1 %v5956_v57  ;;  %v762_v57 = vsub.f32 %v6033_v48, %v761_v60  ;;  %v757_v3 = vand.u32 4294901760, %v756_v53  ;;  %v768_v4 = vsub.f32 %v6050_v59, %v767_v54 }
  0xaf   :  { %412 = vmatmul.f32.gmra.mxu1 %v6060_v61  ;;  %v297_v62 = vsub.f32 %v6045_v56, %v6060_v61  ;;  %581 = vmatpush.msrb.mxu2 %v5959_v58  ;;  %v56_v58 = vld [vmem:[%s7103_s3 + $0x78] sm:$0xff] }
  0xb0   :  { %688 = vmatpush.msra.mxu1 %v5967_v63  ;;  %v763_v63 = vand.u32 4294901760, %v762_v57  ;;  %v769_v7 = vand.u32 4294901760, %v768_v4 }
  0xb1   :  { %v6077_v2 = vand.u32 4294901760, %v297_v62  ;;  %584 = vmatpush.msrb.mxu2 %v5970_v0  ;;  %v6090_v0 = vand.u32 4294901760, %v56_v58 }
  0xb3   :  { %299 = vmatmul.f32.gmra.mxu2 %v6077_v2  ;;  %474 = vmatmul.f32.vlgmr.msra.gmra.mxu3 %v5987_v28  ;;  %v6105_v9 = vsub.f32 %v56_v58, %v6090_v0 }
  0xb4   :  { %587 = vmatpush.msrb.mxu2 %v5976_v5  ;;  %752 = vmatpush.msra.mxu3 %v751_v1  ;;  %v54_v5 = vld [vmem:[%s7103_s3 + $0x68] sm:$0xff]  ;;  %v60_v1 = vld [vmem:[%s7104_s4 + $0x3] sm:$0x1] }
  0xb5   :  { %507 = vmatmul.f32.vlgmr.msrb.gmra.mxu0 %v6037_v50  ;;  %v6111_v11 = vand.u32 4294901760, %v54_v5  ;;  %v965_v14 = vand.u32 4294901760, %v6105_v9  ;;  %v1617_v4 = vsel %vm259_vm1, %v60_v1, 0 }
  0xb6   :  { %758 = vmatpush.msra.mxu3 %v757_v3  ;;  %794 = vmatpush.msrb.mxu0 %v6003_v36  ;;  %v58_v36 = vld [vmem:[%s7104_s4 + $0x1] sm:$0x1] }
  0xb7   :  { %556 = vmatmul.f32.vlgmr.msrb.gmra.mxu1 %v5987_v28  ;;  %v6127_v15 = vsub.f32 %v54_v5, %v6111_v11  ;;  %v966_v18 = vsub.f32 %v6105_v9, %v965_v14  ;;  %v1293_v40 = vsel %vm259_vm1, %v58_v36, 0 }
  0xb8   :  { %764 = vmatpush.msra.mxu3 %v763_v63  ;;  %797 = vmatpush.msrb.mxu0 %v6018_v42  ;;  %v6228_v44 = vand.u32 4294901760, %v1293_v40 }
  0xb9   :  { %828 = vmatpush.msrb.mxu1 %v5992_v31  ;;  %v977_v19 = vand.u32 4294901760, %v6127_v15  ;;  %v967_v22 = vand.u32 4294901760, %v966_v18 }
  0xba   :  { %770 = vmatpush.msra.mxu3 %v769_v7  ;;  %800 = vmatpush.msrb.mxu0 %v6033_v48 }
  0xbb   :  { %445 = vmatmul.f32.vlgmr.msra.gmra.mxu2 %v5987_v28  ;;  %478 = vmatmul.f32.gmra.mxu3 %v6035_v49  ;;  %v978_v23 = vsub.f32 %v6127_v15, %v977_v19 }
  0xbc   :  { %830 = vmatpush.msrb.mxu1 %v6005_v37  ;;  %711 = vmatpush.msra.mxu2 %v5992_v31 }
  0xbd   :  { %515 = vmatmul.f32.gmra.mxu0 %v6077_v2  ;;  %v979_v27 = vand.u32 4294901760, %v978_v23 }
  0xbe   :  { %803 = vmatpush.msrb.mxu0 %v6050_v59  ;;  %832 = vmatpush.msrb.mxu1 %v6020_v43  ;;  %v6247_v59 = vand.u32 4294901760, %v6014_v41 }
  0xbf   :  { %560 = vmatmul.f32.gmra.mxu1 %v6035_v49  ;;  %713 = vmatpush.msra.mxu2 %v6005_v37 }
  0xc0   :  { %834 = vmatpush.msrb.mxu1 %v6040_v52 }
  0xc1   :  { %715 = vmatpush.msra.mxu2 %v6020_v43 }
  0xc3   :  { %449 = vmatmul.f32.gmra.mxu2 %v6035_v49  ;;  %622 = vmatmul.f32.vlgmr.msrb.gmra.mxu3 %v6009_v39 }
  0xc4   :  { %898 = vmatpush.msrb.mxu3 %v5992_v31  ;;  %717 = vmatpush.msra.mxu2 %v6040_v52  ;;  %v1131_v31 = vsel %vm259_vm1, %v57_v30, 0 }
  0xc5   :  { %661 = vmatmul.f32.vlgmr.msra.gmra.mxu0 %v5987_v28  ;;  %v1151_v33 = vand.u32 4294901760, %v1131_v31 }
  0xc6   :  { %900 = vmatpush.msrb.mxu3 %v6005_v37  ;;  %927 = vmatpush.msra.mxu0 %v6090_v0  ;;  %v1455_v37 = vsel %vm259_vm1, %v59_v35, 0 }
  0xc7   :  { %690 = vmatmul.f32.vlgmr.msra.gmra.mxu1 %v5987_v28  ;;  %v1152_v34 = vsub.f32 %v1131_v31, %v1151_v33  ;;  %v1475_v42 = vand.u32 4294901760, %v1455_v37 }
  0xc8   :  { %902 = vmatpush.msrb.mxu3 %v6020_v43  ;;  %929 = vmatpush.msra.mxu0 %v6101_v8 }
  0xc9   :  { %968 = vmatpush.msra.mxu1 %v967_v22  ;;  %v1153_v38 = vand.u32 4294901760, %v1152_v34  ;;  %v6231_v45 = vsub.f32 %v1455_v37, %v1475_v42 }
  0xca   :  { %904 = vmatpush.msrb.mxu3 %v6040_v52  ;;  %931 = vmatpush.msra.mxu0 %v6111_v11 }
  0xcb   :  { %590 = vmatmul.f32.vlgmr.msrb.gmra.mxu2 %v5995_v32  ;;  %628 = vmatmul.f32.gmra.mxu3 %v6060_v61  ;;  %v1154_v43 = vsub.f32 %v1152_v34, %v1153_v38  ;;  %v1477_v48 = vand.u32 4294901760, %v6231_v45 }
  0xcc   :  { %974 = vmatpush.msra.mxu1 %v973_v24  ;;  %863 = vmatpush.msrb.mxu2 %v749_v47  ;;  %v1314_v47 = vsub.f32 %v1293_v40, %v6228_v44 }
  0xcd   :  { %665 = vmatmul.f32.gmra.mxu0 %v6035_v49  ;;  %v1155_v46 = vand.u32 4294901760, %v1154_v43 }
  0xce   :  { %933 = vmatpush.msra.mxu0 %v6120_v13  ;;  %980 = vmatpush.msra.mxu1 %v979_v27  ;;  %v1315_v52 = vand.u32 4294901760, %v1314_v47 }
  0xcf   :  { %694 = vmatmul.f32.gmra.mxu1 %v6035_v49  ;;  %867 = vmatpush.msrb.mxu2 %v755_v55  ;;  %v1478_v55 = vsub.f32 %v6231_v45, %v1477_v48 }
  0xd0   :  { %986 = vmatpush.msra.mxu1 %v985_v29  ;;  %v1316_v53 = vsub.f32 %v1314_v47, %v1315_v52 }
  0xd1   :  { %871 = vmatpush.msrb.mxu2 %v761_v60  ;;  %v1479_v51 = vand.u32 4294901760, %v1478_v55  ;;  %v6253_v60 = vand.u32 4294901760, %v5983_v25 }
  0xd2   :  { %v1317_v57 = vand.u32 4294901760, %v1316_v53 }
  0xd3   :  { %595 = vmatmul.f32.gmra.mxu2 %v6045_v56  ;;  %772 = vmatmul.f32.vlgmr.msra.gmra.mxu3 %v5987_v28  ;;  %v6266_v62 = vsub.f32 %v5983_v25, %v6253_v60 }
  0xd4   :  { %1044 = vmatpush.msra.mxu3 %v6090_v0  ;;  %875 = vmatpush.msrb.mxu2 %v767_v54  ;;  %v6259_v54 = vsub.f32 %v6014_v41, %v6247_v59 }
  0xd5   :  { %806 = vmatmul.f32.vlgmr.msrb.gmra.mxu0 %v5995_v32  ;;  %v2109_v58 = vand.u32 4294901760, %v6266_v62 }
  0xd6   :  { %1046 = vmatpush.msra.mxu3 %v6101_v8  ;;  %1079 = vmatpush.msrb.mxu0 %v965_v14  ;;  %v2103_v3 = vand.u32 4294901760, %v6259_v54 }
  0xd7   :  { %838 = vmatmul.f32.vlgmr.msrb.gmra.mxu1 %v6009_v39  ;;  %v2110_v6 = vsub.f32 %v6266_v62, %v2109_v58 }
  0xd8   :  { %1048 = vmatpush.msra.mxu3 %v6111_v11  ;;  %1083 = vmatpush.msrb.mxu0 %v971_v16  ;;  %v2104_v63 = vsub.f32 %v6259_v54, %v2103_v3 }
  0xd9   :  { %1114 = vmatpush.msrb.mxu1 %v6090_v0  ;;  %v1637_v0 = vand.u32 4294901760, %v1617_v4 }
  0xda   :  { %1050 = vmatpush.msra.mxu3 %v6120_v13  ;;  %1087 = vmatpush.msrb.mxu0 %v977_v19  ;;  %v2105_v7 = vand.u32 4294901760, %v2104_v63 }
  0xdb   :  { %723 = vmatmul.f32.vlgmr.msra.gmra.mxu2 %v6037_v50  ;;  %776 = vmatmul.f32.gmra.mxu3 %v6035_v49  ;;  %v1638_v5 = vsub.f32 %v1617_v4, %v1637_v0 }
  0xdc   :  { %1116 = vmatpush.msrb.mxu1 %v6101_v8  ;;  %1010 = vmatpush.msra.mxu2 %v6105_v9 }
  0xdd   :  { %811 = vmatmul.f32.gmra.mxu0 %v6045_v56  ;;  %v1639_v9 = vand.u32 4294901760, %v1638_v5 }
  0xde   :  { %1091 = vmatpush.msrb.mxu0 %v983_v21  ;;  %1118 = vmatpush.msrb.mxu1 %v6111_v11 }
  0xdf   :  { %844 = vmatmul.f32.gmra.mxu1 %v6060_v61  ;;  %1013 = vmatpush.msra.mxu2 %v6118_v12  ;;  %v1640_v11 = vsub.f32 %v1638_v5, %v1639_v9 }
  0xe0   :  { %1120 = vmatpush.msrb.mxu1 %v6120_v13 }
  0xe1   :  { %1016 = vmatpush.msra.mxu2 %v6127_v15  ;;  %v1641_v14 = vand.u32 4294901760, %v1640_v11 }
  0xe3   :  { %731 = vmatmul.f32.gmra.mxu2 %v6077_v2  ;;  %906 = vmatmul.f32.vlgmr.msrb.gmra.mxu3 %v5987_v28 }
  0xe4   :  { %1179 = vmatpush.xpose.msrb.mxu3 %v6077_v2  ;;  %1019 = vmatpush.msra.mxu2 %v982_v17 }
  0xe5   :  { %939 = vmatmul.f32.vlgmr.msra.gmra.mxu0 %v6037_v50 }
  0xe6   :  { %1259 = vmatpush.xpose.msra.mxu0 %v6060_v61 }
  0xe7   :  { %988 = vmatmul.f32.vlgmr.msra.gmra.mxu1 %v5987_v28 }
  0xe8   :  { %1185 = vmatpush.xpose.msrb.mxu3 %v6037_v50  ;;  %1284 = vmatpush.xpose.msra.mxu1 %v6035_v49 }
  0xea   :  { %1263 = vmatpush.xpose.msra.mxu0 %v6009_v39 }
  0xeb   :  { %877 = vmatmul.f32.vlgmr.msrb.gmra.mxu2 %v5987_v28  ;;  %910 = vmatmul.f32.gmra.mxu3 %v6035_v49 }
  0xec   :  { %1148 = vmatpush.xpose.msrb.mxu2 %v6035_v49  ;;  %1286 = vmatpush.xpose.msra.mxu1 %v5987_v28 }
  0xed   :  { %947 = vmatmul.f32.gmra.mxu0 %v6077_v2 }
  0xef   :  { %992 = vmatmul.f32.gmra.mxu1 %v6035_v49 }
  0xf0   :  { %1150 = vmatpush.xpose.msrb.mxu2 %v5987_v28 }
  0xf3   :  { %881 = vmatmul.f32.gmra.mxu2 %v6035_v49  ;;  %1054 = vmatmul.f32.vlgmr.msra.gmra.mxu3 %v6009_v39 }
  0xf4   :  { %1232 = vmatpush.xpose.msra.mxu3 %v6035_v49 }
  0xf5   :  { %1093 = vmatmul.f32.vlgmr.msrb.gmra.mxu0 %v5987_v28 }
  0xf6   :  { %1369 = vmatpush.xpose.msrb.mxu0 %v6045_v56 }
  0xf7   :  { %1122 = vmatmul.f32.vlgmr.msrb.gmra.mxu1 %v5987_v28 }
  0xf8   :  { %1234 = vmatpush.xpose.msra.mxu3 %v5987_v28  ;;  %1394 = vmatpush.xpose.msrb.mxu1 %v6035_v49 }
  0xfa   :  { %1372 = vmatpush.xpose.msrb.mxu0 %v5995_v32 }
  0xfb   :  { %1022 = vmatmul.f32.vlgmr.msra.gmra.mxu2 %v5995_v32  ;;  %1060 = vmatmul.f32.gmra.mxu3 %v6060_v61 }
  0xfc   :  { %1207 = vmatpush.xpose.msra.mxu2 %v6045_v56  ;;  %1396 = vmatpush.xpose.msrb.mxu1 %v5987_v28 }
  0xfd   :  { %1097 = vmatmul.f32.gmra.mxu0 %v6035_v49 }
  0xff   :  { %1126 = vmatmul.f32.gmra.mxu1 %v6035_v49 }
 0x100   :  { %1210 = vmatpush.xpose.msra.mxu2 %v5995_v32 }
 0x103   :  { %1027 = vmatmul.f32.gmra.mxu2 %v6045_v56  ;;  %1187 = vmatmul.f32.vlgmr.msrb.gmra.mxu3 %v1151_v33 }
 0x104   :  { %1341 = vmatpush.xpose.msrb.mxu3 %v6077_v2 }
 0x105   :  { %1265 = vmatmul.f32.vlgmr.msra.gmra.mxu0 %v1151_v33 }
 0x106   :  { %1472 = vmatpush.xpose.msra.mxu0 %v6035_v49 }
 0x107   :  { %1288 = vmatmul.f32.vlgmr.msra.gmra.mxu1 %v1151_v33 }
 0x108   :  { %1347 = vmatpush.xpose.msrb.mxu3 %v6037_v50  ;;  %1503 = vmatpush.xpose.msra.mxu1 %v6077_v2 }
 0x10a   :  { %1474 = vmatpush.xpose.msra.mxu0 %v5987_v28 }
 0x10b   :  { %1156 = vmatmul.f32.vlgmr.msrb.gmra.mxu2 %v1155_v46  ;;  %1238 = vmatmul.f32.vlgmr.msra.gmra.mxu3 %v1153_v38 }
 0x10c   :  { %1310 = vmatpush.xpose.msrb.mxu2 %v6035_v49  ;;  %1446 = vmatpush.xpose.msra.mxu3 %v6035_v49 }
 0x10d   :  { %1509 = vmatpush.xpose.msra.mxu1 %v6037_v50  ;;  %1375 = vmatmul.f32.vlgmr.msrb.gmra.mxu0 %v1314_v47 }
 0x10e   :  { %1583 = vmatpush.xpose.msrb.mxu0 %v6060_v61 }
 0x10f   :  { %1400 = vmatmul.f32.vlgmr.msrb.gmra.mxu1 %v1315_v52 }
 0x110   :  { %1312 = vmatpush.xpose.msrb.mxu2 %v5987_v28  ;;  %1448 = vmatpush.xpose.msra.mxu3 %v5987_v28 }
 0x111   :  { %1608 = vmatpush.xpose.msrb.mxu1 %v6035_v49 }
 0x112   :  { %1587 = vmatpush.xpose.msrb.mxu0 %v6009_v39 }
 0x113   :  { %1213 = vmatmul.f32.vlgmr.msra.gmra.mxu2 %v1152_v34  ;;  %1349 = vmatmul.f32.vlgmr.msrb.gmra.mxu3 %v6228_v44 }
 0x114   :  { %1421 = vmatpush.xpose.msra.mxu2 %v6060_v61  ;;  %1556 = vmatpush.xpose.msrb.mxu3 %v6035_v49 }
 0x115   :  { %1610 = vmatpush.xpose.msrb.mxu1 %v5987_v28  ;;  %1480 = vmatmul.f32.vlgmr.msra.gmra.mxu0 %v1479_v51 }
 0x116   :  { %1693 = vmatpush.xpose.msra.mxu0 %v6045_v56 }
 0x117   :  { %1511 = vmatmul.f32.vlgmr.msra.gmra.mxu1 %v1475_v42 }
 0x118   :  { %1425 = vmatpush.xpose.msra.mxu2 %v6009_v39  ;;  %1558 = vmatpush.xpose.msrb.mxu3 %v5987_v28 }
 0x119   :  { %1718 = vmatpush.xpose.msra.mxu1 %v6035_v49 }
 0x11a   :  { %1696 = vmatpush.xpose.msra.mxu0 %v5995_v32 }
 0x11b   :  { %1318 = vmatmul.f32.vlgmr.msrb.gmra.mxu2 %v1317_v57  ;;  %1450 = vmatmul.f32.vlgmr.msra.gmra.mxu3 %v6228_v44 }
 0x11c   :  { %1531 = vmatpush.xpose.msrb.mxu2 %v6045_v56  ;;  %1665 = vmatpush.xpose.msra.mxu3 %v6077_v2  ;;  %v2111_v56 = vand.u32 4294901760, %v2110_v6  ;;  %v5848_v2 = vmov 0  }
 0x11d   :  { %1720 = vmatpush.xpose.msra.mxu1 %v5987_v28  ;;  %1589 = vmatmul.f32.vlgmr.msrb.gmra.mxu0 %v1475_v42 }
 0x11e   :  { %2067 = vmatpush.msrb.mxu0 %v6247_v59  ;;  %5773 = vset.pattern.permute.xlu0 %v5848_v2 }
 0x11f   :  { %1612 = vmatmul.f32.vlgmr.msrb.gmra.mxu1 %v1475_v42  ;;  %5774 = vset.pattern.permute.xlu1 %v5848_v2 }
 0x120   :  { %1534 = vmatpush.xpose.msrb.mxu2 %v5995_v32  ;;  %1671 = vmatpush.xpose.msra.mxu3 %v6037_v50 }
 0x121   :  { %2069 = vmatpush.msrb.mxu0 %v6253_v60  ;;  %2106 = vmatpush.msrb.mxu1 %v2105_v7 }
 0x122   :  { %v375_v8 = vpop.f32.mrf.mxu0  ;;  %5775 = vset.pattern.permute.xlu2 %v5848_v2 }
 0x123   :  { %2112 = vmatpush.msrb.mxu1 %v2111_v56  ;;  %1427 = vmatmul.f32.vlgmr.msra.gmra.mxu2 %v6228_v44 }
 0x124   :  { %1562 = vmatmul.f32.vlgmr.msrb.gmra.mxu3 %v1477_v48  ;;  %1634 = vmatpush.xpose.msra.mxu2 %v6035_v49  ;;  %v407_v32 = vpop.f32.mrf.mxu1 }
 0x125   :  { %1770 = vmatpush.xpose.msrb.mxu3 %v6035_v49  ;;  %1699 = vmatmul.f32.vlgmr.msra.gmra.mxu0 %v1638_v5 }
 0x126   :  { %2201 = vmatpush.msra.mxu0 %v2103_v3  ;;  %v341_v50 = vpop.f32.mrf.mxu3 }
 0x127   :  { %1724 = vmatmul.f32.vlgmr.msra.gmra.mxu1 %v1639_v9 }
 0x128   :  { %1636 = vmatpush.xpose.msra.mxu2 %v5987_v28  ;;  %2205 = vmatpush.msra.mxu0 %v2109_v58 }
 0x129   :  { %1772 = vmatpush.xpose.msrb.mxu3 %v5987_v28  ;;  %2230 = vmatpush.msra.mxu1 %v6247_v59 }
 0x12a   :  { %v380_v10 = vpop.f32.mrf.mxu0 }
 0x12b   :  { %2232 = vmatpush.msra.mxu1 %v6253_v60  ;;  %1537 = vmatmul.f32.vlgmr.msrb.gmra.mxu2 %v6231_v45 }
 0x12c   :  { %1673 = vmatmul.f32.vlgmr.msra.gmra.mxu3 %v1637_v0  ;;  %1745 = vmatpush.xpose.msrb.mxu2 %v6060_v61  ;;  %v413_v49 = vpop.f32.mrf.mxu1 }
 0x12d   :  { %2168 = vmatpush.msra.mxu3 %v6247_v59 }
 0x12e   :  { %v292_v12 = vpop.f32.mrf.mxu2  ;;  %v345_v13 = vpop.f32.mrf.mxu3 }
 0x12f   :  { %2170 = vmatpush.msra.mxu3 %v6253_v60  ;;  %v342_v16 = vadd.f32 %v341_v50, %v292_v12 }
 0x130   :  { %1749 = vmatpush.xpose.msrb.mxu2 %v6009_v39 }
 0x131   :  { %v376_v18 = vadd.f32 %v375_v8, %v342_v16 }
 0x132   :  { %v508_v28 = vpop.f32.mrf.mxu0 }
 0x133   :  { %1642 = vmatmul.f32.vlgmr.msra.gmra.mxu2 %v1641_v14  ;;  %v408_v22 = vadd.f32 %v407_v32, %v376_v18 }
 0x134   :  { %2138 = vmatpush.msra.mxu2 %v6259_v54  ;;  %v557_v15 = vpop.f32.mrf.mxu1  ;;  %1774 = vmatmul.f32.vlgmr.msrb.gmra.mxu3 %v1637_v0 }
 0x135   :  { %v558_v37 = vadd.f32 %v557_v15, %v508_v28 }
 0x136   :  { %2141 = vmatpush.msra.mxu2 %v6266_v62  ;;  %v300_v61 = vpop.f32.mrf.mxu2  ;;  %v475_v17 = vpop.f32.mrf.mxu3 }
 0x137   :  { %v346_v20 = vadd.f32 %v345_v13, %v300_v61 }
 0x139   :  { %v381_v26 = vadd.f32 %v380_v10, %v346_v20 }
 0x13a   :  { %v516_v19 = vpop.f32.mrf.mxu0 }
 0x13b   :  { %1751 = vmatmul.f32.vlgmr.msrb.gmra.mxu2 %v1637_v0  ;;  %v414_v30 = vadd.f32 %v413_v49, %v381_v26 }
 0x13c   :  { %v561_v21 = vpop.f32.mrf.mxu1 }
 0x13d   :  { %v562_v47 = vadd.f32 %v561_v21, %v516_v19 }
 0x13e   :  { %v446_v23 = vpop.f32.mrf.mxu2  ;;  %v479_v24 = vpop.f32.mrf.mxu3 }
 0x13f   :  { %v447_v39 = vadd.f32 %v446_v23, %v408_v22 }
 0x141   :  { %v476_v27 = vadd.f32 %v475_v17, %v447_v39 }
 0x142   :  { %v662_v29 = vpop.f32.mrf.mxu0 }
 0x143   :  { %1780 = vperm.xlu0 %5773, %v476_v27  }
 0x144   :  { %v691_v35 = vpop.f32.mrf.mxu1 }
 0x146   :  { %v450_v31 = vpop.f32.mrf.mxu2  ;;  %v623_v33 = vpop.f32.mrf.mxu3 }
 0x147   :  { %v451_v34 = vadd.f32 %v450_v31, %v414_v30 }
 0x149   :  { %v480_v36 = vadd.f32 %v479_v24, %v451_v34 }
 0x14a   :  { %v666_v43 = vpop.f32.mrf.mxu0 }
 0x14b   :  { %1785 = vperm.xlu0 %5773, %v480_v36  }
 0x14c   :  { %v695_v45 = vpop.f32.mrf.mxu1 }
 0x14e   :  { %v591_v38 = vpop.f32.mrf.mxu2  ;;  %v629_v40 = vpop.f32.mrf.mxu3 }
 0x14f   :  { %v592_v42 = vadd.f32 %v591_v38, %v558_v37 }
 0x151   :  { %v624_v44 = vadd.f32 %v623_v33, %v592_v42 }
 0x152   :  { %v807_v60 = vpop.f32.mrf.mxu0 }
 0x153   :  { %v663_v46 = vadd.f32 %v662_v29, %v624_v44 }
 0x154   :  { %v839_v54 = vpop.f32.mrf.mxu1 }
 0x155   :  { %v692_v48 = vadd.f32 %v691_v35, %v663_v46 }
 0x156   :  { %v596_v52 = vpop.f32.mrf.mxu2  ;;  %v773_v59 = vpop.f32.mrf.mxu3 }
 0x157   :  { %v597_v55 = vadd.f32 %v596_v52, %v562_v47  ;;  %1790 = vperm.xlu1 %5774, %v692_v48  }
 0x159   :  { %v630_v51 = vadd.f32 %v629_v40, %v597_v55 }
 0x15a   :  { %v812_v3 = vpop.f32.mrf.mxu0 }
 0x15b   :  { %v667_v53 = vadd.f32 %v666_v43, %v630_v51 }
 0x15c   :  { %v845_v58 = vpop.f32.mrf.mxu1 }
 0x15d   :  { %v696_v62 = vadd.f32 %v695_v45, %v667_v53 }
 0x15e   :  { %v724_v1 = vpop.f32.mrf.mxu2  ;;  %v777_v57 = vpop.f32.mrf.mxu3 }
 0x15f   :  { %1795 = vperm.xlu1 %5774, %v696_v62   ;;  %v774_v4 = vadd.f32 %v773_v59, %v724_v1  ;;  %v6314_v62 = vld [vmem:[%s7105_s1] sm:$0xff] }
 0x161   :  { %v808_v0 = vadd.f32 %v807_v60, %v774_v4 }
 0x162   :  { %v940_v56 = vpop.f32.mrf.mxu0 }
 0x163   :  { %v840_v5 = vadd.f32 %v839_v54, %v808_v0 }
 0x164   :  { %v989_v9 = vpop.f32.mrf.mxu1 }
 0x165   :  { %v990_v15 = vadd.f32 %v989_v9, %v940_v56 }
 0x166   :  { %v732_v63 = vpop.f32.mrf.mxu2  ;;  %v907_v6 = vpop.f32.mrf.mxu3 }
 0x167   :  { %v778_v7 = vadd.f32 %v777_v57, %v732_v63 }
 0x169   :  { %v813_v32 = vadd.f32 %v812_v3, %v778_v7 }
 0x16a   :  { %v6305_v13 = vpop.f32.mrf.mxu0 }
 0x16b   :  { %v846_v10 = vadd.f32 %v845_v58, %v813_v32 }
 0x16c   :  { %v6307_v28 = vpop.f32.mrf.mxu1 }
 0x16e   :  { %v878_v8 = vpop.f32.mrf.mxu2  ;;  %v911_v11 = vpop.f32.mrf.mxu3 }
 0x16f   :  { %v879_v2 = vadd.f32 %v878_v8, %v840_v5 }
 0x171   :  { %v908_v50 = vadd.f32 %v907_v6, %v879_v2  ;;  %v6324_v2 = vld [vmem:[%s7105_s1 + $0x8] sm:$0xff] }
 0x172   :  { %v1094_v19 = vpop.f32.mrf.mxu0 }
 0x173   :  { %1800 = vperm.xlu2 %5775, %v908_v50  }
 0x174   :  { %v1123_v21 = vpop.f32.mrf.mxu1 }
 0x176   :  { %v882_v49 = vpop.f32.mrf.mxu2  ;;  %v1055_v17 = vpop.f32.mrf.mxu3 }
 0x177   :  { %v883_v12 = vadd.f32 %v882_v49, %v846_v10 }
 0x179   :  { %v912_v14 = vadd.f32 %v911_v11, %v883_v12 }
 0x17a   :  { %v1098_v29 = vpop.f32.mrf.mxu0 }
 0x17b   :  { %1805 = vperm.xlu0 %5773, %v912_v14  }
 0x17c   :  { %v6309_v27 = vpop.f32.mrf.mxu1 }
 0x17e   :  { %v1023_v16 = vpop.f32.mrf.mxu2  ;;  %v1061_v24 = vpop.f32.mrf.mxu3 }
 0x17f   :  { %v1024_v61 = vadd.f32 %v1023_v16, %v990_v15  ;;  %v994_v15 = vadd.f32 %v6307_v28, %v6305_v13 }
 0x181   :  { %v1056_v18 = vadd.f32 %v1055_v17, %v1024_v61 }
 0x182   :  { %v1266_v36 = vpop.f32.mrf.mxu0 }
 0x183   :  { %v1095_v20 = vadd.f32 %v1094_v19, %v1056_v18 }
 0x184   :  { %v1289_v35 = vpop.f32.mrf.mxu1 }
 0x185   :  { %v1124_v22 = vadd.f32 %v1123_v21, %v1095_v20 }
 0x186   :  { %v1028_v23 = vpop.f32.mrf.mxu2  ;;  %v1188_v26 = vpop.f32.mrf.mxu3 }
 0x187   :  { %1810 = vperm.xlu0 %5773, %v1124_v22   ;;  %v1029_v61 = vadd.f32 %v1028_v23, %v994_v15 }
 0x189   :  { %v1062_v21 = vadd.f32 %v1061_v24, %v1029_v61 }
 0x18a   :  { %v1376_v44 = vpop.f32.mrf.mxu0 }
 0x18c   :  { %v1401_v43 = vpop.f32.mrf.mxu1 }
 0x18e   :  { %v1157_v39 = vpop.f32.mrf.mxu2  ;;  %v1239_v33 = vpop.f32.mrf.mxu3 }
 0x18f   :  { %v1189_v31 = vadd.f32 %v1188_v26, %v1157_v39 }
 0x192   :  { %v1481_v54 = vpop.f32.mrf.mxu0 }
 0x194   :  { %v1512_v60 = vpop.f32.mrf.mxu1 }
 0x195   :  { %v1513_v3 = vadd.f32 %v1512_v60, %v1481_v54 }
 0x196   :  { %v1214_v30 = vpop.f32.mrf.mxu2  ;;  %v1350_v40 = vpop.f32.mrf.mxu3 }
 0x197   :  { %v1215_v34 = vadd.f32 %v1214_v30, %v1189_v31  ;;  %v1099_v31 = vadd.f32 %v1098_v29, %v1062_v21 }
 0x199   :  { %v1240_v38 = vadd.f32 %v1239_v33, %v1215_v34  ;;  %v1128_v23 = vadd.f32 %v6309_v27, %v1099_v31 }
 0x19a   :  { %v1590_v10 = vpop.f32.mrf.mxu0 }
 0x19b   :  { %v1267_v42 = vadd.f32 %v1266_v36, %v1240_v38 }
 0x19c   :  { %v1613_v16 = vpop.f32.mrf.mxu1 }
 0x19d   :  { %v1290_v45 = vadd.f32 %v1289_v35, %v1267_v42 }
 0x19e   :  { %v1319_v37 = vpop.f32.mrf.mxu2  ;;  %v1451_v55 = vpop.f32.mrf.mxu3 }
 0x19f   :  { %v1351_v47 = vadd.f32 %v1350_v40, %v1319_v37  ;;  %v1818_v48 = vperm.slane %v1290_v45, 0 }
 0x1a1   :  { %v1377_v51 = vadd.f32 %v1376_v44, %v1351_v47 }
 0x1a2   :  { %v1700_v45 = vpop.f32.mrf.mxu0 }
 0x1a3   :  { %v1402_v57 = vadd.f32 %v1401_v43, %v1377_v51 }
 0x1a4   :  { %v1725_v47 = vpop.f32.mrf.mxu1 }
 0x1a6   :  { %v1428_v46 = vpop.f32.mrf.mxu2 }
 0x1a7   :  { %v1429_v0 = vadd.f32 %v1428_v46, %v1402_v57  ;;  %v1563_v56 = vpop.f32.mrf.mxu3 }
 0x1a9   :  { %v1452_v9 = vadd.f32 %v1451_v55, %v1429_v0 }
 0x1ab   :  { %v1819_v49 = vperm.slane %v1452_v9, 0 }
 0x1ae   :  { %v1538_v4 = vpop.f32.mrf.mxu2 }
 0x1af   :  { %v1539_v5 = vadd.f32 %v1538_v4, %v1513_v3  ;;  %v1674_v42 = vpop.f32.mrf.mxu3 }
 0x1b1   :  { %v1564_v50 = vadd.f32 %v1563_v56, %v1539_v5 }
 0x1b3   :  { %v1591_v12 = vadd.f32 %v1590_v10, %v1564_v50 }
 0x1b5   :  { %v1781_v52 = vpop.permute.xlu0 %1780  ;;  %v1614_v18 = vadd.f32 %v1613_v16, %v1591_v12 }
 0x1b6   :  { %v1822_v59 = vadd.f32 %v1818_v48, %v1781_v52  ;;  %v1643_v43 = vpop.f32.mrf.mxu2 }
 0x1b7   :  { %v1820_v22 = vperm.slane %v1614_v18, 0  ;;  %v1675_v27 = vadd.f32 %v1674_v42, %v1643_v43  ;;  %v1775_v60 = vpop.f32.mrf.mxu3 }
 0x1b8   :  { %v1830_v53 = vmul.f32 0.2, %v1822_v59 }
 0x1b9   :  { %v1701_v46 = vadd.f32 %v1700_v45, %v1675_v27 }
 0x1ba   :  { %v1838_v1 = vmax.f32 %v1822_v59, %v1830_v53 }
 0x1bc   :  { %v6317_v58 = vadd.f32 %v1838_v1, %v6314_v62 }
 0x1bd   :  { %v1786_v63 = vpop.permute.xlu0 %1785 }
 0x1be   :  { %v1823_v6 = vadd.f32 %v1818_v48, %v1786_v63  ;;  %v1854_v7 = vsel %vm62_vm0, %v6317_v58, -inf  ;;  %v1726_v48 = vadd.f32 %v1725_v47, %v1701_v46  ;;  %v1752_v52 = vpop.f32.mrf.mxu2 }
 0x1bf   :  { %1855 = vmax.xlane.f32.xlu2 %v1854_v7 }
 0x1c0   :  { %v1831_v8 = vmul.f32 0.2, %v1823_v6  ;;  %v1753_v51 = vadd.f32 %v1752_v52, %v1726_v48 }
 0x1c2   :  { %v1839_v32 = vmax.f32 %v1823_v6, %v1831_v8  ;;  %v1776_v1 = vadd.f32 %v1775_v60, %v1753_v51 }
 0x1c4   :  { %v6327_v11 = vadd.f32 %v1839_v32, %v6324_v2  ;;  %v1821_v3 = vperm.slane %v1776_v1, 0 }
 0x1c6   :  { %v1857_v14 = vsel %vm62_vm0, %v6327_v11, -inf }
 0x1c7   :  { %1858 = vmax.xlane.f32.xlu1 %v1857_v14 }
 0x1c9   :  { %v1791_v17 = vpop.permute.xlu1 %1790 }
 0x1ca   :  { %v1824_v19 = vadd.f32 %v1819_v49, %v1791_v17 }
 0x1cc   :  { %v1832_v20 = vmul.f32 0.2, %v1824_v19 }
 0x1cd   :  { %v1801_v26 = vpop.permute.xlu2 %1800 }
 0x1ce   :  { %v1840_v39 = vmax.f32 %v1824_v19, %v1832_v20  ;;  %v1826_v34 = vadd.f32 %v1820_v22, %v1801_v26 }
 0x1d0   :  { %v6334_v30 = vadd.f32 %v1840_v39, %v6314_v62  ;;  %v1834_v36 = vmul.f32 0.2, %v1826_v34 }
 0x1d1   :  { %v1796_v33 = vpop.permute.xlu1 %1795 }
 0x1d2   :  { %v1825_v35 = vadd.f32 %v1819_v49, %v1796_v33  ;;  %v1860_v13 = vsel %vm62_vm0, %v6334_v30, -inf  ;;  %v1842_v38 = vmax.f32 %v1826_v34, %v1834_v36 }
 0x1d3   :  { %1861 = vmax.xlane.f32.xlu0 %v1860_v13 }
 0x1d4   :  { %v1833_v28 = vmul.f32 0.2, %v1825_v35  ;;  %v6345_v40 = vadd.f32 %v1842_v38, %v6314_v62 }
 0x1d6   :  { %v1841_v37 = vmax.f32 %v1825_v35, %v1833_v28  ;;  %v1866_v44 = vsel %vm62_vm0, %v6345_v40, -inf }
 0x1d7   :  { %1815 = vperm.xlu2 %5775, %v1128_v23  }
 0x1d8   :  { %v6340_v24 = vadd.f32 %v1841_v37, %v6324_v2 }
 0x1da   :  { %v1863_v29 = vsel %vm62_vm0, %v6340_v24, -inf }
 0x1db   :  { %1864 = vmax.xlane.f32.xlu1 %v1863_v29 }
 0x1e3   :  { %1867 = vmax.xlane.f32.xlu1 %v1866_v44 }
 0x1ed   :  { %v1806_v55 = vpop.permute.xlu0 %1805 }
 0x1ee   :  { %v1827_v59 = vadd.f32 %v1820_v22, %v1806_v55 }
 0x1f0   :  { %v1835_v53 = vmul.f32 0.2, %v1827_v59 }
 0x1f2   :  { %v1843_v54 = vmax.f32 %v1827_v59, %v1835_v53 }
 0x1f4   :  { %v1851_v57 = vadd.f32 %v1843_v54, %v6324_v2 }
 0x1f6   :  { %v1869_v4 = vsel %vm62_vm0, %v1851_v57, -inf }
 0x1f7   :  { %1870 = vmax.xlane.f32.xlu0 %v1869_v4 }
 0x1f9   :  { %v1811_v63 = vpop.permute.xlu0 %1810 }
 0x1fa   :  { %v1828_v0 = vadd.f32 %v1821_v3, %v1811_v63 }
 0x1fc   :  { %v1836_v6 = vmul.f32 0.2, %v1828_v0  ;;  %2242 = vrot.lane.b32.xlu1 %v5983_v25, %s5849_s19 }
 0x1fe   :  { %v1844_v7 = vmax.f32 %v1828_v0, %v1836_v6 }
 0x200   :  { %v1852_v5 = vadd.f32 %v1844_v7, %v6314_v62 }
 0x202   :  { %v1872_v56 = vsel %vm62_vm0, %v1852_v5, -inf }
 0x203   :  { %1873 = vmax.xlane.f32.xlu0 %v1872_v56 }
 0x232   :  { %v1856_v8 = vpop.xlane.xlu2 %1855 }
 0x233   :  { %v1878_v9 = vsub.f32 %v6317_v58, %v1856_v8 }
 0x235   :  { %v1886_v32 = vmul.f32 1.442695, %v1878_v9 }
 0x237   :  { %5778 = vpow2.f32 %v1886_v32 }
 0x23a   :  { %v1816_v50 = vpop.permute.xlu2 %1815  ;;  %v1859_v10 = vpop.xlane.xlu1 %1858 }
 0x23b   :  { %v1829_v49 = vadd.f32 %v1821_v3, %v1816_v50  ;;  %v1879_v12 = vsub.f32 %v6327_v11, %v1859_v10 }
 0x23d   :  { %v6357_v14 = vpop.eup %5778  ;;  %v1837_v15 = vmul.f32 0.2, %v1829_v49  ;;  %v1888_v16 = vmul.f32 1.442695, %v1879_v12 }
 0x23e   :  { %v1902_v62 = vsel %vm62_vm0, %v6357_v14, 0.0 }
 0x23f   :  { %v1845_v61 = vmax.f32 %v1829_v49, %v1837_v15  ;;  %5780 = vpow2.f32 %v1888_v16  ;;  %1903 = vadd.xlane.f32.xlu2 %v1902_v62 }
 0x241   :  { %v1853_v17 = vadd.f32 %v1845_v61, %v6324_v2 }
 0x243   :  { %v1875_v58 = vsel %vm62_vm0, %v1853_v17, -inf }
 0x244   :  { %1876 = vmax.xlane.f32.xlu0 %v1875_v58 }
 0x245   :  { %v6363_v18 = vpop.eup %5780 }
 0x246   :  { %v1862_v19 = vpop.xlane.xlu0 %1861  ;;  %v1905_v11 = vsel %vm62_vm0, %v6363_v18, 0.0 }
 0x247   :  { %v1880_v20 = vsub.f32 %v6334_v30, %v1862_v19  ;;  %1906 = vadd.xlane.f32.xlu1 %v1905_v11 }
 0x249   :  { %v1890_v21 = vmul.f32 1.442695, %v1880_v20 }
 0x24b   :  { %5782 = vpow2.f32 %v1890_v21 }
 0x24e   :  { %v1865_v22 = vpop.xlane.xlu1 %1864 }
 0x24f   :  { %v1881_v39 = vsub.f32 %v6340_v24, %v1865_v22 }
 0x251   :  { %v6369_v26 = vpop.eup %5782  ;;  %v1892_v2 = vmul.f32 1.442695, %v1881_v39 }
 0x252   :  { %v1908_v31 = vsel %vm62_vm0, %v6369_v26, 0.0 }
 0x253   :  { %5784 = vpow2.f32 %v1892_v2  ;;  %1909 = vadd.xlane.f32.xlu1 %v1908_v31 }
 0x256   :  { %v1868_v33 = vpop.xlane.xlu1 %1867 }
 0x257   :  { %v1882_v34 = vsub.f32 %v6345_v40, %v1868_v33 }
 0x258   :  { %2244 = vrot.lane.b32.xlu0 %v6014_v41, %s5849_s19 }
 0x259   :  { %v6376_v30 = vpop.eup %5784  ;;  %v1894_v35 = vmul.f32 1.442695, %v1882_v34 }
 0x25a   :  { %v1911_v13 = vsel %vm62_vm0, %v6376_v30, 0.0 }
 0x25b   :  { %5786 = vpow2.f32 %v1894_v35  ;;  %1912 = vadd.xlane.f32.xlu1 %v1911_v13 }
 0x261   :  { %v6380_v28 = vpop.eup %5786 }
 0x262   :  { %v1914_v23 = vsel %vm62_vm0, %v6380_v28, 0.0 }
 0x263   :  { %1915 = vadd.xlane.f32.xlu2 %v1914_v23 }
 0x26a   :  { %v1871_v36 = vpop.xlane.xlu0 %1870 }
 0x26b   :  { %v1883_v37 = vsub.f32 %v1851_v57, %v1871_v36 }
 0x26d   :  { %v1896_v24 = vmul.f32 1.442695, %v1883_v37 }
 0x26e   :  { %v2243_v45 = vpop.permute.xlu1 %2242 }
 0x26f   :  { %5788 = vpow2.f32 %v1896_v24  ;;  %v6403_v9 = vand.u32 4294901760, %v2243_v45 }
 0x271   :  { %v2310_v62 = vsub.f32 %v2243_v45, %v6403_v9 }
 0x273   :  { %v2311_v2 = vand.u32 4294901760, %v2310_v62 }
 0x274   :  { %2446 = vrot.lane.b32.xlu1 %v6014_v41, %s5850_s20 }
 0x275   :  { %v6388_v42 = vpop.eup %5788 }
 0x276   :  { %v1874_v38 = vpop.xlane.xlu0 %1873  ;;  %v1917_v44 = vsel %vm62_vm0, %v6388_v42, 0.0 }
 0x277   :  { %v1884_v29 = vsub.f32 %v1852_v5, %v1874_v38  ;;  %v2312_v38 = vsub.f32 %v2310_v62, %v2311_v2 }
 0x279   :  { %v1898_v40 = vmul.f32 1.442695, %v1884_v29 }
 0x27b   :  { %5790 = vpow2.f32 %v1898_v40 }
 0x27c   :  { %2444 = vrot.lane.b32.xlu1 %v5983_v25, %s5850_s20 }
 0x281   :  { %v6390_v43 = vpop.eup %5790 }
 0x282   :  { %1918 = vadd.xlane.f32.xlu0 %v1917_v44  ;;  %v1920_v27 = vsel %vm62_vm0, %v6390_v43, 0.0 }
 0x283   :  { %1921 = vadd.xlane.f32.xlu2 %v1920_v27 }
 0x284   :  { %2646 = vrot.lane.b32.xlu1 %v5983_v25, %s5851_s0 }
 0x2b2   :  { %v1904_v46 = vpop.xlane.xlu2 %1903 }
 0x2b3   :  { %5792 = vrcp.f32 %v1904_v46  ;;  %v1937_v53 = vand.u32 2147483648, %v1904_v46  ;;  %v1935_v1 = vand.u32 2147483647, %v1904_v46  ;;  %vm1931_vm3 = vweird.f32 %v1904_v46 }
 0x2b5   :  { %v1938_v4 = vor.u32 1.1754944e-38, %v1937_v53  ;;  %vm1936_vm5 = vcmp.eq.f32.partialorder %v1935_v1, 8.507059e+37 }
 0x2b7   :  { %v1877_v47 = vpop.xlane.xlu0 %1876 }
 0x2b8   :  { %v1885_v48 = vsub.f32 %v1853_v17, %v1877_v47 }
 0x2b9   :  { %v5793_v52 = vpop.eup %5792 }
 0x2ba   :  { %v1927_v55 = vmul.f32 %v5793_v52, %v1904_v46  ;;  %v1900_v59 = vmul.f32 1.442695, %v1885_v48  ;;  %v1907_v51 = vpop.xlane.xlu1 %1906  ;;  %vm1932_vm2 = vweird.f32 %v5793_v52 }
 0x2bb   :  { %5794 = vrcp.f32 %v1907_v51  ;;  %vm1933_vm4 = vmor %vm1931_vm3, %vm1932_vm2  ;;  %v1952_v32 = vand.u32 2147483648, %v1907_v51  ;;  %v1950_v10 = vand.u32 2147483647, %v1907_v51  ;;  %vm1946_vm7 = vweird.f32 %v1907_v51 }
 0x2bc   :  { %v1928_v60 = vsub.f32 1.0, %v1927_v55  ;;  %5796 = vpow2.f32 %v1900_v59 }
 0x2bd   :  { %v1953_v61 = vor.u32 1.1754944e-38, %v1952_v32  ;;  %vm1951_vm9 = vcmp.eq.f32.partialorder %v1950_v10, 8.507059e+37 }
 0x2be   :  { %v1929_v54 = vmul.f32 %v5793_v52, %v1928_v60 }
 0x2c0   :  { %v1930_v57 = vadd.f32 %v5793_v52, %v1929_v54 }
 0x2c1   :  { %v5795_v3 = vpop.eup %5794 }
 0x2c2   :  { %v6398_v63 = vpop.eup %5796  ;;  %v1934_v0 = vsel %vm1933_vm4, %v5793_v52, %v1930_v57  ;;  %v1942_v6 = vmul.f32 %v5795_v3, %v1907_v51  ;;  %vm1947_vm6 = vweird.f32 %v5795_v3  ;;  %v2313_v52 = vand.u32 4294901760, %v2312_v38 }
 0x2c3   :  { %v1939_v7 = vsel %vm1936_vm5, %v1938_v4, %v1934_v0  ;;  %v1923_v5 = vsel %vm62_vm0, %v6398_v63, 0.0  ;;  %vm1948_vm8 = vmor %vm1946_vm7, %vm1947_vm6 }
 0x2c4   :  { %v1943_v56 = vsub.f32 1.0, %v1942_v6  ;;  %1924 = vadd.xlane.f32.xlu2 %v1923_v5  ;;  %v1940_v8 = vmul.f32 %v6357_v14, %v1939_v7 }
 0x2c6   :  { %v1944_v50 = vmul.f32 %v5795_v3, %v1943_v56  ;;  %v1910_v49 = vpop.xlane.xlu1 %1909  ;;  %v2047_v12 = vsel %vm62_vm0, %v1940_v8, 0 }
 0x2c7   :  { %5798 = vrcp.f32 %v1910_v49  ;;  %v6406_v16 = vand.u32 4294901760, %v2047_v12  ;;  %v1967_v37 = vand.u32 2147483648, %v1910_v49  ;;  %v1965_v40 = vand.u32 2147483647, %v1910_v49 }
 0x2c8   :  { %v1945_v15 = vadd.f32 %v5795_v3, %v1944_v50  ;;  %vm1961_vm11 = vweird.f32 %v1910_v49 }
 0x2c9   :  { %2114 = vmatmul.f32.vlgmr.msrb.gmra.mxu1 %v6406_v16  ;;  %v2071_v58 = vsub.f32 %v2047_v12, %v6406_v16  ;;  %v1968_v48 = vor.u32 1.1754944e-38, %v1967_v37  ;;  %vm1966_vm13 = vcmp.eq.f32.partialorder %v1965_v40, 8.507059e+37 }
 0x2ca   :  { %v1949_v17 = vsel %vm1948_vm8, %v5795_v3, %v1945_v15  ;;  %v2245_v14 = vpop.permute.xlu0 %2244 }
 0x2cb   :  { %v1954_v19 = vsel %vm1951_vm9, %v1953_v61, %v1949_v17  ;;  %v2268_v11 = vand.u32 4294901760, %v2245_v14  ;;  %2144 = vmatmul.f32.vlgmr.msra.gmra.mxu2 %v2071_v58  ;;  %v2072_v20 = vand.u32 4294901760, %v2071_v58 }
 0x2cc   :  { %v1955_v21 = vmul.f32 %v6363_v18, %v1954_v19 }
 0x2cd   :  { %v5799_v22 = vpop.eup %5798  ;;  %v2304_v39 = vsub.f32 %v2245_v14, %v2268_v11  ;;  %2269 = vmatpush.msrb.mxu2 %v2268_v11  ;;  %2370 = vmatpush.msrb.mxu1 %v2268_v11  ;;  %v2073_v34 = vsub.f32 %v2071_v58, %v2072_v20 }
 0x2ce   :  { %v1957_v31 = vmul.f32 %v5799_v22, %v1910_v49  ;;  %2174 = vmatmul.f32.vlgmr.msra.gmra.mxu3 %v2072_v20  ;;  %v6412_v33 = vpop.xlane.xlu1 %1912  ;;  %v2050_v35 = vsel %vm62_vm0, %v1955_v21, 0  ;;  %vm1962_vm10 = vweird.f32 %v5799_v22 }
 0x2cf   :  { %v2305_v13 = vand.u32 4294901760, %v2304_v39  ;;  %5800 = vrcp.f32 %v6412_v33  ;;  %2271 = vmatpush.msrb.mxu2 %v6403_v9  ;;  %2372 = vmatpush.msrb.mxu1 %v6403_v9  ;;  %v2074_v23 = vand.u32 4294901760, %v2073_v34  ;;  %v6418_v36 = vand.u32 4294901760, %v2050_v35  ;;  %vm1963_vm12 = vmor %vm1961_vm11, %vm1962_vm10 }
 0x2d0   :  { %v1958_v18 = vsub.f32 1.0, %v1957_v31  ;;  %v1982_v3 = vand.u32 2147483648, %v6412_v33  ;;  %v1980_v0 = vand.u32 2147483647, %v6412_v33  ;;  %vm1976_vm15 = vweird.f32 %v6412_v33 }
 0x2d1   :  { %v2306_v24 = vsub.f32 %v2304_v39, %v2305_v13  ;;  %2403 = vmatpush.msra.mxu2 %v2305_v13  ;;  %2075 = vmatmul.f32.vlgmr.msrb.gmra.mxu0 %v2074_v23  ;;  %v2079_v44 = vsub.f32 %v2050_v35, %v6418_v36 }
 0x2d2   :  { %v1959_v29 = vmul.f32 %v5799_v22, %v1958_v18  ;;  %2118 = vmatmul.f32.gmra.mxu1 %v6418_v36  ;;  %2340 = vmatpush.msrb.mxu0 %v2304_v39  ;;  %v1983_v56 = vor.u32 1.1754944e-38, %v1982_v3  ;;  %vm1981_vm3 = vcmp.eq.f32.partialorder %v1980_v0, 8.507059e+37 }
 0x2d3   :  { %v2307_v27 = vand.u32 4294901760, %v2306_v24  ;;  %2407 = vmatpush.msra.mxu2 %v2311_v2  ;;  %v2080_v46 = vand.u32 4294901760, %v2079_v44 }
 0x2d4   :  { %v1960_v45 = vadd.f32 %v5799_v22, %v1959_v29  ;;  %2149 = vmatmul.f32.gmra.mxu2 %v2079_v44  ;;  %2343 = vmatpush.msrb.mxu0 %v2310_v62 }
 0x2d5   :  { %v5801_v47 = vpop.eup %5800  ;;  %2308 = vmatpush.msrb.mxu3 %v2307_v27  ;;  %v2081_v60 = vsub.f32 %v2079_v44, %v2080_v46 }
 0x2d6   :  { %v1964_v55 = vsel %vm1963_vm12, %v5799_v22, %v1960_v45  ;;  %v1972_v59 = vmul.f32 %v5801_v47, %v6412_v33  ;;  %2180 = vmatmul.f32.gmra.mxu3 %v2080_v46  ;;  %v1916_v51 = vpop.xlane.xlu2 %1915  ;;  %vm1977_vm14 = vweird.f32 %v5801_v47 }
 0x2d7   :  { %v1969_v53 = vsel %vm1966_vm13, %v1968_v48, %v1964_v55  ;;  %5802 = vrcp.f32 %v1916_v51  ;;  %2314 = vmatpush.msrb.mxu3 %v2313_v52  ;;  %v2082_v1 = vand.u32 4294901760, %v2081_v60  ;;  %vm1978_vm2 = vmor %vm1976_vm15, %vm1977_vm14  ;;  %v1997_v15 = vand.u32 2147483648, %v1916_v51 }
 0x2d8   :  { %v1973_v54 = vsub.f32 1.0, %v1972_v59  ;;  %v1970_v57 = vmul.f32 %v6369_v26, %v1969_v53  ;;  %v1995_v17 = vand.u32 2147483647, %v1916_v51  ;;  %vm1991_vm5 = vweird.f32 %v1916_v51 }
 0x2d9   :  { %2432 = vmatpush.msra.mxu3 %v2268_v11  ;;  %2083 = vmatmul.f32.gmra.mxu0 %v2082_v1 }
 0x2da   :  { %v1974_v4 = vmul.f32 %v5801_v47, %v1973_v54  ;;  %2234 = vmatmul.f32.vlgmr.msra.gmra.mxu1 %v6406_v16  ;;  %v2249_v6 = vsel %vm62_vm0, %v1970_v57, 0  ;;  %vm1996_vm7 = vcmp.eq.f32.partialorder %v1995_v17, 8.507059e+37 }
 0x2db   :  { %2434 = vmatpush.msra.mxu3 %v6403_v9  ;;  %v6429_v7 = vand.u32 4294901760, %v2249_v6 }
 0x2dc   :  { %v1975_v5 = vadd.f32 %v5801_v47, %v1974_v4  ;;  %2648 = vrot.lane.b32.xlu2 %v6014_v41, %s5851_s0 }
 0x2dd   :  { %v5803_v26 = vpop.eup %5802  ;;  %v2273_v8 = vsub.f32 %v2249_v6, %v6429_v7 }
 0x2de   :  { %v1979_v32 = vsel %vm1978_vm2, %v5801_v47, %v1975_v5  ;;  %v1987_v50 = vmul.f32 %v5803_v26, %v1916_v51  ;;  %2316 = vmatmul.f32.vlgmr.msrb.gmra.mxu3 %v6429_v7  ;;  %vm1992_vm4 = vweird.f32 %v5803_v26 }
 0x2df   :  { %v1984_v10 = vsel %vm1981_vm3, %v1983_v56, %v1979_v32  ;;  %v2274_v9 = vand.u32 4294901760, %v2273_v8  ;;  %vm1993_vm6 = vmor %vm1991_vm5, %vm1992_vm4 }
 0x2e0   :  { %v1988_v49 = vsub.f32 1.0, %v1987_v50  ;;  %v1985_v12 = vmul.f32 %v6376_v30, %v1984_v10  ;;  %v1998_v30 = vor.u32 1.1754944e-38, %v1997_v15 }
 0x2e1   :  { %v2275_v62 = vsub.f32 %v2273_v8, %v2274_v9  ;;  %2207 = vmatmul.f32.vlgmr.msra.gmra.mxu0 %v6406_v16 }
 0x2e2   :  { %v1989_v61 = vmul.f32 %v5803_v26, %v1988_v49  ;;  %2238 = vmatmul.f32.gmra.mxu1 %v6418_v36  ;;  %v2252_v14 = vsel %vm62_vm0, %v1985_v12, 0 }
 0x2e3   :  { %v2276_v58 = vand.u32 4294901760, %v2275_v62  ;;  %v2280_v19 = vand.u32 4294901760, %v2252_v14 }
 0x2e4   :  { %v1990_v11 = vadd.f32 %v5803_v26, %v1989_v61  ;;  %2880 = vrot.lane.b32.xlu2 %v5983_v25, %s5852_s2 }
 0x2e5   :  { %2277 = vmatmul.f32.vlgmr.msrb.gmra.mxu2 %v2276_v58  ;;  %v2281_v20 = vsub.f32 %v2252_v14, %v2280_v19 }
 0x2e6   :  { %v1994_v21 = vsel %vm1993_vm6, %v5803_v26, %v1990_v11  ;;  %2320 = vmatmul.f32.gmra.mxu3 %v2280_v19  ;;  %v2447_v16 = vpop.permute.xlu1 %2446  ;;  %vm2872_vm6 = vcmask 64512  }
 0x2e7   :  { %v1999_v22 = vsel %vm1996_vm7, %v1998_v30, %v1994_v21  ;;  %v2470_v39 = vand.u32 4294901760, %v2447_v16  ;;  %v2282_v2 = vand.u32 4294901760, %v2281_v20  ;;  %vm2877_vm7 = vcmask 195584  }
 0x2e8   :  { %v2000_v31 = vmul.f32 %v6380_v28, %v1999_v22 }
 0x2e9   :  { %v2506_v33 = vsub.f32 %v2447_v16, %v2470_v39  ;;  %2471 = vmatpush.msra.mxu0 %v2470_v39  ;;  %2572 = vmatpush.msrb.mxu3 %v2470_v39  ;;  %v2283_v34 = vsub.f32 %v2281_v20, %v2282_v2 }
 0x2ea   :  { %2211 = vmatmul.f32.gmra.mxu0 %v6418_v36  ;;  %2376 = vmatmul.f32.vlgmr.msrb.gmra.mxu1 %v2274_v9  ;;  %v2451_v18 = vsel %vm62_vm0, %v2000_v31, 0 }
 0x2eb   :  { %v2507_v25 = vand.u32 4294901760, %v2506_v33  ;;  %2542 = vmatpush.msrb.mxu2 %v2506_v33  ;;  %v2284_v35 = vand.u32 4294901760, %v2283_v34  ;;  %v2474_v28 = vand.u32 4294901760, %v2451_v18 }
 0x2ed   :  { %v2508_v13 = vsub.f32 %v2506_v33, %v2507_v25  ;;  %2285 = vmatmul.f32.gmra.mxu2 %v2284_v35  ;;  %v2475_v29 = vsub.f32 %v2451_v18, %v2474_v28 }
 0x2ee   :  { %2436 = vmatmul.f32.vlgmr.msra.gmra.mxu3 %v6429_v7  ;;  %v2445_v23 = vpop.permute.xlu1 %2444 }
 0x2ef   :  { %v2509_v37 = vand.u32 4294901760, %v2508_v13  ;;  %v2472_v24 = vand.u32 4294901760, %v2445_v23  ;;  %v2476_v45 = vand.u32 4294901760, %v2475_v29 }
 0x2f1   :  { %v2512_v38 = vsub.f32 %v2445_v23, %v2472_v24  ;;  %2473 = vmatpush.msra.mxu0 %v2472_v24  ;;  %2510 = vmatpush.msra.mxu1 %v2509_v37  ;;  %v2477_v47 = vsub.f32 %v2475_v29, %v2476_v45 }
 0x2f2   :  { %2346 = vmatmul.f32.vlgmr.msrb.gmra.mxu0 %v2273_v8  ;;  %2382 = vmatmul.f32.gmra.mxu1 %v2282_v2 }
 0x2f3   :  { %2574 = vmatpush.msrb.mxu3 %v2472_v24  ;;  %2605 = vmatpush.msrb.mxu0 %v2507_v25  ;;  %v2513_v36 = vand.u32 4294901760, %v2512_v38  ;;  %v2478_v59 = vand.u32 4294901760, %v2477_v47 }
 0x2f4   :  { %2545 = vmatpush.msrb.mxu2 %v2512_v38 }
 0x2f5   :  { %2409 = vmatmul.f32.vlgmr.msra.gmra.mxu2 %v6429_v7  ;;  %2609 = vmatpush.msrb.mxu0 %v2513_v36  ;;  %v1919_v40 = vpop.xlane.xlu0 %1918  ;;  %v2514_v44 = vsub.f32 %v2512_v38, %v2513_v36 }
 0x2f6   :  { %2440 = vmatmul.f32.gmra.mxu3 %v2280_v19  ;;  %5804 = vrcp.f32 %v1919_v40  ;;  %v2012_v55 = vand.u32 2147483648, %v1919_v40  ;;  %v2010_v60 = vand.u32 2147483647, %v1919_v40  ;;  %vm2006_vm9 = vweird.f32 %v1919_v40  ;;  %v1922_v0 = vpop.xlane.xlu2 %1921  ;;  %v2647_v58 = vpop.permute.xlu1 %2646 }
 0x2f7   :  { %v2515_v27 = vand.u32 4294901760, %v2514_v44  ;;  %5806 = vrcp.f32 %v1922_v0  ;;  %v2027_v9 = vand.u32 2147483648, %v1922_v0  ;;  %vm2021_vm13 = vweird.f32 %v1922_v0 }
 0x2f8   :  { %v2013_v54 = vor.u32 1.1754944e-38, %v2012_v55  ;;  %vm2011_vm11 = vcmp.eq.f32.partialorder %v2010_v60, 8.507059e+37  ;;  %v2025_v49 = vand.u32 2147483647, %v1922_v0  ;;  %v2674_v30 = vand.u32 4294901760, %v2647_v58 }
 0x2f9   :  { %2516 = vmatpush.msra.mxu1 %v2515_v27  ;;  %v2028_v15 = vor.u32 1.1754944e-38, %v2027_v9 }
 0x2fa   :  { %2351 = vmatmul.f32.gmra.mxu0 %v2281_v20  ;;  %2518 = vmatmul.f32.vlgmr.msra.gmra.mxu1 %v2474_v28  ;;  %vm2026_vm15 = vcmp.eq.f32.partialorder %v2025_v49, 8.507059e+37  ;;  %v2714_v16 = vsub.f32 %v2647_v58, %v2674_v30 }
 0x2fb   :  { %2634 = vmatpush.msrb.mxu1 %v2470_v39 }
 0x2fc   :  { %v5805_v46 = vpop.eup %5804  ;;  %v2715_v25 = vand.u32 4294901760, %v2714_v16 }
 0x2fd   :  { %v2002_v48 = vmul.f32 %v5805_v46, %v1919_v40  ;;  %2413 = vmatmul.f32.gmra.mxu2 %v2280_v19  ;;  %2636 = vmatpush.msrb.mxu1 %v2472_v24  ;;  %vm2007_vm8 = vweird.f32 %v5805_v46  ;;  %v5807_v8 = vpop.eup %5806 }
 0x2fe   :  { %2578 = vmatmul.f32.vlgmr.msrb.gmra.mxu3 %v2476_v45  ;;  %vm2008_vm10 = vmor %vm2006_vm9, %vm2007_vm8  ;;  %v2017_v32 = vmul.f32 %v5807_v8, %v1922_v0  ;;  %vm2022_vm12 = vweird.f32 %v5807_v8  ;;  %v2716_v38 = vsub.f32 %v2714_v16, %v2715_v25 }
 0x2ff   :  { %v2003_v52 = vsub.f32 1.0, %v2002_v48  ;;  %vm2023_vm14 = vmor %vm2021_vm13, %vm2022_vm12 }
 0x300   :  { %v2018_v50 = vsub.f32 1.0, %v2017_v32  ;;  %v2717_v27 = vand.u32 4294901760, %v2716_v38 }
 0x301   :  { %v2004_v51 = vmul.f32 %v5805_v46, %v2003_v52 }
 0x302   :  { %2479 = vmatmul.f32.vlgmr.msra.gmra.mxu0 %v2478_v59 }
 0x303   :  { %v2005_v53 = vadd.f32 %v5805_v46, %v2004_v51 }
 0x305   :  { %v2009_v1 = vsel %vm2008_vm10, %v5805_v46, %v2005_v53  ;;  %2548 = vmatmul.f32.vlgmr.msrb.gmra.mxu2 %v2475_v29 }
 0x306   :  { %v2014_v57 = vsel %vm2011_vm11, %v2013_v54, %v2009_v1 }
 0x307   :  { %v2015_v3 = vmul.f32 %v6388_v42, %v2014_v57  ;;  %v2019_v42 = vmul.f32 %v5807_v8, %v2018_v50 }
 0x309   :  { %v2454_v4 = vsel %vm62_vm0, %v2015_v3, 0  ;;  %v2020_v10 = vadd.f32 %v5807_v8, %v2019_v42 }
 0x30a   :  { %v2482_v6 = vand.u32 4294901760, %v2454_v4 }
 0x30b   :  { %v2024_v12 = vsel %vm2023_vm14, %v5807_v8, %v2020_v10 }
 0x30c   :  { %2522 = vmatmul.f32.gmra.mxu1 %v2482_v6  ;;  %v2483_v7 = vsub.f32 %v2454_v4, %v2482_v6  ;;  %v2029_v62 = vsel %vm2026_vm15, %v2028_v15, %v2024_v12 }
 0x30d   :  { %v2030_v61 = vmul.f32 %v6390_v43, %v2029_v62 }
 0x30e   :  { %2553 = vmatmul.f32.gmra.mxu2 %v2483_v7  ;;  %v2484_v5 = vand.u32 4294901760, %v2483_v7 }
 0x30f   :  { %v2653_v17 = vsel %vm62_vm0, %v2030_v61, 0 }
 0x310   :  { %2584 = vmatmul.f32.gmra.mxu3 %v2484_v5  ;;  %v2485_v26 = vsub.f32 %v2483_v7, %v2484_v5  ;;  %v6451_v14 = vand.u32 4294901760, %v2653_v17 }
 0x312   :  { %v2486_v56 = vand.u32 4294901760, %v2485_v26  ;;  %v2677_v19 = vsub.f32 %v2653_v17, %v6451_v14 }
 0x314   :  { %2487 = vmatmul.f32.gmra.mxu0 %v2486_v56  ;;  %2638 = vmatmul.f32.vlgmr.msrb.gmra.mxu1 %v2474_v28  ;;  %v2678_v20 = vand.u32 4294901760, %v2677_v19 }
 0x316   :  { %v2679_v2 = vsub.f32 %v2677_v19, %v2678_v20 }
 0x318   :  { %v2680_v18 = vand.u32 4294901760, %v2679_v2 }
 0x31c   :  { %2611 = vmatmul.f32.vlgmr.msrb.gmra.mxu0 %v2474_v28  ;;  %2642 = vmatmul.f32.gmra.mxu1 %v2482_v6 }
 0x324   :  { %2615 = vmatmul.f32.gmra.mxu0 %v2482_v6 }
 0x337   :  { %v1925_v11 = vpop.xlane.xlu2 %1924 }
 0x338   :  { %5808 = vrcp.f32 %v1925_v11  ;;  %v2042_v34 = vand.u32 2147483648, %v1925_v11  ;;  %v2040_v13 = vand.u32 2147483647, %v1925_v11  ;;  %vm2036_vm3 = vweird.f32 %v1925_v11 }
 0x33a   :  { %v2043_v24 = vor.u32 1.1754944e-38, %v2042_v34  ;;  %vm2041_vm5 = vcmp.eq.f32.partialorder %v2040_v13, 8.507059e+37 }
 0x33e   :  { %v5809_v21 = vpop.eup %5808 }
 0x33f   :  { %v2032_v22 = vmul.f32 %v5809_v21, %v1925_v11  ;;  %v2649_v39 = vpop.permute.xlu2 %2648  ;;  %vm2037_vm2 = vweird.f32 %v5809_v21 }
 0x340   :  { %v2672_v31 = vand.u32 4294901760, %v2649_v39  ;;  %vm2038_vm4 = vmor %vm2036_vm3, %vm2037_vm2 }
 0x341   :  { %v2033_v33 = vsub.f32 1.0, %v2032_v22 }
 0x342   :  { %v2708_v43 = vsub.f32 %v2649_v39, %v2672_v31  ;;  %2673 = vmatpush.msra.mxu2 %v2672_v31  ;;  %2774 = vmatpush.msra.mxu1 %v2672_v31 }
 0x343   :  { %v2034_v35 = vmul.f32 %v5809_v21, %v2033_v33 }
 0x344   :  { %v2709_v23 = vand.u32 4294901760, %v2708_v43  ;;  %2675 = vmatpush.msra.mxu2 %v2674_v30  ;;  %2744 = vmatpush.msra.mxu0 %v2708_v43 }
 0x345   :  { %v2035_v37 = vadd.f32 %v5809_v21, %v2034_v35  ;;  %2776 = vmatpush.msra.mxu1 %v2674_v30  ;;  %2681 = vmatmul.f32.vlgmr.msra.gmra.mxu2 %v2680_v18 }
 0x346   :  { %v2710_v28 = vsub.f32 %v2708_v43, %v2709_v23  ;;  %2780 = vmatmul.f32.vlgmr.msra.gmra.mxu1 %v2678_v20  ;;  %2747 = vmatpush.msra.mxu0 %v2714_v16  ;;  %v6455_v45 = vpop.f32.mrf.mxu1 }
 0x347   :  { %2807 = vmatpush.msrb.mxu2 %v2709_v23  ;;  %2750 = vmatmul.f32.vlgmr.msra.gmra.mxu0 %v2677_v19  ;;  %v2039_v36 = vsel %vm2038_vm4, %v5809_v21, %v2035_v37 }
 0x348   :  { %v2711_v29 = vand.u32 4294901760, %v2710_v28  ;;  %v2044_v40 = vsel %vm2041_vm5, %v2043_v24, %v2039_v36 }
 0x349   :  { %2811 = vmatpush.msrb.mxu2 %v2715_v25  ;;  %v2045_v44 = vmul.f32 %v6398_v63, %v2044_v40 }
 0x34a   :  { %2712 = vmatpush.msra.mxu3 %v2711_v29 }
 0x34b   :  { %v2656_v46 = vsel %vm62_vm0, %v2045_v44, 0 }
 0x34c   :  { %2718 = vmatpush.msra.mxu3 %v2717_v27  ;;  %v2684_v47 = vand.u32 4294901760, %v2656_v46 }
 0x34d   :  { %2720 = vmatmul.f32.vlgmr.msra.gmra.mxu3 %v6451_v14 }
 0x34e   :  { %2836 = vmatpush.msrb.mxu3 %v2672_v31  ;;  %v2685_v48 = vsub.f32 %v2656_v46, %v2684_v47  ;;  %v6459_v52 = vpop.f32.mrf.mxu0  ;;  %v6465_v53 = vpop.f32.mrf.mxu2 }
 0x34f   :  { %v6463_v60 = vpop.f32.mrf.mxu1 }
 0x350   :  { %2838 = vmatpush.msrb.mxu3 %v2674_v30  ;;  %2755 = vmatmul.f32.gmra.mxu0 %v2685_v48  ;;  %v2686_v55 = vand.u32 4294901760, %v2685_v48 }
 0x351   :  { %v6461_v59 = vpop.f32.mrf.mxu3 }
 0x352   :  { %2786 = vmatmul.f32.gmra.mxu1 %v2686_v55  ;;  %v2687_v63 = vsub.f32 %v2685_v48, %v2686_v55 }
 0x354   :  { %v2688_v51 = vand.u32 4294901760, %v2687_v63 }
 0x355   :  { %2724 = vmatmul.f32.gmra.mxu3 %v2684_v47 }
 0x356   :  { %2689 = vmatmul.f32.gmra.mxu2 %v2688_v51  ;;  %v6467_v54 = vpop.f32.mrf.mxu0 }
 0x357   :  { %v6473_v57 = vpop.f32.mrf.mxu1  ;;  %v6477_v4 = vpop.f32.mrf.mxu2 }
 0x359   :  { %v6469_v1 = vpop.f32.mrf.mxu3 }
 0x35d   :  { %2840 = vmatmul.f32.vlgmr.msrb.gmra.mxu3 %v6451_v14 }
 0x35e   :  { %2813 = vmatmul.f32.vlgmr.msrb.gmra.mxu2 %v6451_v14  ;;  %v6475_v3 = vpop.f32.mrf.mxu0 }
 0x35f   :  { %v6481_v5 = vpop.f32.mrf.mxu1 }
 0x361   :  { %v2317_v0 = vpop.f32.mrf.mxu3 }
 0x365   :  { %2844 = vmatmul.f32.gmra.mxu3 %v2684_v47 }
 0x366   :  { %2817 = vmatmul.f32.gmra.mxu2 %v2684_v47 }
 0x367   :  { %v6479_v6 = vpop.f32.mrf.mxu0  ;;  %v2377_v50 = vpop.f32.mrf.mxu1 }
 0x368   :  { %v2278_v7 = vpop.f32.mrf.mxu2 }
 0x369   :  { %v2321_v26 = vpop.f32.mrf.mxu3  ;;  %v2318_v32 = vadd.f32 %v2317_v0, %v2278_v7 }
 0x36f   :  { %v2347_v56 = vpop.f32.mrf.mxu0  ;;  %v2383_v62 = vpop.f32.mrf.mxu1 }
 0x370   :  { %v2286_v8 = vpop.f32.mrf.mxu2  ;;  %v2348_v42 = vadd.f32 %v2347_v56, %v2318_v32 }
 0x371   :  { %v2437_v12 = vpop.f32.mrf.mxu3  ;;  %v2322_v39 = vadd.f32 %v2321_v26, %v2286_v8 }
 0x372   :  { %v2378_v10 = vadd.f32 %v2377_v50, %v2348_v42 }
 0x377   :  { %v2352_v61 = vpop.f32.mrf.mxu0  ;;  %v2519_v17 = vpop.f32.mrf.mxu1 }
 0x378   :  { %v2410_v9 = vpop.f32.mrf.mxu2  ;;  %v2353_v43 = vadd.f32 %v2352_v61, %v2322_v39  ;;  %v2906_v61 = vld [vmem:[%s7107_s6 + $0x18] sm:$0xff] }
 0x379   :  { %v2411_v49 = vadd.f32 %v2410_v9, %v2378_v10  ;;  %v2441_v19 = vpop.f32.mrf.mxu3 }
 0x37a   :  { %v2384_v23 = vadd.f32 %v2383_v62, %v2353_v43 }
 0x37b   :  { %v2438_v15 = vadd.f32 %v2437_v12, %v2411_v49 }
 0x37d   :  { %2850 = vrot.lane.b32.xlu1 %v2438_v15, %s5853_s21 }
 0x37f   :  { %v2480_v58 = vpop.f32.mrf.mxu0 }
 0x380   :  { %v2414_v14 = vpop.f32.mrf.mxu2  ;;  %v2520_v21 = vadd.f32 %v2519_v17, %v2480_v58  ;;  %v2946_v17 = vand.u32 4294901760, %v2906_v61 }
 0x381   :  { %v2579_v22 = vpop.f32.mrf.mxu3  ;;  %v2415_v24 = vadd.f32 %v2414_v14, %v2384_v23  ;;  %v2905_v14 = vld [vmem:[%s7107_s6 + $0x10] sm:$0xff] }
 0x382   :  { %v2984_v58 = vsub.f32 %v2906_v61, %v2946_v17  ;;  %3064 = vmatpush.msra.mxu3 %v2946_v17  ;;  %2947 = vmatpush.msrb.mxu0 %v2946_v17 }
 0x383   :  { %v2442_v40 = vadd.f32 %v2441_v19, %v2415_v24  ;;  %v2948_v19 = vand.u32 4294901760, %v2905_v14 }
 0x384   :  { %3030 = vmatpush.msra.mxu2 %v2984_v58 }
 0x385   :  { %3066 = vmatpush.msra.mxu3 %v2948_v19  ;;  %2949 = vmatpush.msrb.mxu0 %v2948_v19 }
 0x388   :  { %v2549_v30 = vpop.f32.mrf.mxu2 }
 0x389   :  { %v2523_v11 = vpop.f32.mrf.mxu1  ;;  %v2550_v16 = vadd.f32 %v2549_v30, %v2520_v21  ;;  %v2985_v30 = vand.u32 4294901760, %v2984_v58 }
 0x38b   :  { %v2580_v31 = vadd.f32 %v2579_v22, %v2550_v16  ;;  %v2903_v16 = vld [vmem:[%s7107_s6] sm:$0xff]  ;;  %v2986_v22 = vsub.f32 %v2984_v58, %v2985_v30 }
 0x391   :  { %v2488_v20 = vpop.f32.mrf.mxu0  ;;  %v2639_v33 = vpop.f32.mrf.mxu1 }
 0x392   :  { %v2524_v2 = vadd.f32 %v2523_v11, %v2488_v20  ;;  %v2554_v35 = vpop.f32.mrf.mxu2  ;;  %v2904_v11 = vld [vmem:[%s7107_s6 + $0x8] sm:$0xff]  ;;  %v2990_v20 = vsub.f32 %v2905_v14, %v2948_v19 }
 0x393   :  { %v2585_v37 = vpop.f32.mrf.mxu3  ;;  %v2950_v21 = vand.u32 4294901760, %v2904_v11 }
 0x394   :  { %v2555_v13 = vadd.f32 %v2554_v35, %v2524_v2  ;;  %v2991_v39 = vand.u32 4294901760, %v2990_v20  ;;  %3033 = vmatpush.msra.mxu2 %v2990_v20 }
 0x395   :  { %v2996_v2 = vsub.f32 %v2904_v11, %v2950_v21  ;;  %3068 = vmatpush.msra.mxu3 %v2950_v21  ;;  %2951 = vmatpush.msrb.mxu0 %v2950_v21 }
 0x396   :  { %v2586_v28 = vadd.f32 %v2585_v37, %v2555_v13  ;;  %v2992_v43 = vsub.f32 %v2990_v20, %v2991_v39  ;;  %v2116_v13 = vadd.f32 %v6455_v45, %v6459_v52  ;;  %v2881_v52 = vpop.permute.xlu2 %2880 }
 0x397   :  { %3036 = vmatpush.msra.mxu2 %v2996_v2 }
 0x399   :  { %v2612_v34 = vpop.f32.mrf.mxu0  ;;  %v2643_v29 = vpop.f32.mrf.mxu1 }
 0x39a   :  { %v2613_v25 = vadd.f32 %v2612_v34, %v2580_v31  ;;  %v2952_v31 = vand.u32 4294901760, %v2903_v16  ;;  %v2987_v34 = vand.u32 4294901760, %v2986_v22 }
 0x39c   :  { %v2640_v18 = vadd.f32 %v2639_v33, %v2613_v25  ;;  %v2997_v25 = vand.u32 4294901760, %v2996_v2  ;;  %v3002_v35 = vsub.f32 %v2903_v16, %v2952_v31  ;;  %3070 = vmatpush.msra.mxu3 %v2952_v31  ;;  %2953 = vmatpush.msrb.mxu0 %v2952_v31  ;;  %v2910_v16 = vld [vmem:[%s7108_s7 + $0x18] sm:$0xff] }
 0x39d   :  { %2988 = vmatpush.msrb.mxu1 %v2987_v34  ;;  %v3168_v22 = vand.u32 4294901760, %v2910_v16 }
 0x39e   :  { %2858 = vrot.lane.b32.xlu1 %v2640_v18, %s5854_s22  ;;  %v2993_v18 = vand.u32 4294901760, %v2992_v43  ;;  %v2998_v23 = vsub.f32 %v2996_v2, %v2997_v25  ;;  %v3003_v37 = vand.u32 4294901760, %v3002_v35  ;;  %3039 = vmatpush.msra.mxu2 %v3002_v35 }
 0x39f   :  { %3099 = vmatpush.msra.mxu0 %v2985_v30  ;;  %v3206_v2 = vsub.f32 %v2910_v16, %v3168_v22 }
 0x3a0   :  { %2994 = vmatpush.msrb.mxu1 %v2993_v18  ;;  %v2999_v24 = vand.u32 4294901760, %v2998_v23  ;;  %3169 = vmatpush.msrb.mxu2 %v3168_v22 }
 0x3a1   :  { %v2616_v38 = vpop.f32.mrf.mxu0  ;;  %3103 = vmatpush.msra.mxu0 %v2991_v39  ;;  %v2909_v39 = vld [vmem:[%s7108_s7 + $0x10] sm:$0xff]  ;;  %v3207_v34 = vand.u32 4294901760, %v3206_v2 }
 0x3a2   :  { %v2617_v36 = vadd.f32 %v2616_v38, %v2586_v28  ;;  %v3004_v28 = vsub.f32 %v3002_v35, %v3003_v37  ;;  %v2146_v38 = vadd.f32 %v6465_v53, %v2116_v13  ;;  %3000 = vmatpush.msrb.mxu1 %v2999_v24  ;;  %v2907_v35 = vld [vmem:[%s7108_s7] sm:$0xff] }
 0x3a3   :  { %3107 = vmatpush.msra.mxu0 %v2997_v25  ;;  %v3208_v13 = vsub.f32 %v3206_v2, %v3207_v34 }
 0x3a4   :  { %v2644_v44 = vadd.f32 %v2643_v29, %v2617_v36  ;;  %v3005_v36 = vand.u32 4294901760, %v3004_v28  ;;  %v2120_v29 = vadd.f32 %v6463_v60, %v6467_v54 }
 0x3a5   :  { %3111 = vmatpush.msra.mxu0 %v3003_v37  ;;  %v3174_v37 = vand.u32 4294901760, %v2907_v35  ;;  %v3209_v24 = vand.u32 4294901760, %v3208_v13 }
 0x3a6   :  { %2852 = vrot.lane.b32.xlu1 %v2442_v40, %s5853_s21  ;;  %2860 = vrot.lane.b32.xlu2 %v2644_v44, %s5854_s22  ;;  %v2176_v40 = vadd.f32 %v6461_v59, %v2146_v38  ;;  %v2151_v44 = vadd.f32 %v6477_v4, %v2120_v29 }
 0x3a7   :  { %3006 = vmatpush.msrb.mxu1 %v3005_v36  ;;  %v3224_v36 = vsub.f32 %v2907_v35, %v3174_v37  ;;  %3210 = vmatpush.msrb.mxu3 %v3209_v24 }
 0x3a8   :  { %v2182_v53 = vadd.f32 %v6469_v1, %v2151_v44 }
 0x3a9   :  { %3134 = vmatpush.msra.mxu1 %v2946_v17 }
 0x3aa   :  { %v2213_v60 = vadd.f32 %v6479_v6, %v2182_v53 }
 0x3ab   :  { %3136 = vmatpush.msra.mxu1 %v2948_v19 }
 0x3ad   :  { %3138 = vmatpush.msra.mxu1 %v2950_v21 }
 0x3ae   :  { %2882 = vrot.lane.b32.xlu2 %v6014_v41, %s5852_s2 }
 0x3af   :  { %3140 = vmatpush.msra.mxu1 %v2952_v31  ;;  %v3170_v31 = vand.u32 4294901760, %v2909_v39 }
 0x3b1   :  { %v3212_v43 = vsub.f32 %v2909_v39, %v3170_v31  ;;  %3171 = vmatpush.msrb.mxu2 %v3170_v31 }
 0x3b3   :  { %v3213_v18 = vand.u32 4294901760, %v3212_v43 }
 0x3b5   :  { %v3214_v28 = vsub.f32 %v3212_v43, %v3213_v18 }
 0x3b7   :  { %v3215_v29 = vand.u32 4294901760, %v3214_v28 }
 0x3b9   :  { %3216 = vmatpush.msrb.mxu3 %v3215_v29 }
 0x3c3   :  { %v2781_v0 = vpop.f32.mrf.mxu1 }
 0x3c4   :  { %v2751_v55 = vpop.f32.mrf.mxu0 }
 0x3c8   :  { %v2682_v46 = vpop.f32.mrf.mxu2 }
 0x3cd   :  { %v2756_v50 = vpop.f32.mrf.mxu0 }
 0x3cf   :  { %v2787_v9 = vpop.f32.mrf.mxu1 }
 0x3d0   :  { %v2721_v27 = vpop.f32.mrf.mxu3 }
 0x3d1   :  { %v2722_v47 = vadd.f32 %v2721_v27, %v2682_v46  ;;  %v2209_v27 = vadd.f32 %v6475_v3, %v2176_v40  ;;  %v5776_v3 = vld [vmem:[%s7106_s5] ss:$0 sm:$0xff] }
 0x3d3   :  { %v2752_v51 = vadd.f32 %v2751_v55, %v2722_v47  ;;  %v2236_v46 = vadd.f32 %v6473_v57, %v2209_v27  ;;  %v2240_v57 = vadd.f32 %v6481_v5, %v2213_v60 }
 0x3d5   :  { %v2782_v26 = vadd.f32 %v2781_v0, %v2752_v51 }
 0x3d8   :  { %v2725_v48 = vpop.f32.mrf.mxu3 }
 0x3d9   :  { %v2690_v63 = vpop.f32.mrf.mxu2 }
 0x3da   :  { %v2726_v7 = vadd.f32 %v2725_v48, %v2690_v63 }
 0x3dc   :  { %v2757_v42 = vadd.f32 %v2756_v50, %v2726_v7 }
 0x3de   :  { %v2788_v41 = vadd.f32 %v2787_v9, %v2757_v42 }
 0x3e0   :  { %v2841_v56 = vpop.f32.mrf.mxu3 }
 0x3e1   :  { %v2814_v8 = vpop.f32.mrf.mxu2 }
 0x3e2   :  { %v2815_v32 = vadd.f32 %v2814_v8, %v2782_v26 }
 0x3e4   :  { %v2842_v10 = vadd.f32 %v2841_v56, %v2815_v32 }
 0x3e6   :  { %2866 = vrot.lane.b32.xlu0 %v2842_v10, %s5855_s23 }
 0x3e8   :  { %v2845_v15 = vpop.f32.mrf.mxu3 }
 0x3e9   :  { %v2818_v49 = vpop.f32.mrf.mxu2 }
 0x3ea   :  { %v2819_v12 = vadd.f32 %v2818_v49, %v2788_v41 }
 0x3ec   :  { %v2846_v62 = vadd.f32 %v2845_v15, %v2819_v12 }
 0x3ee   :  { %2868 = vrot.lane.b32.xlu1 %v2846_v62, %s5855_s23 }
 0x3ef   :  { %v2851_v33 = vpop.permute.xlu1 %2850 }
 0x3f0   :  { %v2873_v54 = vsel %vm2872_vm6, %v2236_v46, %v2851_v33  ;;  %v2908_v33 = vld [vmem:[%s7108_s7 + $0x8] sm:$0xff]  ;;  %v2914_v46 = vld [vmem:[%s7108_s7 + $0x38] sm:$0xff] }
 0x3f1   :  { %v3172_v25 = vand.u32 4294901760, %v2908_v33  ;;  %v6537_v60 = vand.u32 4294901760, %v2914_v46 }
 0x3f3   :  { %v3218_v23 = vsub.f32 %v2908_v33, %v3172_v25  ;;  %3173 = vmatpush.msrb.mxu2 %v3172_v25 }
 0x3f5   :  { %v3219_v38 = vand.u32 4294901760, %v3218_v23  ;;  %3175 = vmatpush.msrb.mxu2 %v3174_v37 }
 0x400   :  { %v2861_v59 = vpop.permute.xlu2 %2860 }
 0x408   :  { %v2883_v26 = vpop.permute.xlu2 %2882 }
 0x410   :  { %v2859_v45 = vpop.permute.xlu1 %2858 }
 0x411   :  { %v2875_v47 = vsel %vm62_vm0, %v2873_v54, %v2859_v45  ;;  %v3220_v45 = vsub.f32 %v3218_v23, %v3219_v38  ;;  %v2913_v54 = vld [vmem:[%s7108_s7 + $0x30] sm:$0xff] }
 0x413   :  { %v3221_v40 = vand.u32 4294901760, %v3220_v45 }
 0x415   :  { %3222 = vmatpush.msrb.mxu3 %v3221_v40 }
 0x418   :  { %v2853_v48 = vpop.permute.xlu1 %2852 }
 0x419   :  { %v2874_v51 = vsel %vm2872_vm6, %v2240_v57, %v2853_v48  ;;  %v2911_v57 = vld [vmem:[%s7108_s7 + $0x20] sm:$0xff] }
 0x41a   :  { %v2876_v7 = vsel %vm62_vm0, %v2874_v51, %v2861_v59  ;;  %v6544_v59 = vsub.f32 %v2914_v46, %v6537_v60 }
 0x458   :  { %v2867_v4 = vpop.permute.xlu0 %2866 }
 0x459   :  { %v2878_v55 = vsel %vm2877_vm7, %v2875_v47, %v2867_v4  ;;  %v6546_v47 = vand.u32 4294901760, %v2913_v54  ;;  %v3423_v4 = vand.u32 4294901760, %v6544_v59 }
 0x45a   :  { %v2886_v1 = vadd.f32 %v2881_v52, %v2878_v55  ;;  %v3225_v52 = vand.u32 4294901760, %v3224_v36 }
 0x45c   :  { %v2891_v63 = vadd.f32 %v5776_v3, %v2886_v1  ;;  %v3226_v44 = vsub.f32 %v3224_v36, %v3225_v52  ;;  %v6556_v1 = vsub.f32 %v2913_v54, %v6546_v47 }
 0x45e   :  { %v2895_v6 = vmul.f32 1.442695, %v2891_v63  ;;  %vm2893_vm8 = vcmp.gt.f32.partialorder %v2891_v63, 0.0  ;;  %v3227_v27 = vand.u32 4294901760, %v3226_v44  ;;  %v3429_v51 = vand.u32 4294901760, %v6556_v1 }
 0x460   :  { %5810 = vpow2.f32 %v2895_v6  ;;  %v2869_v0 = vpop.permute.xlu1 %2868  ;;  %3228 = vmatpush.msrb.mxu3 %v3227_v27  ;;  %v6564_v6 = vand.u32 4294901760, %v2911_v57  ;;  %v2915_v27 = vld [vmem:[%s7108_s7 + $0x40] sm:$0xff] }
 0x461   :  { %v2879_v56 = vsel %vm2877_vm7, %v2876_v7, %v2869_v0  ;;  %v6639_v54 = vand.u32 4294901760, %v2915_v27 }
 0x462   :  { %v2887_v8 = vadd.f32 %v2883_v26, %v2879_v56  ;;  %v3430_v26 = vsub.f32 %v6556_v1, %v3429_v51  ;;  %v6572_v56 = vsub.f32 %v2911_v57, %v6564_v6 }
 0x464   :  { %v2892_v32 = vadd.f32 %v5776_v3, %v2887_v8  ;;  %v2912_v3 = vld [vmem:[%s7108_s7 + $0x28] sm:$0xff] }
 0x465   :  { %v6553_v55 = vand.u32 4294901760, %v2912_v3 }
 0x466   :  { %v5811_v50 = vpop.eup %5810  ;;  %v2897_v42 = vmul.f32 1.442695, %v2892_v32  ;;  %vm2894_vm9 = vcmp.gt.f32.partialorder %v2892_v32, 0.0 }
 0x467   :  { %v5763_v10 = vadd.f32 -1.0, %v5811_v50  ;;  %v6567_v0 = vsub.f32 %v2912_v3, %v6553_v55 }
 0x468   :  { %5812 = vpow2.f32 %v2897_v42  ;;  %v3431_v42 = vand.u32 4294901760, %v3430_v26 }
 0x469   :  { %v2901_v9 = vsel %vm2893_vm8, %v2891_v63, %v5763_v10  ;;  %v3424_v63 = vsub.f32 %v6544_v59, %v3423_v4  ;;  %v3441_v10 = vand.u32 4294901760, %v6572_v56 }
 0x46a   :  { %v2929_v5 = vsel %vm259_vm1, %v2901_v9, 0 }
 0x46b   :  { %v2954_v41 = vand.u32 4294901760, %v2929_v5  ;;  %v3425_v7 = vand.u32 4294901760, %v3424_v63 }
 0x46d   :  { %v2955_v49 = vsub.f32 %v2929_v5, %v2954_v41  ;;  %3008 = vmatmul.f32.vlgmr.msrb.gmra.mxu1 %v2954_v41 }
 0x46e   :  { %v5813_v12 = vpop.eup %5812  ;;  %3286 = vmatpush.msrb.mxu1 %v3168_v22 }
 0x46f   :  { %v5764_v15 = vadd.f32 -1.0, %v5813_v12  ;;  %3042 = vmatmul.f32.vlgmr.msra.gmra.mxu2 %v2955_v49  ;;  %v2956_v62 = vand.u32 4294901760, %v2955_v49 }
 0x470   :  { %3288 = vmatpush.msrb.mxu1 %v3170_v31  ;;  %3321 = vmatpush.msra.mxu2 %v3207_v34  ;;  %v2918_v34 = vld [vmem:[%s7108_s7 + $0x58] sm:$0xff] }
 0x471   :  { %v2902_v61 = vsel %vm2894_vm9, %v2892_v32, %v5764_v15  ;;  %3074 = vmatmul.f32.vlgmr.msra.gmra.mxu3 %v2956_v62  ;;  %v2957_v17 = vsub.f32 %v2955_v49, %v2956_v62  ;;  %v3435_v32 = vand.u32 4294901760, %v6567_v0  ;;  %v3442_v49 = vsub.f32 %v6572_v56, %v3441_v10 }
 0x472   :  { %v2932_v14 = vsel %vm259_vm1, %v2902_v61, 0  ;;  %3290 = vmatpush.msrb.mxu1 %v3172_v25  ;;  %3325 = vmatpush.msra.mxu2 %v3213_v18  ;;  %v2917_v18 = vld [vmem:[%s7108_s7 + $0x50] sm:$0xff] }
 0x473   :  { %v2958_v58 = vand.u32 4294901760, %v2957_v17  ;;  %v2962_v19 = vand.u32 4294901760, %v2932_v14  ;;  %3356 = vmatpush.msra.mxu3 %v3168_v22  ;;  %v3443_v62 = vand.u32 4294901760, %v3442_v49  ;;  %v6609_v24 = vand.u32 4294901760, %v2917_v18 }
 0x474   :  { %3292 = vmatpush.msrb.mxu1 %v3174_v37  ;;  %3329 = vmatpush.msra.mxu2 %v3219_v38  ;;  %v2916_v38 = vld [vmem:[%s7108_s7 + $0x48] sm:$0xff] }
 0x475   :  { %2959 = vmatmul.f32.vlgmr.msrb.gmra.mxu0 %v2958_v58  ;;  %3012 = vmatmul.f32.gmra.mxu1 %v2962_v19  ;;  %v2963_v11 = vsub.f32 %v2932_v14, %v2962_v19  ;;  %v6622_v45 = vsub.f32 %v2917_v18, %v6609_v24  ;;  %v2924_v18 = vld [vmem:[%s7109_s8 + $0x1] sm:$0x1] }
 0x476   :  { %3252 = vmatpush.msrb.mxu0 %v3206_v2  ;;  %3333 = vmatpush.msra.mxu2 %v3225_v52  ;;  %v6624_v52 = vand.u32 4294901760, %v2916_v38 }
 0x477   :  { %3047 = vmatmul.f32.gmra.mxu2 %v2963_v11  ;;  %v2964_v30 = vand.u32 4294901760, %v2963_v11  ;;  %3358 = vmatpush.msra.mxu3 %v3170_v31 }
 0x478   :  { %3255 = vmatpush.msrb.mxu0 %v3212_v43  ;;  %v6637_v46 = vsub.f32 %v2916_v38, %v6624_v52 }
 0x479   :  { %3080 = vmatmul.f32.gmra.mxu3 %v2964_v30  ;;  %v2965_v20 = vsub.f32 %v2963_v11, %v2964_v30 }
 0x47a   :  { %3258 = vmatpush.msrb.mxu0 %v3218_v23  ;;  %3360 = vmatpush.msra.mxu3 %v3172_v25  ;;  %v6594_v25 = vand.u32 4294901760, %v2918_v34  ;;  %v3651_v3 = vand.u32 4294901760, %v6637_v46 }
 0x47b   :  { %v2966_v21 = vand.u32 4294901760, %v2965_v20 }
 0x47c   :  { %3261 = vmatpush.msrb.mxu0 %v3224_v36  ;;  %3362 = vmatpush.msra.mxu3 %v3174_v37  ;;  %v6607_v37 = vsub.f32 %v2918_v34, %v6594_v25 }
 0x47d   :  { %2967 = vmatmul.f32.gmra.mxu0 %v2966_v21  ;;  %3142 = vmatmul.f32.vlgmr.msra.gmra.mxu1 %v2954_v41 }
 0x47e   :  { %3426 = vmatpush.msra.mxu1 %v3425_v7  ;;  %v3639_v29 = vand.u32 4294901760, %v6607_v37 }
 0x480   :  { %3432 = vmatpush.msra.mxu1 %v3431_v42 }
 0x485   :  { %3113 = vmatmul.f32.vlgmr.msra.gmra.mxu0 %v2954_v41  ;;  %3146 = vmatmul.f32.gmra.mxu1 %v2962_v19  ;;  %v3436_v41 = vsub.f32 %v6567_v0, %v3435_v32 }
 0x486   :  { %3385 = vmatpush.msra.mxu0 %v6537_v60 }
 0x487   :  { %v3437_v12 = vand.u32 4294901760, %v3436_v41 }
 0x488   :  { %3387 = vmatpush.msra.mxu0 %v6546_v47 }
 0x489   :  { %3438 = vmatpush.msra.mxu1 %v3437_v12 }
 0x48a   :  { %3389 = vmatpush.msra.mxu0 %v6553_v55 }
 0x48b   :  { %3444 = vmatpush.msra.mxu1 %v3443_v62 }
 0x48c   :  { %3391 = vmatpush.msra.mxu0 %v6564_v6 }
 0x48d   :  { %3117 = vmatmul.f32.gmra.mxu0 %v2962_v19 }
 0x4ea   :  { %v3009_v53 = vpop.f32.mrf.mxu1 }
 0x4f2   :  { %v2960_v48 = vpop.f32.mrf.mxu0  ;;  %v3013_v8 = vpop.f32.mrf.mxu1 }
 0x4f3   :  { %v3010_v50 = vadd.f32 %v3009_v53, %v2960_v48  ;;  %v3043_v9 = vpop.f32.mrf.mxu2  ;;  %v3645_v53 = vand.u32 4294901760, %v6622_v45 }
 0x4f4   :  { %v3075_v61 = vpop.f32.mrf.mxu3 }
 0x4f5   :  { %v3044_v15 = vadd.f32 %v3043_v9, %v3010_v50  ;;  %v2919_v9 = vld [vmem:[%s7108_s7 + $0x60] sm:$0xff] }
 0x4f6   :  { %v6717_v49 = vand.u32 4294901760, %v2919_v9 }
 0x4f7   :  { %v3076_v17 = vadd.f32 %v3075_v61, %v3044_v15 }
 0x4f8   :  { %v3872_v61 = vsub.f32 %v2919_v9, %v6717_v49 }
 0x4fa   :  { %v2968_v5 = vpop.f32.mrf.mxu0  ;;  %v3143_v58 = vpop.f32.mrf.mxu1 }
 0x4fb   :  { %v3014_v14 = vadd.f32 %v3013_v8, %v2968_v5  ;;  %v3048_v30 = vpop.f32.mrf.mxu2 }
 0x4fc   :  { %v3081_v22 = vpop.f32.mrf.mxu3 }
 0x4fd   :  { %v3049_v20 = vadd.f32 %v3048_v30, %v3014_v14 }
 0x4ff   :  { %v3082_v2 = vadd.f32 %v3081_v22, %v3049_v20 }
 0x502   :  { %v3114_v19 = vpop.f32.mrf.mxu0  ;;  %v3147_v35 = vpop.f32.mrf.mxu1 }
 0x503   :  { %v3115_v11 = vadd.f32 %v3114_v19, %v3076_v17  ;;  %v3873_v19 = vand.u32 4294901760, %v3872_v61 }
 0x505   :  { %v6580_v21 = vadd.f32 %v3143_v58, %v3115_v11 }
 0x507   :  { %v3151_v16 = vsel %vm259_vm1, %v6580_v21, 0 }
 0x508   :  { %v6584_v39 = vand.u32 4294901760, %v3151_v16 }
 0x50a   :  { %v6587_v31 = vsub.f32 %v3151_v16, %v6584_v39  ;;  %v3118_v33 = vpop.f32.mrf.mxu0  ;;  %3230 = vmatmul.f32.vlgmr.msrb.gmra.mxu3 %v6584_v39  ;;  %v3874_v16 = vsub.f32 %v3872_v61, %v3873_v19 }
 0x50b   :  { %v3119_v43 = vadd.f32 %v3118_v33, %v3082_v2  ;;  %3502 = vmatpush.msrb.mxu3 %v6537_v60  ;;  %v2923_v33 = vld [vmem:[%s7109_s8] sm:$0x1] }
 0x50c   :  { %3264 = vmatmul.f32.vlgmr.msrb.gmra.mxu0 %v6587_v31  ;;  %v6598_v13 = vand.u32 4294901760, %v6587_v31  ;;  %v3875_v2 = vand.u32 4294901760, %v3874_v16  ;;  %v4021_v34 = vsel %vm259_vm1, %v2923_v33, 0 }
 0x50d   :  { %v6603_v23 = vadd.f32 %v3147_v35, %v3119_v43  ;;  %3504 = vmatpush.msrb.mxu3 %v6546_v47  ;;  %3537 = vmatpush.msrb.mxu0 %v3423_v4  ;;  %v6653_v4 = vsub.f32 %v2915_v27, %v6639_v54  ;;  %v4041_v43 = vand.u32 4294901760, %v4021_v34  ;;  %v2925_v35 = vld [vmem:[%s7109_s8 + $0x2] sm:$0x1] }
 0x50e   :  { %3296 = vmatmul.f32.vlgmr.msrb.gmra.mxu1 %v6598_v13  ;;  %v3179_v28 = vsub.f32 %v6587_v31, %v6598_v13 }
 0x50f   :  { %v3154_v36 = vsel %vm259_vm1, %v6603_v23, 0  ;;  %3506 = vmatpush.msrb.mxu3 %v6553_v55  ;;  %3541 = vmatpush.msrb.mxu0 %v3429_v51 }
 0x510   :  { %v6626_v40 = vand.u32 4294901760, %v3154_v36  ;;  %v6628_v44 = vand.u32 4294901760, %v3179_v28  ;;  %3572 = vmatpush.msrb.mxu1 %v6537_v60  ;;  %v3640_v60 = vsub.f32 %v6607_v37, %v3639_v29  ;;  %v4183_v28 = vsel %vm259_vm1, %v2924_v18, 0 }
 0x511   :  { %3508 = vmatpush.msrb.mxu3 %v6564_v6  ;;  %3545 = vmatpush.msrb.mxu0 %v3435_v32  ;;  %v2921_v32 = vld [vmem:[%s7108_s7 + $0x70] sm:$0xff] }
 0x512   :  { %v6642_v48 = vsub.f32 %v3154_v36, %v6626_v40  ;;  %3181 = vmatmul.f32.vlgmr.msrb.gmra.mxu2 %v6628_v44  ;;  %3234 = vmatmul.f32.gmra.mxu3 %v6626_v40  ;;  %v3641_v51 = vand.u32 4294901760, %v3640_v60  ;;  %v6698_v42 = vand.u32 4294901760, %v2921_v32 }
 0x513   :  { %3574 = vmatpush.msrb.mxu1 %v6546_v47  ;;  %3468 = vmatpush.msrb.mxu2 %v6544_v59  ;;  %v3646_v59 = vsub.f32 %v6622_v45, %v3645_v53  ;;  %v3657_v47 = vand.u32 4294901760, %v6653_v4 }
 0x514   :  { %3269 = vmatmul.f32.gmra.mxu0 %v6642_v48  ;;  %v6657_v57 = vand.u32 4294901760, %v6642_v48  ;;  %v6715_v41 = vsub.f32 %v2921_v32, %v6698_v42 }
 0x515   :  { %3549 = vmatpush.msrb.mxu0 %v3441_v10  ;;  %3576 = vmatpush.msrb.mxu1 %v6553_v55  ;;  %v3652_v55 = vsub.f32 %v6637_v46, %v3651_v3  ;;  %v3647_v26 = vand.u32 4294901760, %v3646_v59  ;;  %v3658_v8 = vsub.f32 %v6653_v4, %v3657_v47 }
 0x516   :  { %3302 = vmatmul.f32.gmra.mxu1 %v6657_v57  ;;  %v3187_v63 = vsub.f32 %v6642_v48, %v6657_v57  ;;  %3471 = vmatpush.msrb.mxu2 %v6556_v1  ;;  %v2922_v1 = vld [vmem:[%s7108_s7 + $0x78] sm:$0xff]  ;;  %v3861_v62 = vand.u32 4294901760, %v6715_v41 }
 0x517   :  { %3578 = vmatpush.msrb.mxu1 %v6564_v6  ;;  %v3653_v6 = vand.u32 4294901760, %v3652_v55  ;;  %v3659_v50 = vand.u32 4294901760, %v3658_v8 }
 0x518   :  { %v6674_v7 = vand.u32 4294901760, %v3187_v63  ;;  %3474 = vmatpush.msrb.mxu2 %v6567_v0  ;;  %v6687_v0 = vand.u32 4294901760, %v2922_v1  ;;  %v3862_v58 = vsub.f32 %v6715_v41, %v3861_v62 }
 0x51a   :  { %3189 = vmatmul.f32.gmra.mxu2 %v6674_v7  ;;  %3364 = vmatmul.f32.vlgmr.msra.gmra.mxu3 %v6584_v39  ;;  %v6702_v10 = vsub.f32 %v2922_v1, %v6687_v0  ;;  %v3863_v20 = vand.u32 4294901760, %v3862_v58 }
 0x51b   :  { %3477 = vmatpush.msrb.mxu2 %v6572_v56  ;;  %3642 = vmatpush.msra.mxu3 %v3641_v51  ;;  %v2920_v56 = vld [vmem:[%s7108_s7 + $0x68] sm:$0xff] }
 0x51c   :  { %3397 = vmatmul.f32.vlgmr.msra.gmra.mxu0 %v6628_v44  ;;  %v6708_v5 = vand.u32 4294901760, %v2920_v56  ;;  %v3855_v12 = vand.u32 4294901760, %v6702_v10 }
 0x51d   :  { %3648 = vmatpush.msra.mxu3 %v3647_v26  ;;  %3684 = vmatpush.msra.mxu0 %v6607_v37  ;;  %v4345_v37 = vsel %vm259_vm1, %v2925_v35, 0 }
 0x51e   :  { %3446 = vmatmul.f32.vlgmr.msra.gmra.mxu1 %v6584_v39  ;;  %v6724_v15 = vsub.f32 %v2920_v56, %v6708_v5  ;;  %v3856_v17 = vsub.f32 %v6702_v10, %v3855_v12  ;;  %v4365_v38 = vand.u32 4294901760, %v4345_v37 }
 0x51f   :  { %3654 = vmatpush.msra.mxu3 %v3653_v6  ;;  %3687 = vmatpush.msra.mxu0 %v6622_v45 }
 0x520   :  { %3718 = vmatpush.msra.mxu1 %v6594_v25  ;;  %v3867_v14 = vand.u32 4294901760, %v6724_v15  ;;  %v3857_v11 = vand.u32 4294901760, %v3856_v17  ;;  %v4366_v45 = vsub.f32 %v4345_v37, %v4365_v38 }
 0x521   :  { %3660 = vmatpush.msra.mxu3 %v3659_v50  ;;  %3690 = vmatpush.msra.mxu0 %v6637_v46 }
 0x522   :  { %3335 = vmatmul.f32.vlgmr.msra.gmra.mxu2 %v6584_v39  ;;  %3368 = vmatmul.f32.gmra.mxu3 %v6626_v40  ;;  %v3868_v30 = vsub.f32 %v6724_v15, %v3867_v14 }
 0x523   :  { %3720 = vmatpush.msra.mxu1 %v6609_v24  ;;  %3601 = vmatpush.msra.mxu2 %v6594_v25 }
 0x524   :  { %3405 = vmatmul.f32.gmra.mxu0 %v6674_v7  ;;  %v3869_v22 = vand.u32 4294901760, %v3868_v30 }
 0x525   :  { %3693 = vmatpush.msra.mxu0 %v6653_v4  ;;  %3722 = vmatpush.msra.mxu1 %v6624_v52 }
 0x526   :  { %3450 = vmatmul.f32.gmra.mxu1 %v6626_v40  ;;  %3603 = vmatpush.msra.mxu2 %v6609_v24 }
 0x527   :  { %3724 = vmatpush.msra.mxu1 %v6639_v54 }
 0x528   :  { %3605 = vmatpush.msra.mxu2 %v6624_v52 }
 0x52a   :  { %3339 = vmatmul.f32.gmra.mxu2 %v6626_v40  ;;  %3512 = vmatmul.f32.vlgmr.msrb.gmra.mxu3 %v6598_v13 }
 0x52b   :  { %3788 = vmatpush.msrb.mxu3 %v6594_v25  ;;  %3607 = vmatpush.msra.mxu2 %v6639_v54  ;;  %v4042_v25 = vsub.f32 %v4021_v34, %v4041_v43 }
 0x52c   :  { %3551 = vmatmul.f32.vlgmr.msrb.gmra.mxu0 %v6584_v39 }
 0x52d   :  { %3790 = vmatpush.msrb.mxu3 %v6609_v24  ;;  %3817 = vmatpush.msrb.mxu0 %v6687_v0  ;;  %v4043_v24 = vand.u32 4294901760, %v4042_v25 }
 0x52e   :  { %3580 = vmatmul.f32.vlgmr.msrb.gmra.mxu1 %v6584_v39 }
 0x52f   :  { %3792 = vmatpush.msrb.mxu3 %v6624_v52  ;;  %3819 = vmatpush.msrb.mxu0 %v6698_v42  ;;  %v4044_v36 = vsub.f32 %v4042_v25, %v4043_v24 }
 0x530   :  { %3858 = vmatpush.msrb.mxu1 %v3857_v11 }
 0x531   :  { %3794 = vmatpush.msrb.mxu3 %v6639_v54  ;;  %3821 = vmatpush.msrb.mxu0 %v6708_v5  ;;  %v4045_v52 = vand.u32 4294901760, %v4044_v36 }
 0x532   :  { %3480 = vmatmul.f32.vlgmr.msrb.gmra.mxu2 %v6587_v31  ;;  %3518 = vmatmul.f32.gmra.mxu3 %v6657_v57 }
 0x533   :  { %3864 = vmatpush.msrb.mxu1 %v3863_v20  ;;  %3753 = vmatpush.msrb.mxu2 %v3639_v29  ;;  %v4203_v29 = vand.u32 4294901760, %v4183_v28 }
 0x534   :  { %3555 = vmatmul.f32.gmra.mxu0 %v6626_v40 }
 0x535   :  { %3823 = vmatpush.msrb.mxu0 %v6717_v49  ;;  %3870 = vmatpush.msrb.mxu1 %v3869_v22  ;;  %v4204_v27 = vsub.f32 %v4183_v28, %v4203_v29 }
 0x536   :  { %3584 = vmatmul.f32.gmra.mxu1 %v6626_v40  ;;  %3757 = vmatpush.msrb.mxu2 %v3645_v53  ;;  %v4367_v53 = vand.u32 4294901760, %v4366_v45 }
 0x537   :  { %3876 = vmatpush.msrb.mxu1 %v3875_v2  ;;  %v4205_v46 = vand.u32 4294901760, %v4204_v27 }
 0x538   :  { %3761 = vmatpush.msrb.mxu2 %v3651_v3  ;;  %v4368_v54 = vsub.f32 %v4366_v45, %v4367_v53 }
 0x539   :  { %v4206_v3 = vsub.f32 %v4204_v27, %v4205_v46 }
 0x53a   :  { %3485 = vmatmul.f32.gmra.mxu2 %v6642_v48  ;;  %3662 = vmatmul.f32.vlgmr.msra.gmra.mxu3 %v6584_v39  ;;  %v4369_v60 = vand.u32 4294901760, %v4368_v54 }
 0x53b   :  { %3934 = vmatpush.msra.mxu3 %v6687_v0  ;;  %3765 = vmatpush.msrb.mxu2 %v3657_v47  ;;  %v4207_v4 = vand.u32 4294901760, %v4206_v3 }
 0x53c   :  { %3696 = vmatmul.f32.vlgmr.msra.gmra.mxu0 %v6587_v31 }
 0x53d   :  { %3936 = vmatpush.msra.mxu3 %v6698_v42  ;;  %3969 = vmatpush.msra.mxu0 %v3855_v12 }
 0x53e   :  { %3728 = vmatmul.f32.vlgmr.msra.gmra.mxu1 %v6598_v13 }
 0x53f   :  { %3938 = vmatpush.msra.mxu3 %v6708_v5  ;;  %3973 = vmatpush.msra.mxu0 %v3861_v62 }
 0x540   :  { %4004 = vmatpush.msra.mxu1 %v6687_v0 }
 0x541   :  { %3940 = vmatpush.msra.mxu3 %v6717_v49  ;;  %3977 = vmatpush.msra.mxu0 %v3867_v14 }
 0x542   :  { %3613 = vmatmul.f32.vlgmr.msra.gmra.mxu2 %v6628_v44  ;;  %3666 = vmatmul.f32.gmra.mxu3 %v6626_v40 }
 0x543   :  { %4006 = vmatpush.msra.mxu1 %v6698_v42  ;;  %3900 = vmatpush.msra.mxu2 %v6702_v10 }
 0x544   :  { %3701 = vmatmul.f32.gmra.mxu0 %v6642_v48 }
 0x545   :  { %3981 = vmatpush.msra.mxu0 %v3873_v19  ;;  %4008 = vmatpush.msra.mxu1 %v6708_v5 }
 0x546   :  { %3734 = vmatmul.f32.gmra.mxu1 %v6657_v57  ;;  %3903 = vmatpush.msra.mxu2 %v6715_v41 }
 0x547   :  { %4010 = vmatpush.msra.mxu1 %v6717_v49 }
 0x548   :  { %3906 = vmatpush.msra.mxu2 %v6724_v15 }
 0x54a   :  { %3621 = vmatmul.f32.gmra.mxu2 %v6674_v7  ;;  %3796 = vmatmul.f32.vlgmr.msrb.gmra.mxu3 %v6584_v39 }
 0x54b   :  { %4069 = vmatpush.xpose.msrb.mxu3 %v6674_v7  ;;  %3909 = vmatpush.msra.mxu2 %v3872_v61 }
 0x54c   :  { %3829 = vmatmul.f32.vlgmr.msrb.gmra.mxu0 %v6628_v44 }
 0x54d   :  { %4149 = vmatpush.xpose.msrb.mxu0 %v6657_v57 }
 0x54e   :  { %3878 = vmatmul.f32.vlgmr.msrb.gmra.mxu1 %v6584_v39 }
 0x54f   :  { %4075 = vmatpush.xpose.msrb.mxu3 %v6628_v44  ;;  %4174 = vmatpush.xpose.msrb.mxu1 %v6626_v40 }
 0x551   :  { %4153 = vmatpush.xpose.msrb.mxu0 %v6598_v13 }
 0x552   :  { %3767 = vmatmul.f32.vlgmr.msrb.gmra.mxu2 %v6584_v39  ;;  %3800 = vmatmul.f32.gmra.mxu3 %v6626_v40 }
 0x553   :  { %4038 = vmatpush.xpose.msrb.mxu2 %v6626_v40  ;;  %4176 = vmatpush.xpose.msrb.mxu1 %v6584_v39 }
 0x554   :  { %3837 = vmatmul.f32.gmra.mxu0 %v6674_v7 }
 0x556   :  { %3882 = vmatmul.f32.gmra.mxu1 %v6626_v40 }
 0x557   :  { %4040 = vmatpush.xpose.msrb.mxu2 %v6584_v39 }
 0x55a   :  { %3771 = vmatmul.f32.gmra.mxu2 %v6626_v40  ;;  %3944 = vmatmul.f32.vlgmr.msra.gmra.mxu3 %v6598_v13 }
 0x55b   :  { %4122 = vmatpush.xpose.msra.mxu3 %v6626_v40 }
 0x55c   :  { %3983 = vmatmul.f32.vlgmr.msra.gmra.mxu0 %v6584_v39 }
 0x55d   :  { %4259 = vmatpush.xpose.msra.mxu0 %v6642_v48 }
 0x55e   :  { %4012 = vmatmul.f32.vlgmr.msra.gmra.mxu1 %v6584_v39 }
 0x55f   :  { %4124 = vmatpush.xpose.msra.mxu3 %v6584_v39  ;;  %4284 = vmatpush.xpose.msra.mxu1 %v6626_v40 }
 0x561   :  { %4262 = vmatpush.xpose.msra.mxu0 %v6587_v31 }
 0x562   :  { %3912 = vmatmul.f32.vlgmr.msra.gmra.mxu2 %v6587_v31  ;;  %3950 = vmatmul.f32.gmra.mxu3 %v6657_v57 }
 0x563   :  { %4097 = vmatpush.xpose.msra.mxu2 %v6642_v48  ;;  %4286 = vmatpush.xpose.msra.mxu1 %v6584_v39 }
 0x564   :  { %3987 = vmatmul.f32.gmra.mxu0 %v6626_v40 }
 0x566   :  { %4016 = vmatmul.f32.gmra.mxu1 %v6626_v40 }
 0x567   :  { %4100 = vmatpush.xpose.msra.mxu2 %v6587_v31 }
 0x56a   :  { %3917 = vmatmul.f32.gmra.mxu2 %v6642_v48  ;;  %4077 = vmatmul.f32.vlgmr.msrb.gmra.mxu3 %v4041_v43 }
 0x56b   :  { %4231 = vmatpush.xpose.msrb.mxu3 %v6674_v7 }
 0x56c   :  { %4155 = vmatmul.f32.vlgmr.msrb.gmra.mxu0 %v4041_v43 }
 0x56d   :  { %4362 = vmatpush.xpose.msrb.mxu0 %v6626_v40 }
 0x56e   :  { %4178 = vmatmul.f32.vlgmr.msrb.gmra.mxu1 %v4041_v43 }
 0x56f   :  { %4237 = vmatpush.xpose.msrb.mxu3 %v6628_v44  ;;  %4393 = vmatpush.xpose.msrb.mxu1 %v6674_v7 }
 0x571   :  { %4364 = vmatpush.xpose.msrb.mxu0 %v6584_v39 }
 0x572   :  { %4046 = vmatmul.f32.vlgmr.msrb.gmra.mxu2 %v4045_v52  ;;  %4128 = vmatmul.f32.vlgmr.msra.gmra.mxu3 %v4043_v24 }
 0x573   :  { %4200 = vmatpush.xpose.msrb.mxu2 %v6626_v40  ;;  %4336 = vmatpush.xpose.msra.mxu3 %v6626_v40 }
 0x574   :  { %4399 = vmatpush.xpose.msrb.mxu1 %v6628_v44  ;;  %4265 = vmatmul.f32.vlgmr.msra.gmra.mxu0 %v4204_v27 }
 0x575   :  { %4473 = vmatpush.xpose.msra.mxu0 %v6657_v57 }
 0x576   :  { %4290 = vmatmul.f32.vlgmr.msra.gmra.mxu1 %v4205_v46 }
 0x577   :  { %4202 = vmatpush.xpose.msrb.mxu2 %v6584_v39  ;;  %4338 = vmatpush.xpose.msra.mxu3 %v6584_v39 }
 0x578   :  { %4498 = vmatpush.xpose.msra.mxu1 %v6626_v40 }
 0x579   :  { %4477 = vmatpush.xpose.msra.mxu0 %v6598_v13 }
 0x57a   :  { %4103 = vmatmul.f32.vlgmr.msra.gmra.mxu2 %v4042_v25  ;;  %4239 = vmatmul.f32.vlgmr.msrb.gmra.mxu3 %v4203_v29 }
 0x57b   :  { %4311 = vmatpush.xpose.msra.mxu2 %v6657_v57  ;;  %4446 = vmatpush.xpose.msrb.mxu3 %v6626_v40 }
 0x57c   :  { %4500 = vmatpush.xpose.msra.mxu1 %v6584_v39  ;;  %4370 = vmatmul.f32.vlgmr.msrb.gmra.mxu0 %v4369_v60 }
 0x57d   :  { %4583 = vmatpush.xpose.msrb.mxu0 %v6642_v48 }
 0x57e   :  { %4401 = vmatmul.f32.vlgmr.msrb.gmra.mxu1 %v4365_v38 }
 0x57f   :  { %4315 = vmatpush.xpose.msra.mxu2 %v6598_v13  ;;  %4448 = vmatpush.xpose.msrb.mxu3 %v6584_v39 }
 0x580   :  { %4608 = vmatpush.xpose.msrb.mxu1 %v6626_v40 }
 0x581   :  { %4586 = vmatpush.xpose.msrb.mxu0 %v6587_v31 }
 0x582   :  { %4208 = vmatmul.f32.vlgmr.msrb.gmra.mxu2 %v4207_v4  ;;  %4340 = vmatmul.f32.vlgmr.msra.gmra.mxu3 %v4203_v29 }
 0x583   :  { %4421 = vmatpush.xpose.msrb.mxu2 %v6642_v48  ;;  %4555 = vmatpush.xpose.msra.mxu3 %v6674_v7 }
 0x584   :  { %4610 = vmatpush.xpose.msrb.mxu1 %v6584_v39  ;;  %4479 = vmatmul.f32.vlgmr.msra.gmra.mxu0 %v4365_v38 }
 0x586   :  { %4502 = vmatmul.f32.vlgmr.msra.gmra.mxu1 %v4365_v38 }
 0x587   :  { %4424 = vmatpush.xpose.msrb.mxu2 %v6587_v31  ;;  %4561 = vmatpush.xpose.msra.mxu3 %v6628_v44 }
 0x589   :  { %v3265_v59 = vpop.f32.mrf.mxu0 }
 0x58a   :  { %4317 = vmatmul.f32.vlgmr.msra.gmra.mxu2 %v4203_v29  ;;  %4452 = vmatmul.f32.vlgmr.msrb.gmra.mxu3 %v4367_v53 }
 0x58b   :  { %4524 = vmatpush.xpose.msra.mxu2 %v6626_v40  ;;  %4660 = vmatpush.xpose.msrb.mxu3 %v6626_v40  ;;  %v3297_v47 = vpop.f32.mrf.mxu1 }
 0x58d   :  { %v3231_v63 = vpop.f32.mrf.mxu3 }
 0x58f   :  { %4526 = vmatpush.xpose.msra.mxu2 %v6584_v39  ;;  %4662 = vmatpush.xpose.msrb.mxu3 %v6584_v39 }
 0x591   :  { %v6855_v48 = vpop.f32.mrf.mxu0 }
 0x592   :  { %4427 = vmatmul.f32.vlgmr.msrb.gmra.mxu2 %v4366_v45 }
 0x593   :  { %4635 = vmatpush.xpose.msrb.mxu2 %v6657_v57  ;;  %v6858_v31 = vpop.f32.mrf.mxu1  ;;  %v2926_v57 = vld [vmem:[%s7109_s8 + $0x3] sm:$0x1] }
 0x595   :  { %v3182_v44 = vpop.f32.mrf.mxu2  ;;  %v6860_v51 = vpop.f32.mrf.mxu3 }
 0x596   :  { %v3232_v7 = vadd.f32 %v3231_v63, %v3182_v44 }
 0x597   :  { %4639 = vmatpush.xpose.msrb.mxu2 %v6598_v13  ;;  %v4507_v13 = vsel %vm259_vm1, %v2926_v57, 0 }
 0x598   :  { %v3266_v1 = vadd.f32 %v3265_v59, %v3232_v7  ;;  %v4527_v42 = vand.u32 4294901760, %v4507_v13 }
 0x599   :  { %v3398_v55 = vpop.f32.mrf.mxu0 }
 0x59a   :  { %v3298_v0 = vadd.f32 %v3297_v47, %v3266_v1  ;;  %v4528_v9 = vsub.f32 %v4507_v13, %v4527_v42  ;;  %4563 = vmatmul.f32.vlgmr.msra.gmra.mxu3 %v4527_v42 }
 0x59b   :  { %v3447_v40 = vpop.f32.mrf.mxu1 }
 0x59c   :  { %v4529_v41 = vand.u32 4294901760, %v4528_v9  ;;  %4589 = vmatmul.f32.vlgmr.msrb.gmra.mxu0 %v4528_v9  ;;  %v3448_v17 = vadd.f32 %v3447_v40, %v3398_v55 }
 0x59d   :  { %v6863_v26 = vpop.f32.mrf.mxu2  ;;  %v3365_v8 = vpop.f32.mrf.mxu3 }
 0x59e   :  { %v4530_v62 = vsub.f32 %v4528_v9, %v4529_v41  ;;  %4614 = vmatmul.f32.vlgmr.msrb.gmra.mxu1 %v4529_v41 }
 0x5a0   :  { %v4531_v61 = vand.u32 4294901760, %v4530_v62 }
 0x5a1   :  { %v3406_v39 = vpop.f32.mrf.mxu0 }
 0x5a2   :  { %4532 = vmatmul.f32.vlgmr.msra.gmra.mxu2 %v4531_v61  ;;  %4664 = vmatmul.f32.vlgmr.msrb.gmra.mxu3 %v4527_v42 }
 0x5a3   :  { %v3451_v6 = vpop.f32.mrf.mxu1 }
 0x5a4   :  { %v3452_v22 = vadd.f32 %v3451_v6, %v3406_v39 }
 0x5a5   :  { %v3336_v32 = vpop.f32.mrf.mxu2  ;;  %v6865_v50 = vpop.f32.mrf.mxu3 }
 0x5a6   :  { %v3337_v56 = vadd.f32 %v3336_v32, %v3298_v0 }
 0x5a8   :  { %v3366_v10 = vadd.f32 %v3365_v8, %v3337_v56 }
 0x5a9   :  { %v3552_v5 = vpop.f32.mrf.mxu0 }
 0x5aa   :  { %4670 = vperm.xlu1 %5774, %v3366_v10   ;;  %4641 = vmatmul.f32.vlgmr.msrb.gmra.mxu2 %v4527_v42 }
 0x5ab   :  { %v3581_v49 = vpop.f32.mrf.mxu1 }
 0x5ad   :  { %v6871_v12 = vpop.f32.mrf.mxu2  ;;  %v3513_v15 = vpop.f32.mrf.mxu3 }
 0x5b1   :  { %v3556_v14 = vpop.f32.mrf.mxu0 }
 0x5b3   :  { %v3585_v30 = vpop.f32.mrf.mxu1 }
 0x5b5   :  { %v3481_v58 = vpop.f32.mrf.mxu2  ;;  %v3519_v19 = vpop.f32.mrf.mxu3 }
 0x5b6   :  { %v3482_v11 = vadd.f32 %v3481_v58, %v3448_v17 }
 0x5b8   :  { %v3514_v20 = vadd.f32 %v3513_v15, %v3482_v11 }
 0x5b9   :  { %v3697_v25 = vpop.f32.mrf.mxu0 }
 0x5ba   :  { %v3553_v16 = vadd.f32 %v3552_v5, %v3514_v20 }
 0x5bb   :  { %v3729_v18 = vpop.f32.mrf.mxu1 }
 0x5bc   :  { %v3582_v2 = vadd.f32 %v3581_v49, %v3553_v16 }
 0x5bd   :  { %v3486_v33 = vpop.f32.mrf.mxu2  ;;  %v3663_v34 = vpop.f32.mrf.mxu3 }
 0x5be   :  { %v3487_v43 = vadd.f32 %v3486_v33, %v3452_v22  ;;  %4680 = vperm.xlu1 %5774, %v3582_v2  }
 0x5c0   :  { %v3520_v35 = vadd.f32 %v3519_v19, %v3487_v43 }
 0x5c1   :  { %v3702_v36 = vpop.f32.mrf.mxu0 }
 0x5c2   :  { %v3557_v37 = vadd.f32 %v3556_v14, %v3520_v35 }
 0x5c3   :  { %v3735_v29 = vpop.f32.mrf.mxu1 }
 0x5c4   :  { %v3586_v24 = vadd.f32 %v3585_v30, %v3557_v37 }
 0x5c5   :  { %v3614_v28 = vpop.f32.mrf.mxu2  ;;  %v3667_v38 = vpop.f32.mrf.mxu3 }
 0x5c6   :  { %4685 = vperm.xlu0 %5773, %v3586_v24   ;;  %v3664_v45 = vadd.f32 %v3663_v34, %v3614_v28 }
 0x5c8   :  { %v3698_v53 = vadd.f32 %v3697_v25, %v3664_v45 }
 0x5c9   :  { %v3830_v46 = vpop.f32.mrf.mxu0 }
 0x5ca   :  { %v3730_v60 = vadd.f32 %v3729_v18, %v3698_v53 }
 0x5cb   :  { %v3879_v3 = vpop.f32.mrf.mxu1 }
 0x5cc   :  { %v3880_v0 = vadd.f32 %v3879_v3, %v3830_v46 }
 0x5cd   :  { %v3622_v52 = vpop.f32.mrf.mxu2  ;;  %v3797_v27 = vpop.f32.mrf.mxu3 }
 0x5ce   :  { %v3668_v54 = vadd.f32 %v3667_v38, %v3622_v52 }
 0x5d0   :  { %v3703_v63 = vadd.f32 %v3702_v36, %v3668_v54 }
 0x5d1   :  { %v3838_v40 = vpop.f32.mrf.mxu0 }
 0x5d2   :  { %v3736_v55 = vadd.f32 %v3735_v29, %v3703_v63 }
 0x5d3   :  { %v3883_v1 = vpop.f32.mrf.mxu1 }
 0x5d4   :  { %v3884_v5 = vadd.f32 %v3883_v1, %v3838_v40 }
 0x5d5   :  { %v3768_v4 = vpop.f32.mrf.mxu2  ;;  %v3801_v47 = vpop.f32.mrf.mxu3 }
 0x5d6   :  { %v3769_v59 = vadd.f32 %v3768_v4, %v3730_v60 }
 0x5d8   :  { %v3798_v44 = vadd.f32 %v3797_v27, %v3769_v59 }
 0x5d9   :  { %v3984_v56 = vpop.f32.mrf.mxu0 }
 0x5da   :  { %4690 = vperm.xlu2 %5775, %v3798_v44  }
 0x5db   :  { %v4013_v42 = vpop.f32.mrf.mxu1 }
 0x5dd   :  { %v3772_v7 = vpop.f32.mrf.mxu2  ;;  %v3945_v6 = vpop.f32.mrf.mxu3 }
 0x5de   :  { %v3773_v8 = vadd.f32 %v3772_v7, %v3736_v55 }
 0x5e0   :  { %v3802_v39 = vadd.f32 %v3801_v47, %v3773_v8 }
 0x5e1   :  { %v3988_v61 = vpop.f32.mrf.mxu0 }
 0x5e2   :  { %4695 = vperm.xlu1 %5774, %v3802_v39  }
 0x5e3   :  { %v4017_v14 = vpop.f32.mrf.mxu1 }
 0x5e5   :  { %v3913_v32 = vpop.f32.mrf.mxu2  ;;  %v3951_v9 = vpop.f32.mrf.mxu3 }
 0x5e6   :  { %v3914_v57 = vadd.f32 %v3913_v32, %v3880_v0 }
 0x5e8   :  { %v3946_v13 = vadd.f32 %v3945_v6, %v3914_v57 }
 0x5e9   :  { %v4156_v2 = vpop.f32.mrf.mxu0 }
 0x5ea   :  { %v3985_v10 = vadd.f32 %v3984_v56, %v3946_v13 }
 0x5eb   :  { %v4179_v34 = vpop.f32.mrf.mxu1 }
 0x5ec   :  { %v4014_v41 = vadd.f32 %v4013_v42, %v3985_v10  ;;  %v6883_v10 = vld [vmem:[%s7105_s1] sm:$0xff] }
 0x5ed   :  { %v3918_v49 = vpop.f32.mrf.mxu2  ;;  %v4078_v58 = vpop.f32.mrf.mxu3 }
 0x5ee   :  { %v3919_v15 = vadd.f32 %v3918_v49, %v3884_v5  ;;  %4700 = vperm.xlu0 %5773, %v4014_v41  }
 0x5f0   :  { %v3952_v62 = vadd.f32 %v3951_v9, %v3919_v15 }
 0x5f1   :  { %v4266_v24 = vpop.f32.mrf.mxu0 }
 0x5f2   :  { %v3989_v17 = vadd.f32 %v3988_v61, %v3952_v62 }
 0x5f3   :  { %v4291_v37 = vpop.f32.mrf.mxu1 }
 0x5f4   :  { %v4018_v19 = vadd.f32 %v4017_v14, %v3989_v17 }
 0x5f5   :  { %v4047_v11 = vpop.f32.mrf.mxu2  ;;  %v4129_v16 = vpop.f32.mrf.mxu3 }
 0x5f6   :  { %4705 = vperm.xlu1 %5774, %v4018_v19   ;;  %v4079_v30 = vadd.f32 %v4078_v58, %v4047_v11  ;;  %v6892_v58 = vld [vmem:[%s7105_s1 + $0x8] sm:$0xff] }
 0x5f9   :  { %v4371_v27 = vpop.f32.mrf.mxu0 }
 0x5fb   :  { %v4402_v29 = vpop.f32.mrf.mxu1 }
 0x5fc   :  { %v4403_v46 = vadd.f32 %v4402_v29, %v4371_v27 }
 0x5fd   :  { %v4104_v20 = vpop.f32.mrf.mxu2  ;;  %v4240_v18 = vpop.f32.mrf.mxu3 }
 0x5fe   :  { %v4105_v22 = vadd.f32 %v4104_v20, %v4079_v30  ;;  %v3236_v30 = vadd.f32 %v6860_v51, %v6863_v26 }
 0x600   :  { %v4130_v33 = vadd.f32 %v4129_v16, %v4105_v22  ;;  %v3271_v20 = vadd.f32 %v6855_v48, %v3236_v30 }
 0x601   :  { %v4480_v63 = vpop.f32.mrf.mxu0 }
 0x602   :  { %v4157_v43 = vadd.f32 %v4156_v2, %v4130_v33  ;;  %v3304_v33 = vadd.f32 %v6858_v31, %v3271_v20 }
 0x603   :  { %v4503_v40 = vpop.f32.mrf.mxu1 }
 0x604   :  { %v6873_v25 = vadd.f32 %v4179_v34, %v4157_v43  ;;  %v3341_v43 = vadd.f32 %v6871_v12, %v3304_v33 }
 0x605   :  { %v4209_v35 = vpop.f32.mrf.mxu2  ;;  %v4341_v38 = vpop.f32.mrf.mxu3 }
 0x606   :  { %v4708_v36 = vperm.slane %v6873_v25, 0  ;;  %v4241_v45 = vadd.f32 %v4240_v18, %v4209_v35 }
 0x608   :  { %v4267_v60 = vadd.f32 %v4266_v24, %v4241_v45 }
 0x60a   :  { %v4292_v59 = vadd.f32 %v4291_v37, %v4267_v60  ;;  %v3370_v37 = vadd.f32 %v6865_v50, %v3341_v43 }
 0x60d   :  { %v4318_v28 = vpop.f32.mrf.mxu2  ;;  %v4453_v4 = vpop.f32.mrf.mxu3 }
 0x60e   :  { %v4319_v44 = vadd.f32 %v4318_v28, %v4292_v59 }
 0x610   :  { %v4342_v7 = vadd.f32 %v4341_v38, %v4319_v44 }
 0x612   :  { %v4709_v1 = vperm.slane %v4342_v7, 0 }
 0x615   :  { %v4428_v54 = vpop.f32.mrf.mxu2 }
 0x616   :  { %v4429_v3 = vadd.f32 %v4428_v54, %v4403_v46 }
 0x618   :  { %v4454_v47 = vadd.f32 %v4453_v4, %v4429_v3 }
 0x619   :  { %v4590_v34 = vpop.f32.mrf.mxu0 }
 0x61a   :  { %v4481_v55 = vadd.f32 %v4480_v63, %v4454_v47 }
 0x61b   :  { %v4615_v18 = vpop.f32.mrf.mxu1 }
 0x61c   :  { %v4671_v52 = vpop.permute.xlu1 %4670  ;;  %v4504_v8 = vadd.f32 %v4503_v40, %v4481_v55 }
 0x61d   :  { %v6878_v53 = vadd.f32 %v4708_v36, %v4671_v52  ;;  %v4564_v16 = vpop.f32.mrf.mxu3 }
 0x61e   :  { %v4710_v6 = vperm.slane %v4504_v8, 0 }
 0x625   :  { %v4533_v22 = vpop.f32.mrf.mxu2  ;;  %v4665_v29 = vpop.f32.mrf.mxu3 }
 0x626   :  { %v4565_v2 = vadd.f32 %v4564_v16, %v4533_v22 }
 0x628   :  { %v4591_v35 = vadd.f32 %v4590_v34, %v4565_v2 }
 0x62a   :  { %v4616_v24 = vadd.f32 %v4615_v18, %v4591_v35 }
 0x62d   :  { %v4642_v28 = vpop.f32.mrf.mxu2 }
 0x62e   :  { %v4643_v26 = vadd.f32 %v4642_v28, %v4616_v24 }
 0x630   :  { %v4681_v39 = vpop.permute.xlu1 %4680  ;;  %v4666_v52 = vadd.f32 %v4665_v29, %v4643_v26 }
 0x631   :  { %v4714_v0 = vadd.f32 %v4709_v1, %v4681_v39 }
 0x632   :  { %v4711_v31 = vperm.slane %v4666_v52, 0 }
 0x633   :  { %v4722_v32 = vmul.f32 0.2, %v4714_v0 }
 0x634   :  { %v4691_v57 = vpop.permute.xlu2 %4690 }
 0x635   :  { %v4730_v56 = vmax.f32 %v4714_v0, %v4722_v32  ;;  %v4716_v13 = vadd.f32 %v4710_v6, %v4691_v57  ;;  %v4720_v32 = vmul.f32 0.2, %v6878_v53 }
 0x637   :  { %v4724_v42 = vmul.f32 0.2, %v4716_v13  ;;  %v4738_v9 = vadd.f32 %v6883_v10, %v4730_v56 }
 0x638   :  { %v4686_v5 = vpop.permute.xlu0 %4685 }
 0x639   :  { %v4732_v41 = vmax.f32 %v4716_v13, %v4724_v42  ;;  %v4715_v49 = vadd.f32 %v4709_v1, %v4686_v5  ;;  %v4750_v15 = vsel %vm62_vm0, %v4738_v9, -inf }
 0x63a   :  { %4751 = vmax.xlane.f32.xlu2 %v4750_v15 }
 0x63b   :  { %v4723_v62 = vmul.f32 0.2, %v4715_v49  ;;  %v4740_v61 = vadd.f32 %v6883_v10, %v4732_v41  ;;  %v4728_v41 = vmax.f32 %v6878_v53, %v4720_v32 }
 0x63d   :  { %v4731_v17 = vmax.f32 %v4715_v49, %v4723_v62  ;;  %v4756_v14 = vsel %vm62_vm0, %v4740_v61, -inf }
 0x63e   :  { %4757 = vmax.xlane.f32.xlu1 %v4756_v14 }
 0x63f   :  { %v4739_v19 = vadd.f32 %v6892_v58, %v4731_v17  ;;  %v4736_v17 = vadd.f32 %v6883_v10, %v4728_v41 }
 0x641   :  { %v4753_v11 = vsel %vm62_vm0, %v4739_v19, -inf  ;;  %v4744_v25 = vsel %vm62_vm0, %v4736_v17, -inf }
 0x642   :  { %4754 = vmax.xlane.f32.xlu0 %v4753_v11 }
 0x652   :  { %4675 = vperm.xlu2 %5775, %v3370_v37  }
 0x654   :  { %v4696_v38 = vpop.permute.xlu1 %4695 }
 0x655   :  { %v4717_v51 = vadd.f32 %v4710_v6, %v4696_v38 }
 0x657   :  { %v4725_v48 = vmul.f32 0.2, %v4717_v51 }
 0x659   :  { %v4733_v45 = vmax.f32 %v4717_v51, %v4725_v48 }
 0x65b   :  { %v6903_v27 = vadd.f32 %v6892_v58, %v4733_v45 }
 0x65d   :  { %v4759_v12 = vsel %vm62_vm0, %v6903_v27, -inf }
 0x65e   :  { %4760 = vmax.xlane.f32.xlu0 %v4759_v12 }
 0x660   :  { %v4701_v46 = vpop.permute.xlu0 %4700 }
 0x661   :  { %v4718_v50 = vadd.f32 %v4711_v31, %v4701_v46 }
 0x663   :  { %v4726_v54 = vmul.f32 0.2, %v4718_v50 }
 0x665   :  { %v4734_v60 = vmax.f32 %v4718_v50, %v4726_v54 }
 0x667   :  { %v4742_v3 = vadd.f32 %v6883_v10, %v4734_v60 }
 0x668   :  { %v4706_v4 = vpop.permute.xlu1 %4705 }
 0x669   :  { %v4719_v59 = vadd.f32 %v4711_v31, %v4706_v4  ;;  %v4762_v47 = vsel %vm62_vm0, %v4742_v3, -inf }
 0x66a   :  { %4763 = vmax.xlane.f32.xlu0 %v4762_v47 }
 0x66b   :  { %v4727_v63 = vmul.f32 0.2, %v4719_v59 }
 0x66d   :  { %v4735_v44 = vmax.f32 %v4719_v59, %v4727_v63 }
 0x66f   :  { %v4743_v55 = vadd.f32 %v6892_v58, %v4735_v44 }
 0x671   :  { %v4765_v40 = vsel %vm62_vm0, %v4743_v55, -inf }
 0x672   :  { %4766 = vmax.xlane.f32.xlu0 %v4765_v40 }
 0x686   :  { %4938 = vrot.lane.b32.xlu0 %v6603_v23, %s5849_s19 }
 0x68e   :  { %5140 = vrot.lane.b32.xlu0 %v6603_v23, %s5850_s20 }
 0x6ad   :  { %v4752_v7 = vpop.xlane.xlu2 %4751 }
 0x6ae   :  { %v4770_v8 = vsub.f32 %v4738_v9, %v4752_v7 }
 0x6b0   :  { %v4780_v1 = vmul.f32 1.442695, %v4770_v8 }
 0x6b1   :  { %v4758_v39 = vpop.xlane.xlu1 %4757 }
 0x6b2   :  { %5814 = vpow2.f32 %v4780_v1  ;;  %v4772_v6 = vsub.f32 %v4740_v61, %v4758_v39 }
 0x6b4   :  { %v4784_v0 = vmul.f32 1.442695, %v4772_v6 }
 0x6b5   :  { %v4755_v57 = vpop.xlane.xlu0 %4754  ;;  %v4676_v13 = vpop.permute.xlu2 %4675 }
 0x6b6   :  { %5816 = vpow2.f32 %v4784_v0  ;;  %v4771_v56 = vsub.f32 %v4739_v19, %v4755_v57  ;;  %v4713_v49 = vadd.f32 %v4708_v36, %v4676_v13 }
 0x6b8   :  { %v6916_v42 = vpop.eup %5814  ;;  %v4782_v5 = vmul.f32 1.442695, %v4771_v56  ;;  %v4721_v62 = vmul.f32 0.2, %v4713_v49 }
 0x6b9   :  { %v4798_v9 = vsel %vm62_vm0, %v6916_v42, 0.0 }
 0x6ba   :  { %5818 = vpow2.f32 %v4782_v5  ;;  %4799 = vadd.xlane.f32.xlu1 %v4798_v9  ;;  %v4729_v53 = vmax.f32 %v4713_v49, %v4721_v62 }
 0x6bc   :  { %v6923_v15 = vpop.eup %5816  ;;  %v6934_v19 = vadd.f32 %v6892_v58, %v4729_v53 }
 0x6bd   :  { %v4804_v61 = vsel %vm62_vm0, %v6923_v15, 0.0 }
 0x6be   :  { %4805 = vadd.xlane.f32.xlu0 %v4804_v61  ;;  %v4747_v11 = vsel %vm62_vm0, %v6934_v19, -inf }
 0x6c0   :  { %v6928_v14 = vpop.eup %5818 }
 0x6c1   :  { %v4801_v36 = vsel %vm62_vm0, %v6928_v14, 0.0 }
 0x6c2   :  { %4745 = vmax.xlane.f32.xlu1 %v4744_v25  ;;  %4802 = vadd.xlane.f32.xlu2 %v4801_v36 }
 0x6ca   :  { %4748 = vmax.xlane.f32.xlu1 %v4747_v11 }
 0x6d1   :  { %v4761_v10 = vpop.xlane.xlu0 %4760 }
 0x6d2   :  { %5138 = vrot.lane.b32.xlu0 %v6580_v21, %s5850_s20  ;;  %v4773_v37 = vsub.f32 %v6903_v27, %v4761_v10 }
 0x6d4   :  { %v4786_v51 = vmul.f32 1.442695, %v4773_v37 }
 0x6dd   :  { %v4764_v30 = vpop.xlane.xlu0 %4763 }
 0x6de   :  { %v4774_v20 = vsub.f32 %v4742_v3, %v4764_v30 }
 0x6e0   :  { %v4788_v16 = vmul.f32 1.442695, %v4774_v20 }
 0x6e2   :  { %5820 = vpow2.f32 %v4788_v16 }
 0x6e3   :  { %4936 = vrot.lane.b32.xlu1 %v6580_v21, %s5849_s19 }
 0x6e5   :  { %v4767_v22 = vpop.xlane.xlu0 %4766 }
 0x6e6   :  { %v4775_v33 = vsub.f32 %v4743_v55, %v4767_v22 }
 0x6e8   :  { %v6942_v2 = vpop.eup %5820  ;;  %v4790_v34 = vmul.f32 1.442695, %v4775_v33 }
 0x6e9   :  { %v4810_v58 = vsel %vm62_vm0, %v6942_v2, 0.0 }
 0x6ea   :  { %4811 = vadd.xlane.f32.xlu2 %v4810_v58  ;;  %5822 = vpow2.f32 %v4790_v34 }
 0x6eb   :  { %5824 = vpow2.f32 %v4786_v51 }
 0x6f0   :  { %v6946_v43 = vpop.eup %5822 }
 0x6f1   :  { %v4813_v28 = vsel %vm62_vm0, %v6946_v43, 0.0  ;;  %v6963_v48 = vpop.eup %5824 }
 0x6f2   :  { %v4807_v45 = vsel %vm62_vm0, %v6963_v48, 0.0 }
 0x6f8   :  { %v4939_v35 = vpop.permute.xlu0 %4938 }
 0x6f9   :  { %v6948_v18 = vand.u32 4294901760, %v4939_v35 }
 0x6fb   :  { %v6952_v24 = vsub.f32 %v4939_v35, %v6948_v18  ;;  %4963 = vmatpush.msra.mxu0 %v6948_v18  ;;  %5064 = vmatpush.msra.mxu3 %v6948_v18 }
 0x6fc   :  { %4814 = vadd.xlane.f32.xlu0 %v4813_v28 }
 0x6fd   :  { %v4999_v38 = vand.u32 4294901760, %v6952_v24  ;;  %5034 = vmatpush.msra.mxu2 %v6952_v24 }
 0x6ff   :  { %v5000_v26 = vsub.f32 %v6952_v24, %v4999_v38 }
 0x700   :  { %v6969_v52 = vpop.permute.xlu0 %5140 }
 0x701   :  { %v5001_v29 = vand.u32 4294901760, %v5000_v26  ;;  %v6991_v20 = vand.u32 4294901760, %v6969_v52 }
 0x703   :  { %5002 = vmatpush.msra.mxu1 %v5001_v29  ;;  %v5200_v37 = vsub.f32 %v6969_v52, %v6991_v20 }
 0x70d   :  { %4808 = vadd.xlane.f32.xlu1 %v4807_v45 }
 0x726   :  { %5342 = vrot.lane.b32.xlu1 %v6603_v23, %s5851_s0 }
 0x72d   :  { %v4800_v27 = vpop.xlane.xlu1 %4799 }
 0x72e   :  { %5826 = vrcp.f32 %v4800_v27  ;;  %5340 = vrot.lane.b32.xlu1 %v6580_v21, %s5851_s0  ;;  %v4857_v4 = vand.u32 2147483648, %v4800_v27  ;;  %v4855_v63 = vand.u32 2147483647, %v4800_v27  ;;  %vm4851_vm10 = vweird.f32 %v4800_v27 }
 0x730   :  { %v4858_v7 = vor.u32 1.1754944e-38, %v4857_v4  ;;  %vm4856_vm12 = vcmp.eq.f32.partialorder %v4855_v63, 8.507059e+37 }
 0x731   :  { %v6973_v31 = vpop.xlane.xlu0 %4805 }
 0x732   :  { %5828 = vrcp.f32 %v6973_v31  ;;  %v4887_v35 = vand.u32 2147483648, %v6973_v31  ;;  %vm4881_vm4 = vweird.f32 %v6973_v31  ;;  %v4885_v28 = vand.u32 2147483647, %v6973_v31 }
 0x734   :  { %v5827_v12 = vpop.eup %5826  ;;  %v4888_v29 = vor.u32 1.1754944e-38, %v4887_v35  ;;  %vm4886_vm7 = vcmp.eq.f32.partialorder %v4885_v28, 8.507059e+37 }
 0x735   :  { %v4847_v46 = vmul.f32 %v5827_v12, %v4800_v27  ;;  %v4746_v50 = vpop.xlane.xlu1 %4745  ;;  %v4803_v54 = vpop.xlane.xlu2 %4802  ;;  %vm4852_vm1 = vweird.f32 %v5827_v12  ;;  %v5201_v27 = vand.u32 4294901760, %v5200_v37 }
 0x736   :  { %v4768_v60 = vsub.f32 %v4736_v17, %v4746_v50  ;;  %5830 = vrcp.f32 %v4803_v54  ;;  %5746 = vrot.lane.b32.xlu1 %v6603_v23, %s5852_s2  ;;  %vm4853_vm11 = vmor %vm4851_vm10, %vm4852_vm1  ;;  %v4872_v5 = vand.u32 2147483648, %v4803_v54  ;;  %v4870_v9 = vand.u32 2147483647, %v4803_v54 }
 0x737   :  { %v4848_v3 = vsub.f32 1.0, %v4847_v46  ;;  %vm4866_vm14 = vweird.f32 %v4803_v54  ;;  %v5202_v52 = vsub.f32 %v5200_v37, %v5201_v27 }
 0x738   :  { %v4776_v59 = vmul.f32 1.442695, %v4768_v60  ;;  %v5829_v44 = vpop.eup %5828  ;;  %v4873_v25 = vor.u32 1.1754944e-38, %v4872_v5  ;;  %vm4871_vm2 = vcmp.eq.f32.partialorder %v4870_v9, 8.507059e+37 }
 0x739   :  { %v4849_v47 = vmul.f32 %v5827_v12, %v4848_v3  ;;  %v4877_v0 = vmul.f32 %v5829_v44, %v6973_v31  ;;  %vm4882_vm3 = vweird.f32 %v5829_v44  ;;  %v5203_v63 = vand.u32 4294901760, %v5202_v52 }
 0x73a   :  { %5832 = vpow2.f32 %v4776_v59  ;;  %vm4883_vm5 = vmor %vm4881_vm4, %vm4882_vm3 }
 0x73b   :  { %v4850_v55 = vadd.f32 %v5827_v12, %v4849_v47  ;;  %v4878_v61 = vsub.f32 1.0, %v4877_v0 }
 0x73c   :  { %v5831_v40 = vpop.eup %5830 }
 0x73d   :  { %v4854_v8 = vsel %vm4853_vm11, %v5827_v12, %v4850_v55  ;;  %v4862_v1 = vmul.f32 %v5831_v40, %v4803_v54  ;;  %v4749_v39 = vpop.xlane.xlu1 %4748  ;;  %vm4867_vm13 = vweird.f32 %v5831_v40 }
 0x73e   :  { %v4859_v6 = vsel %vm4856_vm12, %v4858_v7, %v4854_v8  ;;  %v4769_v32 = vsub.f32 %v6934_v19, %v4749_v39  ;;  %vm4868_vm15 = vmor %vm4866_vm14, %vm4867_vm13 }
 0x73f   :  { %v4863_v57 = vsub.f32 1.0, %v4862_v1  ;;  %v4860_v13 = vmul.f32 %v6916_v42, %v4859_v6  ;;  %v4879_v42 = vmul.f32 %v5829_v44, %v4878_v61 }
 0x740   :  { %v6980_v56 = vpop.eup %5832  ;;  %v4778_v41 = vmul.f32 1.442695, %v4769_v32 }
 0x741   :  { %v4864_v49 = vmul.f32 %v5831_v40, %v4863_v57  ;;  %v4792_v62 = vsel %vm62_vm0, %v6980_v56, 0.0  ;;  %v4943_v53 = vsel %vm62_vm0, %v4860_v13, 0  ;;  %v4880_v58 = vadd.f32 %v5829_v44, %v4879_v42 }
 0x742   :  { %5834 = vpow2.f32 %v4778_v41  ;;  %4793 = vadd.xlane.f32.xlu2 %v4792_v62  ;;  %v6986_v11 = vand.u32 4294901760, %v4943_v53 }
 0x743   :  { %v4865_v17 = vadd.f32 %v5831_v40, %v4864_v49 }
 0x744   :  { %v5139_v10 = vpop.permute.xlu0 %5138  ;;  %v4967_v34 = vsub.f32 %v4943_v53, %v6986_v11 }
 0x745   :  { %v4869_v36 = vsel %vm4868_vm15, %v5831_v40, %v4865_v17  ;;  %v6996_v33 = vand.u32 4294901760, %v5139_v10 }
 0x746   :  { %v4874_v19 = vsel %vm4871_vm2, %v4873_v25, %v4869_v36  ;;  %v4968_v45 = vand.u32 4294901760, %v4967_v34 }
 0x747   :  { %v4875_v22 = vmul.f32 %v6928_v14, %v4874_v19  ;;  %v4884_v14 = vsel %vm4883_vm5, %v5829_v44, %v4880_v58  ;;  %v5206_v26 = vsub.f32 %v5139_v10, %v6996_v33 }
 0x748   :  { %v6988_v30 = vpop.eup %5834  ;;  %v4889_v46 = vsel %vm4886_vm7, %v4888_v29, %v4884_v14  ;;  %v4969_v54 = vsub.f32 %v4967_v34, %v4968_v45 }
 0x749   :  { %v4795_v16 = vsel %vm62_vm0, %v6988_v30, 0.0  ;;  %v4946_v51 = vsel %vm62_vm0, %v4875_v22, 0  ;;  %v5207_v50 = vand.u32 4294901760, %v5206_v26  ;;  %v4890_v60 = vmul.f32 %v6923_v15, %v4889_v46 }
 0x74a   :  { %4796 = vadd.xlane.f32.xlu2 %v4795_v16  ;;  %v7006_v12 = vand.u32 4294901760, %v4946_v51  ;;  %v4970_v47 = vand.u32 4294901760, %v4969_v54 }
 0x74b   :  { %v5208_v59 = vsub.f32 %v5206_v26, %v5207_v50  ;;  %v5145_v40 = vsel %vm62_vm0, %v4890_v60, 0 }
 0x74c   :  { %v4975_v31 = vsub.f32 %v4946_v51, %v7006_v12  ;;  %v7013_v8 = vand.u32 4294901760, %v5145_v40 }
 0x74d   :  { %v5209_v15 = vand.u32 4294901760, %v5208_v59  ;;  %v7043_v59 = vand.u32 4294901760, %v6580_v21 }
 0x74e   :  { %v4976_v55 = vand.u32 4294901760, %v4975_v31 }
 0x750   :  { %v4977_v39 = vsub.f32 %v4975_v31, %v4976_v55 }
 0x752   :  { %v4978_v6 = vand.u32 4294901760, %v4977_v39 }
 0x755   :  { %v4937_v3 = vpop.permute.xlu1 %4936 }
 0x756   :  { %v4964_v4 = vand.u32 4294901760, %v4937_v3 }
 0x758   :  { %v5004_v44 = vsub.f32 %v4937_v3, %v4964_v4  ;;  %4965 = vmatpush.msra.mxu0 %v4964_v4  ;;  %5066 = vmatpush.msra.mxu3 %v4964_v4 }
 0x759   :  { %4971 = vmatmul.f32.vlgmr.msra.gmra.mxu0 %v4970_v47  ;;  %5070 = vmatmul.f32.vlgmr.msra.gmra.mxu3 %v4968_v45 }
 0x75a   :  { %5097 = vmatpush.msrb.mxu0 %v4999_v38  ;;  %5204 = vmatpush.msrb.mxu3 %v5203_v63  ;;  %v5005_v7 = vand.u32 4294901760, %v5004_v44  ;;  %v5169_v38 = vsub.f32 %v5145_v40, %v7013_v8 }
 0x75b   :  { %5037 = vmatpush.msra.mxu2 %v5004_v44 }
 0x75c   :  { %5040 = vmatmul.f32.vlgmr.msra.gmra.mxu2 %v4967_v34  ;;  %5210 = vmatpush.msrb.mxu3 %v5209_v15  ;;  %v5006_v1 = vsub.f32 %v5004_v44, %v5005_v7  ;;  %v5170_v0 = vand.u32 4294901760, %v5169_v38  ;;  %v7055_v15 = vsub.f32 %v6580_v21, %v7043_v59 }
 0x75d   :  { %5165 = vmatpush.msrb.mxu2 %v6991_v20  ;;  %5101 = vmatpush.msrb.mxu0 %v5005_v7  ;;  %v4812_v57 = vpop.xlane.xlu2 %4811 }
 0x75e   :  { %5328 = vmatpush.msra.mxu3 %v6991_v20  ;;  %v5007_v24 = vand.u32 4294901760, %v5006_v1  ;;  %v5171_v32 = vsub.f32 %v5169_v38, %v5170_v0  ;;  %5836 = vrcp.f32 %v4812_v57  ;;  %v4917_v36 = vand.u32 2147483648, %v4812_v57 }
 0x75f   :  { %5236 = vmatpush.msra.mxu0 %v5200_v37  ;;  %5167 = vmatpush.msrb.mxu2 %v6996_v33  ;;  %vm4911_vm9 = vweird.f32 %v4812_v57  ;;  %v4915_v42 = vand.u32 2147483647, %v4812_v57 }
 0x760   :  { %5330 = vmatpush.msra.mxu3 %v6996_v33  ;;  %5008 = vmatpush.msra.mxu1 %v5007_v24  ;;  %v5172_v13 = vand.u32 4294901760, %v5171_v32  ;;  %v4918_v10 = vor.u32 1.1754944e-38, %v4917_v36 }
 0x761   :  { %5299 = vmatpush.msra.mxu2 %v5201_v27  ;;  %5239 = vmatpush.msra.mxu0 %v5206_v26  ;;  %vm4916_vm10 = vcmp.eq.f32.partialorder %v4915_v42, 8.507059e+37 }
 0x762   :  { %4979 = vmatmul.f32.gmra.mxu0 %v4978_v6  ;;  %5010 = vmatmul.f32.vlgmr.msra.gmra.mxu1 %v6986_v11 }
 0x763   :  { %5303 = vmatpush.msra.mxu2 %v5207_v50  ;;  %5076 = vmatmul.f32.gmra.mxu3 %v4976_v55 }
 0x764   :  { %5126 = vmatpush.msrb.mxu1 %v6948_v18  ;;  %5744 = vrot.lane.b32.xlu2 %v6580_v21, %s5852_s2  ;;  %v5837_v5 = vpop.eup %5836 }
 0x765   :  { %5045 = vmatmul.f32.gmra.mxu2 %v4975_v31  ;;  %v4907_v41 = vmul.f32 %v5837_v5, %v4812_v57  ;;  %vm4912_vm8 = vweird.f32 %v5837_v5  ;;  %v7039_v31 = vand.u32 4294901760, %v6603_v23 }
 0x766   :  { %5128 = vmatpush.msrb.mxu1 %v4964_v4  ;;  %vm4913_vm1 = vmor %vm4911_vm9, %vm4912_vm8 }
 0x767   :  { %v4908_v49 = vsub.f32 1.0, %v4907_v41  ;;  %v7050_v44 = vsub.f32 %v6603_v23, %v7039_v31 }
 0x768   :  { %5266 = vmatpush.msra.mxu1 %v6991_v20 }
 0x769   :  { %v4909_v62 = vmul.f32 %v5837_v5, %v4908_v49  ;;  %v5599_v23 = vand.u32 4294901760, %v7050_v44 }
 0x76a   :  { %5268 = vmatpush.msra.mxu1 %v6996_v33  ;;  %5103 = vmatmul.f32.vlgmr.msrb.gmra.mxu0 %v6986_v11 }
 0x76b   :  { %5014 = vmatmul.f32.gmra.mxu1 %v7006_v12  ;;  %5212 = vmatmul.f32.vlgmr.msrb.gmra.mxu3 %v7013_v8  ;;  %v4910_v53 = vadd.f32 %v5837_v5, %v4909_v62 }
 0x76d   :  { %5173 = vmatmul.f32.vlgmr.msrb.gmra.mxu2 %v5172_v13  ;;  %v4914_v19 = vsel %vm4913_vm1, %v5837_v5, %v4910_v53  ;;  %v5600_v13 = vsub.f32 %v7050_v44, %v5599_v23 }
 0x76e   :  { %v4919_v16 = vsel %vm4916_vm10, %v4918_v10, %v4914_v19 }
 0x76f   :  { %v4815_v18 = vpop.xlane.xlu0 %4814  ;;  %v4920_v35 = vmul.f32 %v6942_v2, %v4919_v16 }
 0x770   :  { %5838 = vrcp.f32 %v4815_v18  ;;  %v4932_v33 = vand.u32 2147483648, %v4815_v18  ;;  %vm4926_vm12 = vweird.f32 %v4815_v18  ;;  %v4930_v37 = vand.u32 2147483647, %v4815_v18 }
 0x771   :  { %v5347_v27 = vsel %vm62_vm0, %v4920_v35, 0 }
 0x772   :  { %5107 = vmatmul.f32.gmra.mxu0 %v7006_v12  ;;  %v4933_v29 = vor.u32 1.1754944e-38, %v4932_v33  ;;  %vm4931_vm2 = vcmp.eq.f32.partialorder %v4930_v37, 8.507059e+37  ;;  %v7034_v54 = vand.u32 4294901760, %v5347_v27 }
 0x773   :  { %5130 = vmatmul.f32.vlgmr.msrb.gmra.mxu1 %v6986_v11 }
 0x774   :  { %v7046_v47 = vsub.f32 %v5347_v27, %v7034_v54 }
 0x776   :  { %v5839_v9 = vpop.eup %5838  ;;  %v5372_v7 = vand.u32 4294901760, %v7046_v47 }
 0x777   :  { %v4922_v61 = vmul.f32 %v5839_v9, %v4815_v18  ;;  %vm4927_vm11 = vweird.f32 %v5839_v9 }
 0x778   :  { %vm4928_vm13 = vmor %vm4926_vm12, %vm4927_vm11  ;;  %v5373_v32 = vsub.f32 %v7046_v47, %v5372_v7 }
 0x779   :  { %v4923_v25 = vsub.f32 1.0, %v4922_v61 }
 0x77a   :  { %5242 = vmatmul.f32.vlgmr.msra.gmra.mxu0 %v5169_v38 }
 0x77b   :  { %5134 = vmatmul.f32.gmra.mxu1 %v7006_v12  ;;  %v4924_v11 = vmul.f32 %v5839_v9, %v4923_v25 }
 0x77d   :  { %v4925_v58 = vadd.f32 %v5839_v9, %v4924_v11 }
 0x77f   :  { %v4929_v26 = vsel %vm4928_vm13, %v5839_v9, %v4925_v58  ;;  %v5374_v9 = vand.u32 4294901760, %v5373_v32 }
 0x780   :  { %v4809_v17 = vpop.xlane.xlu1 %4808  ;;  %v4934_v46 = vsel %vm4931_vm2, %v4933_v29, %v4929_v26 }
 0x781   :  { %5840 = vrcp.f32 %v4809_v17  ;;  %v4902_v28 = vand.u32 2147483648, %v4809_v17  ;;  %v4900_v14 = vand.u32 2147483647, %v4809_v17  ;;  %vm4896_vm15 = vweird.f32 %v4809_v17 }
 0x782   :  { %v4935_v60 = vmul.f32 %v6946_v43, %v4934_v46 }
 0x783   :  { %5272 = vmatmul.f32.vlgmr.msra.gmra.mxu1 %v5170_v0  ;;  %v4903_v12 = vor.u32 1.1754944e-38, %v4902_v28  ;;  %vm4901_vm4 = vcmp.eq.f32.partialorder %v4900_v14, 8.507059e+37  ;;  %v5605_v0 = vand.u32 4294901760, %v7055_v15 }
 0x784   :  { %v5350_v43 = vsel %vm62_vm0, %v4935_v60, 0 }
 0x785   :  { %v7058_v1 = vand.u32 4294901760, %v5350_v43  ;;  %v5606_v49 = vsub.f32 %v7055_v15, %v5605_v0 }
 0x787   :  { %v5841_v20 = vpop.eup %5840  ;;  %v5379_v21 = vsub.f32 %v5350_v43, %v7058_v1  ;;  %v5607_v53 = vand.u32 4294901760, %v5606_v49 }
 0x788   :  { %v4892_v22 = vmul.f32 %v5841_v20, %v4809_v17  ;;  %vm4897_vm14 = vweird.f32 %v5841_v20  ;;  %v5601_v17 = vand.u32 4294901760, %v5600_v13 }
 0x789   :  { %vm4898_vm3 = vmor %vm4896_vm15, %vm4897_vm14  ;;  %v5380_v62 = vand.u32 4294901760, %v5379_v21 }
 0x78a   :  { %v4893_v34 = vsub.f32 1.0, %v4892_v22 }
 0x78b   :  { %v5381_v36 = vsub.f32 %v5379_v21, %v5380_v62 }
 0x78c   :  { %v4894_v51 = vmul.f32 %v5841_v20, %v4893_v34 }
 0x78d   :  { %v5382_v11 = vand.u32 4294901760, %v5381_v36 }
 0x78e   :  { %v4895_v45 = vadd.f32 %v5841_v20, %v4894_v51 }
 0x790   :  { %v4899_v50 = vsel %vm4898_vm3, %v5841_v20, %v4895_v45 }
 0x791   :  { %v4904_v2 = vsel %vm4901_vm4, %v4903_v12, %v4899_v50 }
 0x792   :  { %v4905_v52 = vmul.f32 %v6963_v48, %v4904_v2 }
 0x794   :  { %v5148_v3 = vsel %vm62_vm0, %v4905_v52, 0 }
 0x795   :  { %v5176_v4 = vand.u32 4294901760, %v5148_v3 }
 0x797   :  { %5216 = vmatmul.f32.gmra.mxu3 %v5176_v4  ;;  %v5177_v63 = vsub.f32 %v5148_v3, %v5176_v4 }
 0x798   :  { %v5343_v48 = vpop.permute.xlu1 %5342 }
 0x799   :  { %v5366_v55 = vand.u32 4294901760, %v5343_v48  ;;  %5247 = vmatmul.f32.gmra.mxu0 %v5177_v63  ;;  %v5178_v40 = vand.u32 4294901760, %v5177_v63 }
 0x79b   :  { %v5402_v39 = vsub.f32 %v5343_v48, %v5366_v55  ;;  %5278 = vmatmul.f32.gmra.mxu1 %v5178_v40  ;;  %5367 = vmatpush.msrb.mxu0 %v5366_v55  ;;  %v5179_v24 = vsub.f32 %v5177_v63, %v5178_v40 }
 0x79c   :  { %5468 = vmatpush.msrb.mxu3 %v5366_v55 }
 0x79d   :  { %v5403_v38 = vand.u32 4294901760, %v5402_v39  ;;  %5438 = vmatpush.msrb.mxu2 %v5402_v39  ;;  %v5180_v6 = vand.u32 4294901760, %v5179_v24 }
 0x79f   :  { %v5404_v57 = vsub.f32 %v5402_v39, %v5403_v38  ;;  %5181 = vmatmul.f32.gmra.mxu2 %v5180_v6  ;;  %5332 = vmatmul.f32.vlgmr.msra.gmra.mxu3 %v7013_v8 }
 0x7a0   :  { %v5341_v18 = vpop.permute.xlu1 %5340 }
 0x7a1   :  { %v5405_v5 = vand.u32 4294901760, %v5404_v57  ;;  %v5368_v41 = vand.u32 4294901760, %v5341_v18 }
 0x7a3   :  { %v5408_v61 = vsub.f32 %v5341_v18, %v5368_v41  ;;  %5369 = vmatpush.msrb.mxu0 %v5368_v41  ;;  %5406 = vmatpush.msrb.mxu1 %v5405_v5 }
 0x7a4   :  { %5470 = vmatpush.msrb.mxu3 %v5368_v41  ;;  %5375 = vmatmul.f32.vlgmr.msrb.gmra.mxu0 %v5374_v9 }
 0x7a5   :  { %5501 = vmatpush.msra.mxu0 %v5403_v38  ;;  %v5409_v25 = vand.u32 4294901760, %v5408_v61  ;;  %5441 = vmatpush.msrb.mxu2 %v5408_v61 }
 0x7a6   :  { %5602 = vmatpush.msra.mxu3 %v5601_v17 }
 0x7a7   :  { %5305 = vmatmul.f32.vlgmr.msra.gmra.mxu2 %v7013_v8  ;;  %v5410_v42 = vsub.f32 %v5408_v61, %v5409_v25  ;;  %5336 = vmatmul.f32.gmra.mxu3 %v5176_v4 }
 0x7a8   :  { %5608 = vmatpush.msra.mxu3 %v5607_v53  ;;  %5505 = vmatpush.msra.mxu0 %v5409_v25 }
 0x7a9   :  { %5563 = vmatpush.msra.mxu2 %v7039_v31  ;;  %v5411_v19 = vand.u32 4294901760, %v5410_v42 }
 0x7aa   :  { %5634 = vmatpush.msrb.mxu0 %v7050_v44 }
 0x7ab   :  { %5565 = vmatpush.msra.mxu2 %v7043_v59  ;;  %5412 = vmatpush.msrb.mxu1 %v5411_v19 }
 0x7ac   :  { %5637 = vmatpush.msrb.mxu0 %v7055_v15  ;;  %5414 = vmatmul.f32.vlgmr.msrb.gmra.mxu1 %v7034_v54 }
 0x7ad   :  { %5383 = vmatmul.f32.gmra.mxu0 %v5382_v11  ;;  %5530 = vmatpush.msra.mxu1 %v5366_v55 }
 0x7af   :  { %5309 = vmatmul.f32.gmra.mxu2 %v5176_v4  ;;  %5532 = vmatpush.msra.mxu1 %v5368_v41 }
 0x7b0   :  { %5474 = vmatmul.f32.vlgmr.msrb.gmra.mxu3 %v5372_v7 }
 0x7b1   :  { %5664 = vmatpush.msrb.mxu1 %v7039_v31  ;;  %5726 = vmatpush.msrb.mxu3 %v7039_v31 }
 0x7b3   :  { %5666 = vmatpush.msrb.mxu1 %v7043_v59  ;;  %5728 = vmatpush.msrb.mxu3 %v7043_v59 }
 0x7b4   :  { %5418 = vmatmul.f32.gmra.mxu1 %v7058_v1 }
 0x7b5   :  { %5507 = vmatmul.f32.vlgmr.msra.gmra.mxu0 %v7034_v54  ;;  %v4794_v8 = vpop.xlane.xlu2 %4793 }
 0x7b6   :  { %5842 = vrcp.f32 %v4794_v8  ;;  %v4827_v58 = vand.u32 2147483648, %v4794_v8  ;;  %v4825_v34 = vand.u32 2147483647, %v4794_v8  ;;  %vm4821_vm7 = vweird.f32 %v4794_v8 }
 0x7b7   :  { %5444 = vmatmul.f32.vlgmr.msrb.gmra.mxu2 %v7046_v47 }
 0x7b8   :  { %5480 = vmatmul.f32.gmra.mxu3 %v5380_v62  ;;  %5697 = vmatpush.msrb.mxu2 %v5599_v23  ;;  %v4828_v28 = vor.u32 1.1754944e-38, %v4827_v58  ;;  %vm4826_vm9 = vcmp.eq.f32.partialorder %v4825_v34, 8.507059e+37 }
 0x7ba   :  { %5701 = vmatpush.msrb.mxu2 %v5605_v0 }
 0x7bc   :  { %v5843_v10 = vpop.eup %5842  ;;  %5534 = vmatmul.f32.vlgmr.msra.gmra.mxu1 %v7034_v54 }
 0x7bd   :  { %5511 = vmatmul.f32.gmra.mxu0 %v7058_v1  ;;  %v4817_v20 = vmul.f32 %v5843_v10, %v4794_v8  ;;  %v4797_v16 = vpop.xlane.xlu2 %4796  ;;  %vm4822_vm5 = vweird.f32 %v5843_v10 }
 0x7be   :  { %5844 = vrcp.f32 %v4797_v16  ;;  %vm4823_vm8 = vmor %vm4821_vm7, %vm4822_vm5  ;;  %v4842_v27 = vand.u32 2147483648, %v4797_v16  ;;  %v4840_v46 = vand.u32 2147483647, %v4797_v16  ;;  %vm4836_vm10 = vweird.f32 %v4797_v16 }
 0x7bf   :  { %v4818_v22 = vsub.f32 1.0, %v4817_v20  ;;  %5449 = vmatmul.f32.gmra.mxu2 %v5379_v21 }
 0x7c0   :  { %v4843_v52 = vor.u32 1.1754944e-38, %v4842_v27  ;;  %vm4841_vm12 = vcmp.eq.f32.partialorder %v4840_v46, 8.507059e+37 }
 0x7c1   :  { %v4819_v33 = vmul.f32 %v5843_v10, %v4818_v22 }
 0x7c3   :  { %v4820_v35 = vadd.f32 %v5843_v10, %v4819_v33 }
 0x7c4   :  { %v5845_v37 = vpop.eup %5844  ;;  %5538 = vmatmul.f32.gmra.mxu1 %v7058_v1 }
 0x7c5   :  { %v4824_v51 = vsel %vm4823_vm8, %v5843_v10, %v4820_v35  ;;  %v4832_v14 = vmul.f32 %v5845_v37, %v4797_v16  ;;  %vm4837_vm1 = vweird.f32 %v5845_v37 }
 0x7c6   :  { %v4829_v26 = vsel %vm4826_vm9, %v4828_v28, %v4824_v51  ;;  %vm4838_vm11 = vmor %vm4836_vm10, %vm4837_vm1 }
 0x7c7   :  { %v4830_v29 = vmul.f32 %v6980_v56, %v4829_v26  ;;  %v4833_v45 = vsub.f32 1.0, %v4832_v14 }
 0x7c9   :  { %v4834_v12 = vmul.f32 %v5845_v37, %v4833_v45  ;;  %v5543_v50 = vsel %vm62_vm0, %v4830_v29, 0 }
 0x7ca   :  { %v5566_v2 = vand.u32 4294901760, %v5543_v50 }
 0x7cb   :  { %v4835_v54 = vadd.f32 %v5845_v37, %v4834_v12 }
 0x7cc   :  { %5610 = vmatmul.f32.vlgmr.msra.gmra.mxu3 %v5566_v2  ;;  %v5567_v60 = vsub.f32 %v5543_v50, %v5566_v2 }
 0x7cd   :  { %v4839_v31 = vsel %vm4838_vm11, %v5845_v37, %v4835_v54 }
 0x7ce   :  { %v4844_v3 = vsel %vm4841_vm12, %v4843_v52, %v4839_v31  ;;  %5640 = vmatmul.f32.vlgmr.msrb.gmra.mxu0 %v5567_v60  ;;  %v5568_v4 = vand.u32 4294901760, %v5567_v60 }
 0x7cf   :  { %v4845_v56 = vmul.f32 %v6988_v30, %v4844_v3 }
 0x7d0   :  { %5670 = vmatmul.f32.vlgmr.msrb.gmra.mxu1 %v5568_v4  ;;  %v5569_v59 = vsub.f32 %v5567_v60, %v5568_v4 }
 0x7d1   :  { %v5546_v47 = vsel %vm62_vm0, %v4845_v56, 0 }
 0x7d2   :  { %v5570_v63 = vand.u32 4294901760, %v5569_v59  ;;  %v5574_v44 = vand.u32 4294901760, %v5546_v47 }
 0x7d4   :  { %5571 = vmatmul.f32.vlgmr.msra.gmra.mxu2 %v5570_v63  ;;  %5614 = vmatmul.f32.gmra.mxu3 %v5574_v44  ;;  %v5575_v43 = vsub.f32 %v5546_v47, %v5574_v44 }
 0x7d6   :  { %5645 = vmatmul.f32.gmra.mxu0 %v5575_v43  ;;  %v5576_v48 = vand.u32 4294901760, %v5575_v43  ;;  %v4972_v15 = vpop.f32.mrf.mxu0 }
 0x7d8   :  { %5676 = vmatmul.f32.gmra.mxu1 %v5576_v48  ;;  %v5577_v55 = vsub.f32 %v5575_v43, %v5576_v48 }
 0x7da   :  { %v5578_v40 = vand.u32 4294901760, %v5577_v55 }
 0x7dc   :  { %5579 = vmatmul.f32.gmra.mxu2 %v5578_v40  ;;  %5730 = vmatmul.f32.vlgmr.msrb.gmra.mxu3 %v5566_v2  ;;  %v5071_v39 = vpop.f32.mrf.mxu3 }
 0x7df   :  { %v5011_v7 = vpop.f32.mrf.mxu1  ;;  %v5041_v1 = vpop.f32.mrf.mxu2 }
 0x7e0   :  { %v5012_v30 = vadd.f32 %v5011_v7, %v4972_v15  ;;  %v4980_v38 = vpop.f32.mrf.mxu0 }
 0x7e2   :  { %v5042_v24 = vadd.f32 %v5041_v1, %v5012_v30 }
 0x7e4   :  { %5703 = vmatmul.f32.vlgmr.msrb.gmra.mxu2 %v5566_v2  ;;  %5734 = vmatmul.f32.gmra.mxu3 %v5574_v44  ;;  %v5072_v23 = vadd.f32 %v5071_v39, %v5042_v24 }
 0x7e6   :  { %v5077_v57 = vpop.f32.mrf.mxu3 }
 0x7e8   :  { %v5015_v6 = vpop.f32.mrf.mxu1  ;;  %v5046_v32 = vpop.f32.mrf.mxu2 }
 0x7e9   :  { %v5016_v0 = vadd.f32 %v5015_v6, %v4980_v38  ;;  %v5104_v18 = vpop.f32.mrf.mxu0 }
 0x7ea   :  { %v5105_v26 = vadd.f32 %v5104_v18, %v5072_v23 }
 0x7eb   :  { %v5047_v21 = vadd.f32 %v5046_v32, %v5016_v0 }
 0x7ec   :  { %5707 = vmatmul.f32.gmra.mxu2 %v5574_v44 }
 0x7ed   :  { %v5078_v13 = vadd.f32 %v5077_v57, %v5047_v21 }
 0x7ee   :  { %v5213_v41 = vpop.f32.mrf.mxu3 }
 0x7f0   :  { %v5131_v5 = vpop.f32.mrf.mxu1  ;;  %v5174_v9 = vpop.f32.mrf.mxu2 }
 0x7f1   :  { %v5108_v49 = vpop.f32.mrf.mxu0  ;;  %v5132_v27 = vadd.f32 %v5131_v5, %v5105_v26  ;;  %v5214_v3 = vadd.f32 %v5213_v41, %v5174_v9 }
 0x7f2   :  { %v5109_v2 = vadd.f32 %v5108_v49, %v5078_v13 }
 0x7f8   :  { %v5135_v62 = vpop.f32.mrf.mxu1 }
 0x7f9   :  { %v5243_v53 = vpop.f32.mrf.mxu0  ;;  %v5136_v4 = vadd.f32 %v5135_v62, %v5109_v2 }
 0x7fa   :  { %v5244_v59 = vadd.f32 %v5243_v53, %v5214_v3 }
 0x800   :  { %v5273_v25 = vpop.f32.mrf.mxu1 }
 0x801   :  { %v5274_v43 = vadd.f32 %v5273_v25, %v5244_v59 }
 0x816   :  { %v5248_v42 = vpop.f32.mrf.mxu0 }
 0x818   :  { %v5279_v11 = vpop.f32.mrf.mxu1 }
 0x81a   :  { %v5217_v61 = vpop.f32.mrf.mxu3 }
 0x821   :  { %v5376_v10 = vpop.f32.mrf.mxu0 }
 0x822   :  { %v5182_v17 = vpop.f32.mrf.mxu2  ;;  %v5333_v36 = vpop.f32.mrf.mxu3 }
 0x823   :  { %v5218_v48 = vadd.f32 %v5217_v61, %v5182_v17 }
 0x825   :  { %v5249_v24 = vadd.f32 %v5248_v42, %v5218_v48  ;;  %v5777_v42 = vld [vmem:[%s7110_s9] ss:$0 sm:$0xff] }
 0x827   :  { %v5280_v13 = vadd.f32 %v5279_v11, %v5249_v24 }
 0x829   :  { %v5415_v16 = vpop.f32.mrf.mxu1 }
 0x82a   :  { %v5306_v19 = vpop.f32.mrf.mxu2  ;;  %v7087_v8 = vpop.f32.mrf.mxu3  ;;  %v5416_v54 = vadd.f32 %v5415_v16, %v5376_v10 }
 0x82b   :  { %v5384_v58 = vpop.f32.mrf.mxu0  ;;  %v5307_v40 = vadd.f32 %v5306_v19, %v5274_v43  ;;  %v5745_v10 = vpop.permute.xlu2 %5744 }
 0x82d   :  { %v5334_v32 = vadd.f32 %v5333_v36, %v5307_v40 }
 0x831   :  { %v5419_v34 = vpop.f32.mrf.mxu1 }
 0x832   :  { %v5310_v20 = vpop.f32.mrf.mxu2  ;;  %v5420_v15 = vadd.f32 %v5419_v34, %v5384_v58 }
 0x833   :  { %v5475_v22 = vpop.f32.mrf.mxu3  ;;  %v5508_v37 = vpop.f32.mrf.mxu0  ;;  %v5311_v9 = vadd.f32 %v5310_v20, %v5280_v13 }
 0x835   :  { %v5338_v16 = vadd.f32 %v7087_v8, %v5311_v9 }
 0x839   :  { %v5535_v51 = vpop.f32.mrf.mxu1 }
 0x83a   :  { %v5445_v33 = vpop.f32.mrf.mxu2 }
 0x83b   :  { %v5481_v35 = vpop.f32.mrf.mxu3  ;;  %v5512_v29 = vpop.f32.mrf.mxu0  ;;  %v5446_v56 = vadd.f32 %v5445_v33, %v5416_v54 }
 0x83d   :  { %v5476_v55 = vadd.f32 %v5475_v22, %v5446_v56 }
 0x83f   :  { %v5509_v23 = vadd.f32 %v5508_v37, %v5476_v55  ;;  %v5747_v37 = vpop.permute.xlu1 %5746 }
 0x841   :  { %v5539_v46 = vpop.f32.mrf.mxu1  ;;  %v5536_v18 = vadd.f32 %v5535_v51, %v5509_v23 }
 0x842   :  { %v5450_v28 = vpop.f32.mrf.mxu2 }
 0x843   :  { %v5451_v38 = vadd.f32 %v5450_v28, %v5420_v15 }
 0x845   :  { %v5482_v5 = vadd.f32 %v5481_v35, %v5451_v38 }
 0x847   :  { %v5513_v53 = vadd.f32 %v5512_v29, %v5482_v5 }
 0x849   :  { %v5540_v58 = vadd.f32 %v5539_v46, %v5513_v53 }
 0x84b   :  { %v5641_v60 = vpop.f32.mrf.mxu0 }
 0x84d   :  { %v5671_v44 = vpop.f32.mrf.mxu1 }
 0x84f   :  { %v5611_v14 = vpop.f32.mrf.mxu3 }
 0x853   :  { %v5646_v0 = vpop.f32.mrf.mxu0 }
 0x855   :  { %v5677_v49 = vpop.f32.mrf.mxu1 }
 0x857   :  { %v5572_v45 = vpop.f32.mrf.mxu2  ;;  %v5615_v50 = vpop.f32.mrf.mxu3 }
 0x858   :  { %v5573_v12 = vadd.f32 %v5572_v45, %v5132_v27 }
 0x85a   :  { %v5612_v52 = vadd.f32 %v5611_v14, %v5573_v12 }
 0x85c   :  { %v5642_v63 = vadd.f32 %v5641_v60, %v5612_v52 }
 0x85e   :  { %v5672_v1 = vadd.f32 %v5671_v44, %v5642_v63 }
 0x85f   :  { %v5580_v31 = vpop.f32.mrf.mxu2  ;;  %v5731_v30 = vpop.f32.mrf.mxu3 }
 0x860   :  { %v5581_v47 = vadd.f32 %v5580_v31, %v5136_v4 }
 0x862   :  { %v5616_v7 = vadd.f32 %v5615_v50, %v5581_v47 }
 0x864   :  { %v5647_v57 = vadd.f32 %v5646_v0, %v5616_v7 }
 0x866   :  { %v5678_v61 = vadd.f32 %v5677_v49, %v5647_v57 }
 0x867   :  { %v5704_v39 = vpop.f32.mrf.mxu2  ;;  %v5735_v36 = vpop.f32.mrf.mxu3 }
 0x868   :  { %v5705_v6 = vadd.f32 %v5704_v39, %v5672_v1 }
 0x86a   :  { %v5732_v21 = vadd.f32 %v5731_v30, %v5705_v6 }
 0x86c   :  { %v5738_v41 = vadd.f32 %v5732_v21, %v5334_v32 }
 0x86e   :  { %v5740_v62 = vadd.f32 %v5738_v41, %v5536_v18 }
 0x86f   :  { %v5708_v17 = vpop.f32.mrf.mxu2 }
 0x870   :  { %v5742_v25 = vmul.f32 0.25, %v5740_v62  ;;  %v5709_v19 = vadd.f32 %v5708_v17, %v5678_v61 }
 0x872   :  { %v5750_v11 = vadd.f32 %v5745_v10, %v5742_v25  ;;  %v5736_v22 = vadd.f32 %v5735_v36, %v5709_v19 }
 0x874   :  { %v5755_v33 = vadd.f32 %v5777_v42, %v5750_v11  ;;  %v5739_v34 = vadd.f32 %v5736_v22, %v5338_v16 }
 0x876   :  { %5757 = vst.msk [vmem:[%s7111_s10] sm:$0xff] %vm2872_vm6, %v5755_v33  ;;  %v5741_v20 = vadd.f32 %v5739_v34, %v5540_v58 }
 0x878   :  { %v5743_v35 = vmul.f32 0.25, %v5741_v20 }
 0x87a   :  { %v5751_v28 = vadd.f32 %v5747_v37, %v5743_v35 }
 0x87c   :  { %v5756_v51 = vadd.f32 %v5777_v42, %v5751_v28 }
 0x87e   :  { %5758 = vst.msk [vmem:[%s7111_s10 + $0x8] sm:$0xff] %vm2872_vm6, %v5756_v51 }

</bundles_post_ra>
